<compile_context>
chip_gen: v7x
topology: tpu7x:2x2x1
jax: 0.10.0
libtpu: 0.0.40
codegen_flags: <defaults>
</compile_context>

<pallas_src>
import math

import numpy as np
import jax
import jax.numpy as jnp
from jax.experimental import pallas as pl
from jax.experimental.pallas import tpu as pltpu

LEAKY_SLOPE = 0.3
BN_EPS = 1e-5
C_DIM = 12
NUM_CH = 64
SCALE_FACTOR = 4.0                       # -> 2 upsampling stages
N_UP = int(math.log2(SCALE_FACTOR))      # 2
DOT_DTYPE = jnp.bfloat16                 # MXU inputs; accumulation stays f32


# ------------------------------- fused kernel --------------------------------

def generator_kernel(x_ref, w0_ref, b0_ref,
                     w1_ref, g1_ref, b1_ref,
                     w2_ref, g2_ref, b2_ref,
                     m1_ref, m2_ref,
                     wf_ref, bf_ref,
                     o_ref, pad_ref):
    """Whole Generator forward. All refs are full arrays resident in VMEM.

    pad_ref: (N, L_max + 8, NUM_CH) f32 scratch reused for in-kernel padding.
    """
    n, l0, _ = x_ref.shape

    def conv_same(x_nlc, w_kcc):
        """'same' Conv1d: x (n, l, cin), w (K, cin, cout) -> (n*l, cout) f32."""
        nn, ll, cin = x_nlc.shape
        k_taps = w_kcc.shape[0]
        pad = (k_taps - 1) // 2
        # zero-pad along length inside VMEM scratch (no XLA pad op)
        pad_ref[...] = jnp.zeros(pad_ref.shape, jnp.float32)
        pad_ref[:, pad:pad + ll, :cin] = x_nlc
        acc = None
        for k in range(k_taps):           # K tap-shifted MXU dots, f32 accum
            xs = pad_ref[:, k:k + ll, :cin].reshape(nn * ll, cin)
            part = jnp.dot(xs.astype(DOT_DTYPE),
                           w_kcc[k].astype(DOT_DTYPE),
                           preferred_element_type=jnp.float32)
            acc = part if acc is None else acc + part
        return acc                        # (nn*ll, cout)

    def batchnorm(y, gamma, beta):
        """Training-mode BN over (N,L) per channel; one-pass sum / sumsq."""
        m = y.shape[0]
        s = jnp.sum(y, axis=0, keepdims=True)
        ss = jnp.sum(y * y, axis=0, keepdims=True)
        mean = s * (1.0 / m)
        var = ss * (1.0 / m) - mean * mean          # biased variance
        inv = jax.lax.rsqrt(jnp.maximum(var, 0.0) + BN_EPS)
        return (y - mean) * (inv * gamma) + beta

    def lrelu(y):
        return jnp.where(y >= 0, y, LEAKY_SLOPE * y)

    def residual_block(h_flat, nn, ll, idx):
        h3 = h_flat.reshape(nn, ll, NUM_CH)
        y = conv_same(h3, w1_ref[idx])
        y = lrelu(batchnorm(y, g1_ref[idx], b1_ref[idx]))
        y3 = y.reshape(nn, ll, NUM_CH)
        z = conv_same(y3, w2_ref[idx])
        z = batchnorm(z, g2_ref[idx], b2_ref[idx])
        return z + h_flat

    def upsample2(h_flat, nn, ll, m_ref):
        """Linear interp (align_corners=True), scale 2, per-sample matmul."""
        h3 = h_flat.reshape(nn, ll, NUM_CH)
        m = m_ref[...]                               # (2*ll, ll) constant
        ups = [jnp.dot(m, h3[i], preferred_element_type=jnp.float32)
               for i in range(nn)]
        return jnp.concatenate(ups, axis=0)          # (nn*2*ll, NUM_CH)

    # ---- rand_block: Conv1d(c_dim -> 64, k=9, pad=4) + bias + LeakyReLU ----
    x = x_ref[...].astype(jnp.float32)
    h = conv_same(x, w0_ref[...]) + b0_ref[...]
    h = lrelu(h)                                     # (n*l0, NUM_CH)

    # ---- blocks: Res, (Up + Res) * 2 ----
    h = residual_block(h, n, l0, 0)
    h = upsample2(h, n, l0, m1_ref)
    h = residual_block(h, n, 2 * l0, 1)
    h = upsample2(h, n, 2 * l0, m2_ref)
    h = residual_block(h, n, 4 * l0, 2)

    # ---- final_block: Conv1d(64 -> c_dim, k=3, pad=1) + bias, tanh/2 ----
    h3 = h.reshape(n, 4 * l0, NUM_CH)
    y = conv_same(h3, wf_ref[...]) + bf_ref[...]
    y = jnp.tanh(y) * 0.5
    o_ref[...] = y.reshape(n, 4 * l0, C_DIM)


# ------------------------------- call wrapper ---------------------------------

@jax.jit
def generator_forward(x, params):
    """x: (N, L, C_DIM) f32 -> (N, L*SCALE_FACTOR, C_DIM) f32."""
    n, l, _ = x.shape
    l_out = int(l * SCALE_FACTOR)
    vmem = pl.BlockSpec(memory_space=pltpu.MemorySpace.VMEM)
    return pl.pallas_call(
        generator_kernel,
        out_shape=jax.ShapeDtypeStruct((n, l_out, C_DIM), jnp.float32),
        in_specs=[vmem] * 13,
        out_specs=vmem,
        scratch_shapes=[pltpu.VMEM((n, l_out + 8, NUM_CH), jnp.float32)],
    )(x, params['w0'], params['b0'],
      params['w1'], params['g1'], params['b1'],
      params['w2'], params['g2'], params['b2'],
      params['m1'], params['m2'],
      params['wf'], params['bf'])


# --------------------------- parameter handling --------------------------------

def init_params(key):
    """Deterministic synthetic parameters (shapes from the module __init__)."""
    keys = iter(jax.random.split(key, 32))

    def conv_w(k, cin, cout):
        # stored as (K, Cin, Cout) == transposed PyTorch (Cout, Cin, K)
        scale = 1.0 / math.sqrt(cin * k)
        return scale * jax.random.normal(next(keys), (k, cin, cout), jnp.float32)

    def vec(cout, base=0.0, amp=0.1):
        return base + amp * jax.random.normal(next(keys), (1, cout), jnp.float32)

    p = {
        'w0': conv_w(9, C_DIM, NUM_CH), 'b0': vec(NUM_CH),
        'wf': conv_w(3, NUM_CH, C_DIM), 'bf': vec(C_DIM),
    }
    w1, g1, b1, w2, g2, b2 = [], [], [], [], [], []
    for _ in range(1 + N_UP):            # ResidualBlock, then one per upsample
        w1.append(conv_w(3, NUM_CH, NUM_CH))
        g1.append(vec(NUM_CH, base=1.0)); b1.append(vec(NUM_CH))
        w2.append(conv_w(3, NUM_CH, NUM_CH))
        g2.append(vec(NUM_CH, base=1.0)); b2.append(vec(NUM_CH))
    p['w1'] = jnp.stack(w1); p['g1'] = jnp.stack(g1); p['b1'] = jnp.stack(b1)
    p['w2'] = jnp.stack(w2); p['g2'] = jnp.stack(g2); p['b2'] = jnp.stack(b2)
    return p


def upsample_matrix(l_in, scale=2):
    """Host-built constant (L_out x L_in) linear-interp matrix (align_corners=True)."""
    l_out = int(l_in * scale)
    m = np.zeros((l_out, l_in), np.float32)
    if l_out == 1:
        m[0, 0] = 1.0
        return jnp.asarray(m)
    pos = np.arange(l_out, dtype=np.float64) * (l_in - 1) / (l_out - 1)
    i0 = np.clip(np.floor(pos).astype(np.int64), 0, l_in - 1)
    lam = pos - i0
    i1 = np.minimum(i0 + 1, l_in - 1)
    for o in range(l_out):
        m[o, i0[o]] += 1.0 - lam[o]
        m[o, i1[o]] += lam[o]
    return jnp.asarray(m)


# ----------------------------------- main ---------------------------------------

if __name__ == "__main__":
    key = jax.random.PRNGKey(0)
    k_param, k_x = jax.random.split(key)

    params = init_params(k_param)

    N, L = 2, 16
    params['m1'] = upsample_matrix(L)          # 16 -> 32
    params['m2'] = upsample_matrix(2 * L)      # 32 -> 64

    x = jax.random.normal(k_x, (N, L, C_DIM), jnp.float32)   # NLC layout

    out = generator_forward(x, params)
    out = jax.block_until_ready(out)

    assert out.shape == (N, int(L * SCALE_FACTOR), C_DIM), out.shape
    assert bool(jnp.all(jnp.isfinite(out)))
    assert bool(jnp.all(jnp.abs(out) <= 0.5 + 1e-6))          # tanh(x)/2 range
    print("KERNEL_OK")
</pallas_src>

<mosaic_0001>
module attributes {stable_mosaic.version = 11 : i64} {
  func.func @generator_kernel(%arg0: memref<2x16x12xf32, #tpu.memory_space<vmem>>, %arg1: memref<9x12x64xf32, #tpu.memory_space<vmem>>, %arg2: memref<1x64xf32, #tpu.memory_space<vmem>>, %arg3: memref<3x3x64x64xf32, #tpu.memory_space<vmem>>, %arg4: memref<3x1x64xf32, #tpu.memory_space<vmem>>, %arg5: memref<3x1x64xf32, #tpu.memory_space<vmem>>, %arg6: memref<3x3x64x64xf32, #tpu.memory_space<vmem>>, %arg7: memref<3x1x64xf32, #tpu.memory_space<vmem>>, %arg8: memref<3x1x64xf32, #tpu.memory_space<vmem>>, %arg9: memref<32x16xf32, #tpu.memory_space<vmem>>, %arg10: memref<64x32xf32, #tpu.memory_space<vmem>>, %arg11: memref<3x64x12xf32, #tpu.memory_space<vmem>>, %arg12: memref<1x12xf32, #tpu.memory_space<vmem>>, %arg13: memref<2x64x12xf32, #tpu.memory_space<vmem>>, %arg14: memref<2x72x64xf32, #tpu.memory_space<vmem>>) attributes {dimension_semantics = [], scalar_prefetch = 0 : i64, scratch_operands = 1 : i64, tpu.core_type = #tpu.core_type<tc>} {
    %c0 = arith.constant 0 : index
    %c0_0 = arith.constant 0 : index
    %c0_1 = arith.constant 0 : index
    %0 = vector.load %arg0[%c0, %c0_0, %c0_1] : memref<2x16x12xf32, #tpu.memory_space<vmem>>, vector<2x16x12xf32>
    %c0_2 = arith.constant 0 : index
    %c0_3 = arith.constant 0 : index
    %c0_4 = arith.constant 0 : index
    %1 = vector.load %arg1[%c0_2, %c0_3, %c0_4] : memref<9x12x64xf32, #tpu.memory_space<vmem>>, vector<9x12x64xf32>
    %cst = arith.constant 0.000000e+00 : f32
    %2 = vector.broadcast %cst : f32 to vector<2x72x64xf32>
    %c0_5 = arith.constant 0 : index
    %c0_6 = arith.constant 0 : index
    %c0_7 = arith.constant 0 : index
    %3 = vector.load %arg14[%c0_5, %c0_6, %c0_7] : memref<2x72x64xf32, #tpu.memory_space<vmem>>, vector<2x72x64xf32>
    tpu.vector_store %arg14[%c0_5, %c0_6, %c0_7], %2 {strides = array<i32>} : memref<2x72x64xf32, #tpu.memory_space<vmem>>, vector<2x72x64xf32>,
    %c0_8 = arith.constant 0 : index
    %c4 = arith.constant 4 : index
    %c0_9 = arith.constant 0 : index
    %4 = vector.load %arg14[%c0_8, %c4, %c0_9] : memref<2x72x64xf32, #tpu.memory_space<vmem>>, vector<2x16x12xf32>
    tpu.vector_store %arg14[%c0_8, %c4, %c0_9], %0 {strides = array<i32>} : memref<2x72x64xf32, #tpu.memory_space<vmem>>, vector<2x16x12xf32>,
    %c0_10 = arith.constant 0 : index
    %c0_11 = arith.constant 0 : index
    %c0_12 = arith.constant 0 : index
    %5 = vector.load %arg14[%c0_10, %c0_11, %c0_12] : memref<2x72x64xf32, #tpu.memory_space<vmem>>, vector<2x16x12xf32>
    %6 = vector.shape_cast %5 : vector<2x16x12xf32> to vector<32x12xf32>
    %7 = arith.truncf %6 : vector<32x12xf32> to vector<32x12xbf16>
    %8 = vector.extract_strided_slice %1 {offsets = [0, 0, 0], sizes = [1, 12, 64], strides = [1, 1, 1]} : vector<9x12x64xf32> to vector<1x12x64xf32>
    %9 = vector.shape_cast %8 : vector<1x12x64xf32> to vector<12x64xf32>
    %10 = arith.truncf %9 : vector<12x64xf32> to vector<12x64xbf16>
    %cst_13 = arith.constant dense<0.000000e+00> : vector<32x64xf32>
    %11 = tpu.matmul %7, %10, %cst_13 {dimension_numbers = #tpu.dot_dimension_numbers<[1], [0], [0], [1], [0, 0, 1, 1], [], []>} : vector<32x12xbf16>, vector<12x64xbf16>, vector<32x64xf32> -> vector<32x64xf32>
    %c0_14 = arith.constant 0 : index
    %c1 = arith.constant 1 : index
    %c0_15 = arith.constant 0 : index
    %12 = vector.load %arg14[%c0_14, %c1, %c0_15] : memref<2x72x64xf32, #tpu.memory_space<vmem>>, vector<2x16x12xf32>
    %13 = vector.shape_cast %12 : vector<2x16x12xf32> to vector<32x12xf32>
    %14 = arith.truncf %13 : vector<32x12xf32> to vector<32x12xbf16>
    %15 = vector.extract_strided_slice %1 {offsets = [1, 0, 0], sizes = [1, 12, 64], strides = [1, 1, 1]} : vector<9x12x64xf32> to vector<1x12x64xf32>
    %16 = vector.shape_cast %15 : vector<1x12x64xf32> to vector<12x64xf32>
    %17 = arith.truncf %16 : vector<12x64xf32> to vector<12x64xbf16>
    %cst_16 = arith.constant dense<0.000000e+00> : vector<32x64xf32>
    %18 = tpu.matmul %14, %17, %cst_16 {dimension_numbers = #tpu.dot_dimension_numbers<[1], [0], [0], [1], [0, 0, 1, 1], [], []>} : vector<32x12xbf16>, vector<12x64xbf16>, vector<32x64xf32> -> vector<32x64xf32>
    %19 = arith.addf %11, %18 : vector<32x64xf32>
    %c0_17 = arith.constant 0 : index
    %c2 = arith.constant 2 : index
    %c0_18 = arith.constant 0 : index
    %20 = vector.load %arg14[%c0_17, %c2, %c0_18] : memref<2x72x64xf32, #tpu.memory_space<vmem>>, vector<2x16x12xf32>
    %21 = vector.shape_cast %20 : vector<2x16x12xf32> to vector<32x12xf32>
    %22 = arith.truncf %21 : vector<32x12xf32> to vector<32x12xbf16>
    %23 = vector.extract_strided_slice %1 {offsets = [2, 0, 0], sizes = [1, 12, 64], strides = [1, 1, 1]} : vector<9x12x64xf32> to vector<1x12x64xf32>
    %24 = vector.shape_cast %23 : vector<1x12x64xf32> to vector<12x64xf32>
    %25 = arith.truncf %24 : vector<12x64xf32> to vector<12x64xbf16>
    %cst_19 = arith.constant dense<0.000000e+00> : vector<32x64xf32>
    %26 = tpu.matmul %22, %25, %cst_19 {dimension_numbers = #tpu.dot_dimension_numbers<[1], [0], [0], [1], [0, 0, 1, 1], [], []>} : vector<32x12xbf16>, vector<12x64xbf16>, vector<32x64xf32> -> vector<32x64xf32>
    %27 = arith.addf %19, %26 : vector<32x64xf32>
    %c0_20 = arith.constant 0 : index
    %c3 = arith.constant 3 : index
    %c0_21 = arith.constant 0 : index
    %28 = vector.load %arg14[%c0_20, %c3, %c0_21] : memref<2x72x64xf32, #tpu.memory_space<vmem>>, vector<2x16x12xf32>
    %29 = vector.shape_cast %28 : vector<2x16x12xf32> to vector<32x12xf32>
    %30 = arith.truncf %29 : vector<32x12xf32> to vector<32x12xbf16>
    %31 = vector.extract_strided_slice %1 {offsets = [3, 0, 0], sizes = [1, 12, 64], strides = [1, 1, 1]} : vector<9x12x64xf32> to vector<1x12x64xf32>
    %32 = vector.shape_cast %31 : vector<1x12x64xf32> to vector<12x64xf32>
    %33 = arith.truncf %32 : vector<12x64xf32> to vector<12x64xbf16>
    %cst_22 = arith.constant dense<0.000000e+00> : vector<32x64xf32>
    %34 = tpu.matmul %30, %33, %cst_22 {dimension_numbers = #tpu.dot_dimension_numbers<[1], [0], [0], [1], [0, 0, 1, 1], [], []>} : vector<32x12xbf16>, vector<12x64xbf16>, vector<32x64xf32> -> vector<32x64xf32>
    %35 = arith.addf %27, %34 : vector<32x64xf32>
    %c0_23 = arith.constant 0 : index
    %c4_24 = arith.constant 4 : index
    %c0_25 = arith.constant 0 : index
    %36 = vector.load %arg14[%c0_23, %c4_24, %c0_25] : memref<2x72x64xf32, #tpu.memory_space<vmem>>, vector<2x16x12xf32>
    %37 = vector.shape_cast %36 : vector<2x16x12xf32> to vector<32x12xf32>
    %38 = arith.truncf %37 : vector<32x12xf32> to vector<32x12xbf16>
    %39 = vector.extract_strided_slice %1 {offsets = [4, 0, 0], sizes = [1, 12, 64], strides = [1, 1, 1]} : vector<9x12x64xf32> to vector<1x12x64xf32>
    %40 = vector.shape_cast %39 : vector<1x12x64xf32> to vector<12x64xf32>
    %41 = arith.truncf %40 : vector<12x64xf32> to vector<12x64xbf16>
    %cst_26 = arith.constant dense<0.000000e+00> : vector<32x64xf32>
    %42 = tpu.matmul %38, %41, %cst_26 {dimension_numbers = #tpu.dot_dimension_numbers<[1], [0], [0], [1], [0, 0, 1, 1], [], []>} : vector<32x12xbf16>, vector<12x64xbf16>, vector<32x64xf32> -> vector<32x64xf32>
    %43 = arith.addf %35, %42 : vector<32x64xf32>
    %c0_27 = arith.constant 0 : index
    %c5 = arith.constant 5 : index
    %c0_28 = arith.constant 0 : index
    %44 = vector.load %arg14[%c0_27, %c5, %c0_28] : memref<2x72x64xf32, #tpu.memory_space<vmem>>, vector<2x16x12xf32>
    %45 = vector.shape_cast %44 : vector<2x16x12xf32> to vector<32x12xf32>
    %46 = arith.truncf %45 : vector<32x12xf32> to vector<32x12xbf16>
    %47 = vector.extract_strided_slice %1 {offsets = [5, 0, 0], sizes = [1, 12, 64], strides = [1, 1, 1]} : vector<9x12x64xf32> to vector<1x12x64xf32>
    %48 = vector.shape_cast %47 : vector<1x12x64xf32> to vector<12x64xf32>
    %49 = arith.truncf %48 : vector<12x64xf32> to vector<12x64xbf16>
    %cst_29 = arith.constant dense<0.000000e+00> : vector<32x64xf32>
    %50 = tpu.matmul %46, %49, %cst_29 {dimension_numbers = #tpu.dot_dimension_numbers<[1], [0], [0], [1], [0, 0, 1, 1], [], []>} : vector<32x12xbf16>, vector<12x64xbf16>, vector<32x64xf32> -> vector<32x64xf32>
    %51 = arith.addf %43, %50 : vector<32x64xf32>
    %c0_30 = arith.constant 0 : index
    %c6 = arith.constant 6 : index
    %c0_31 = arith.constant 0 : index
    %52 = vector.load %arg14[%c0_30, %c6, %c0_31] : memref<2x72x64xf32, #tpu.memory_space<vmem>>, vector<2x16x12xf32>
    %53 = vector.shape_cast %52 : vector<2x16x12xf32> to vector<32x12xf32>
    %54 = arith.truncf %53 : vector<32x12xf32> to vector<32x12xbf16>
    %55 = vector.extract_strided_slice %1 {offsets = [6, 0, 0], sizes = [1, 12, 64], strides = [1, 1, 1]} : vector<9x12x64xf32> to vector<1x12x64xf32>
    %56 = vector.shape_cast %55 : vector<1x12x64xf32> to vector<12x64xf32>
    %57 = arith.truncf %56 : vector<12x64xf32> to vector<12x64xbf16>
    %cst_32 = arith.constant dense<0.000000e+00> : vector<32x64xf32>
    %58 = tpu.matmul %54, %57, %cst_32 {dimension_numbers = #tpu.dot_dimension_numbers<[1], [0], [0], [1], [0, 0, 1, 1], [], []>} : vector<32x12xbf16>, vector<12x64xbf16>, vector<32x64xf32> -> vector<32x64xf32>
    %59 = arith.addf %51, %58 : vector<32x64xf32>
    %c0_33 = arith.constant 0 : index
    %c7 = arith.constant 7 : index
    %c0_34 = arith.constant 0 : index
    %60 = vector.load %arg14[%c0_33, %c7, %c0_34] : memref<2x72x64xf32, #tpu.memory_space<vmem>>, vector<2x16x12xf32>
    %61 = vector.shape_cast %60 : vector<2x16x12xf32> to vector<32x12xf32>
    %62 = arith.truncf %61 : vector<32x12xf32> to vector<32x12xbf16>
    %63 = vector.extract_strided_slice %1 {offsets = [7, 0, 0], sizes = [1, 12, 64], strides = [1, 1, 1]} : vector<9x12x64xf32> to vector<1x12x64xf32>
    %64 = vector.shape_cast %63 : vector<1x12x64xf32> to vector<12x64xf32>
    %65 = arith.truncf %64 : vector<12x64xf32> to vector<12x64xbf16>
    %cst_35 = arith.constant dense<0.000000e+00> : vector<32x64xf32>
    %66 = tpu.matmul %62, %65, %cst_35 {dimension_numbers = #tpu.dot_dimension_numbers<[1], [0], [0], [1], [0, 0, 1, 1], [], []>} : vector<32x12xbf16>, vector<12x64xbf16>, vector<32x64xf32> -> vector<32x64xf32>
    %67 = arith.addf %59, %66 : vector<32x64xf32>
    %c0_36 = arith.constant 0 : index
    %c8 = arith.constant 8 : index
    %c0_37 = arith.constant 0 : index
    %68 = vector.load %arg14[%c0_36, %c8, %c0_37] : memref<2x72x64xf32, #tpu.memory_space<vmem>>, vector<2x16x12xf32>
    %69 = vector.shape_cast %68 : vector<2x16x12xf32> to vector<32x12xf32>
    %70 = arith.truncf %69 : vector<32x12xf32> to vector<32x12xbf16>
    %71 = vector.extract_strided_slice %1 {offsets = [8, 0, 0], sizes = [1, 12, 64], strides = [1, 1, 1]} : vector<9x12x64xf32> to vector<1x12x64xf32>
    %72 = vector.shape_cast %71 : vector<1x12x64xf32> to vector<12x64xf32>
    %73 = arith.truncf %72 : vector<12x64xf32> to vector<12x64xbf16>
    %cst_38 = arith.constant dense<0.000000e+00> : vector<32x64xf32>
    %74 = tpu.matmul %70, %73, %cst_38 {dimension_numbers = #tpu.dot_dimension_numbers<[1], [0], [0], [1], [0, 0, 1, 1], [], []>} : vector<32x12xbf16>, vector<12x64xbf16>, vector<32x64xf32> -> vector<32x64xf32>
    %75 = arith.addf %67, %74 : vector<32x64xf32>
    %c0_39 = arith.constant 0 : index
    %c0_40 = arith.constant 0 : index
    %76 = vector.load %arg2[%c0_39, %c0_40] : memref<1x64xf32, #tpu.memory_space<vmem>>, vector<1x64xf32>
    %77 = vector.broadcast %76 : vector<1x64xf32> to vector<32x64xf32>
    %78 = arith.addf %75, %77 : vector<32x64xf32>
    %cst_41 = arith.constant 0.000000e+00 : f32
    %79 = vector.broadcast %cst_41 : f32 to vector<32x64xf32>
    %80 = arith.cmpf oge, %78, %79 : vector<32x64xf32>
    %cst_42 = arith.constant 3.000000e-01 : f32
    %81 = vector.broadcast %cst_42 : f32 to vector<32x64xf32>
    %82 = arith.mulf %81, %78 : vector<32x64xf32>
    %83 = arith.select %80, %78, %82 : vector<32x64xi1>, vector<32x64xf32>
    %84 = vector.shape_cast %83 : vector<32x64xf32> to vector<2x16x64xf32>
    %c0_43 = arith.constant 0 : index
    %c0_44 = arith.constant 0 : index
    %c0_45 = arith.constant 0 : index
    %c0_46 = arith.constant 0 : index
    %85 = vector.load %arg3[%c0_43, %c0_44, %c0_45, %c0_46] : memref<3x3x64x64xf32, #tpu.memory_space<vmem>>, vector<1x3x64x64xf32>
    %86 = vector.shape_cast %85 : vector<1x3x64x64xf32> to vector<3x64x64xf32>
    %cst_47 = arith.constant 0.000000e+00 : f32
    %87 = vector.broadcast %cst_47 : f32 to vector<2x72x64xf32>
    %c0_48 = arith.constant 0 : index
    %c0_49 = arith.constant 0 : index
    %c0_50 = arith.constant 0 : index
    %88 = vector.load %arg14[%c0_48, %c0_49, %c0_50] : memref<2x72x64xf32, #tpu.memory_space<vmem>>, vector<2x72x64xf32>
    tpu.vector_store %arg14[%c0_48, %c0_49, %c0_50], %87 {strides = array<i32>} : memref<2x72x64xf32, #tpu.memory_space<vmem>>, vector<2x72x64xf32>,
    %c0_51 = arith.constant 0 : index
    %c1_52 = arith.constant 1 : index
    %c0_53 = arith.constant 0 : index
    %89 = vector.load %arg14[%c0_51, %c1_52, %c0_53] : memref<2x72x64xf32, #tpu.memory_space<vmem>>, vector<2x16x64xf32>
    tpu.vector_store %arg14[%c0_51, %c1_52, %c0_53], %84 {strides = array<i32>} : memref<2x72x64xf32, #tpu.memory_space<vmem>>, vector<2x16x64xf32>,
    %c0_54 = arith.constant 0 : index
    %c0_55 = arith.constant 0 : index
    %c0_56 = arith.constant 0 : index
    %90 = vector.load %arg14[%c0_54, %c0_55, %c0_56] : memref<2x72x64xf32, #tpu.memory_space<vmem>>, vector<2x16x64xf32>
    %91 = vector.shape_cast %90 : vector<2x16x64xf32> to vector<32x64xf32>
    %92 = arith.truncf %91 : vector<32x64xf32> to vector<32x64xbf16>
    %93 = vector.extract_strided_slice %86 {offsets = [0, 0, 0], sizes = [1, 64, 64], strides = [1, 1, 1]} : vector<3x64x64xf32> to vector<1x64x64xf32>
    %94 = vector.shape_cast %93 : vector<1x64x64xf32> to vector<64x64xf32>
    %95 = arith.truncf %94 : vector<64x64xf32> to vector<64x64xbf16>
    %cst_57 = arith.constant dense<0.000000e+00> : vector<32x64xf32>
    %96 = tpu.matmul %92, %95, %cst_57 {dimension_numbers = #tpu.dot_dimension_numbers<[1], [0], [0], [1], [0, 0, 1, 1], [], []>} : vector<32x64xbf16>, vector<64x64xbf16>, vector<32x64xf32> -> vector<32x64xf32>
    %c0_58 = arith.constant 0 : index
    %c1_59 = arith.constant 1 : index
    %c0_60 = arith.constant 0 : index
    %97 = vector.load %arg14[%c0_58, %c1_59, %c0_60] : memref<2x72x64xf32, #tpu.memory_space<vmem>>, vector<2x16x64xf32>
    %98 = vector.shape_cast %97 : vector<2x16x64xf32> to vector<32x64xf32>
    %99 = arith.truncf %98 : vector<32x64xf32> to vector<32x64xbf16>
    %100 = vector.extract_strided_slice %86 {offsets = [1, 0, 0], sizes = [1, 64, 64], strides = [1, 1, 1]} : vector<3x64x64xf32> to vector<1x64x64xf32>
    %101 = vector.shape_cast %100 : vector<1x64x64xf32> to vector<64x64xf32>
    %102 = arith.truncf %101 : vector<64x64xf32> to vector<64x64xbf16>
    %cst_61 = arith.constant dense<0.000000e+00> : vector<32x64xf32>
    %103 = tpu.matmul %99, %102, %cst_61 {dimension_numbers = #tpu.dot_dimension_numbers<[1], [0], [0], [1], [0, 0, 1, 1], [], []>} : vector<32x64xbf16>, vector<64x64xbf16>, vector<32x64xf32> -> vector<32x64xf32>
    %104 = arith.addf %96, %103 : vector<32x64xf32>
    %c0_62 = arith.constant 0 : index
    %c2_63 = arith.constant 2 : index
    %c0_64 = arith.constant 0 : index
    %105 = vector.load %arg14[%c0_62, %c2_63, %c0_64] : memref<2x72x64xf32, #tpu.memory_space<vmem>>, vector<2x16x64xf32>
    %106 = vector.shape_cast %105 : vector<2x16x64xf32> to vector<32x64xf32>
    %107 = arith.truncf %106 : vector<32x64xf32> to vector<32x64xbf16>
    %108 = vector.extract_strided_slice %86 {offsets = [2, 0, 0], sizes = [1, 64, 64], strides = [1, 1, 1]} : vector<3x64x64xf32> to vector<1x64x64xf32>
    %109 = vector.shape_cast %108 : vector<1x64x64xf32> to vector<64x64xf32>
    %110 = arith.truncf %109 : vector<64x64xf32> to vector<64x64xbf16>
    %cst_65 = arith.constant dense<0.000000e+00> : vector<32x64xf32>
    %111 = tpu.matmul %107, %110, %cst_65 {dimension_numbers = #tpu.dot_dimension_numbers<[1], [0], [0], [1], [0, 0, 1, 1], [], []>} : vector<32x64xbf16>, vector<64x64xbf16>, vector<32x64xf32> -> vector<32x64xf32>
    %112 = arith.addf %104, %111 : vector<32x64xf32>
    %c0_66 = arith.constant 0 : index
    %c0_67 = arith.constant 0 : index
    %c0_68 = arith.constant 0 : index
    %113 = vector.load %arg4[%c0_66, %c0_67, %c0_68] : memref<3x1x64xf32, #tpu.memory_space<vmem>>, vector<1x1x64xf32>
    %114 = vector.shape_cast %113 : vector<1x1x64xf32> to vector<1x64xf32>
    %c0_69 = arith.constant 0 : index
    %c0_70 = arith.constant 0 : index
    %c0_71 = arith.constant 0 : index
    %115 = vector.load %arg5[%c0_69, %c0_70, %c0_71] : memref<3x1x64xf32, #tpu.memory_space<vmem>>, vector<1x1x64xf32>
    %116 = vector.shape_cast %115 : vector<1x1x64xf32> to vector<1x64xf32>
    %cst_72 = arith.constant dense<0.000000e+00> : vector<64xf32>
    %117 = vector.multi_reduction <add>, %112, %cst_72 [0] : vector<32x64xf32> to vector<64xf32>
    %118 = vector.shape_cast %117 : vector<64xf32> to vector<1x64xf32>
    %119 = arith.mulf %112, %112 : vector<32x64xf32>
    %cst_73 = arith.constant dense<0.000000e+00> : vector<64xf32>
    %120 = vector.multi_reduction <add>, %119, %cst_73 [0] : vector<32x64xf32> to vector<64xf32>
    %121 = vector.shape_cast %120 : vector<64xf32> to vector<1x64xf32>
    %cst_74 = arith.constant 3.125000e-02 : f32
    %122 = vector.broadcast %cst_74 : f32 to vector<1x64xf32>
    %123 = arith.mulf %118, %122 : vector<1x64xf32>
    %cst_75 = arith.constant 3.125000e-02 : f32
    %124 = vector.broadcast %cst_75 : f32 to vector<1x64xf32>
    %125 = arith.mulf %121, %124 : vector<1x64xf32>
    %126 = arith.mulf %123, %123 : vector<1x64xf32>
    %127 = arith.subf %125, %126 : vector<1x64xf32>
    %cst_76 = arith.constant 0.000000e+00 : f32
    %128 = vector.broadcast %cst_76 : f32 to vector<1x64xf32>
    %129 = arith.maximumf %127, %128 : vector<1x64xf32>
    %cst_77 = arith.constant 9.99999974E-6 : f32
    %130 = vector.broadcast %cst_77 : f32 to vector<1x64xf32>
    %131 = arith.addf %129, %130 : vector<1x64xf32>
    %132 = math.rsqrt %131 : vector<1x64xf32>
    %133 = vector.broadcast %123 : vector<1x64xf32> to vector<32x64xf32>
    %134 = arith.subf %112, %133 : vector<32x64xf32>
    %135 = arith.mulf %132, %114 : vector<1x64xf32>
    %136 = vector.broadcast %135 : vector<1x64xf32> to vector<32x64xf32>
    %137 = arith.mulf %134, %136 : vector<32x64xf32>
    %138 = vector.broadcast %116 : vector<1x64xf32> to vector<32x64xf32>
    %139 = arith.addf %137, %138 : vector<32x64xf32>
    %cst_78 = arith.constant 0.000000e+00 : f32
    %140 = vector.broadcast %cst_78 : f32 to vector<32x64xf32>
    %141 = arith.cmpf oge, %139, %140 : vector<32x64xf32>
    %cst_79 = arith.constant 3.000000e-01 : f32
    %142 = vector.broadcast %cst_79 : f32 to vector<32x64xf32>
    %143 = arith.mulf %142, %139 : vector<32x64xf32>
    %144 = arith.select %141, %139, %143 : vector<32x64xi1>, vector<32x64xf32>
    %145 = vector.shape_cast %144 : vector<32x64xf32> to vector<2x16x64xf32>
    %c0_80 = arith.constant 0 : index
    %c0_81 = arith.constant 0 : index
    %c0_82 = arith.constant 0 : index
    %c0_83 = arith.constant 0 : index
    %146 = vector.load %arg6[%c0_80, %c0_81, %c0_82, %c0_83] : memref<3x3x64x64xf32, #tpu.memory_space<vmem>>, vector<1x3x64x64xf32>
    %147 = vector.shape_cast %146 : vector<1x3x64x64xf32> to vector<3x64x64xf32>
    %cst_84 = arith.constant 0.000000e+00 : f32
    %148 = vector.broadcast %cst_84 : f32 to vector<2x72x64xf32>
    %c0_85 = arith.constant 0 : index
    %c0_86 = arith.constant 0 : index
    %c0_87 = arith.constant 0 : index
    %149 = vector.load %arg14[%c0_85, %c0_86, %c0_87] : memref<2x72x64xf32, #tpu.memory_space<vmem>>, vector<2x72x64xf32>
    tpu.vector_store %arg14[%c0_85, %c0_86, %c0_87], %148 {strides = array<i32>} : memref<2x72x64xf32, #tpu.memory_space<vmem>>, vector<2x72x64xf32>,
    %c0_88 = arith.constant 0 : index
    %c1_89 = arith.constant 1 : index
    %c0_90 = arith.constant 0 : index
    %150 = vector.load %arg14[%c0_88, %c1_89, %c0_90] : memref<2x72x64xf32, #tpu.memory_space<vmem>>, vector<2x16x64xf32>
    tpu.vector_store %arg14[%c0_88, %c1_89, %c0_90], %145 {strides = array<i32>} : memref<2x72x64xf32, #tpu.memory_space<vmem>>, vector<2x16x64xf32>,
    %c0_91 = arith.constant 0 : index
    %c0_92 = arith.constant 0 : index
    %c0_93 = arith.constant 0 : index
    %151 = vector.load %arg14[%c0_91, %c0_92, %c0_93] : memref<2x72x64xf32, #tpu.memory_space<vmem>>, vector<2x16x64xf32>
    %152 = vector.shape_cast %151 : vector<2x16x64xf32> to vector<32x64xf32>
    %153 = arith.truncf %152 : vector<32x64xf32> to vector<32x64xbf16>
    %154 = vector.extract_strided_slice %147 {offsets = [0, 0, 0], sizes = [1, 64, 64], strides = [1, 1, 1]} : vector<3x64x64xf32> to vector<1x64x64xf32>
    %155 = vector.shape_cast %154 : vector<1x64x64xf32> to vector<64x64xf32>
    %156 = arith.truncf %155 : vector<64x64xf32> to vector<64x64xbf16>
    %cst_94 = arith.constant dense<0.000000e+00> : vector<32x64xf32>
    %157 = tpu.matmul %153, %156, %cst_94 {dimension_numbers = #tpu.dot_dimension_numbers<[1], [0], [0], [1], [0, 0, 1, 1], [], []>} : vector<32x64xbf16>, vector<64x64xbf16>, vector<32x64xf32> -> vector<32x64xf32>
    %c0_95 = arith.constant 0 : index
    %c1_96 = arith.constant 1 : index
    %c0_97 = arith.constant 0 : index
    %158 = vector.load %arg14[%c0_95, %c1_96, %c0_97] : memref<2x72x64xf32, #tpu.memory_space<vmem>>, vector<2x16x64xf32>
    %159 = vector.shape_cast %158 : vector<2x16x64xf32> to vector<32x64xf32>
    %160 = arith.truncf %159 : vector<32x64xf32> to vector<32x64xbf16>
    %161 = vector.extract_strided_slice %147 {offsets = [1, 0, 0], sizes = [1, 64, 64], strides = [1, 1, 1]} : vector<3x64x64xf32> to vector<1x64x64xf32>
    %162 = vector.shape_cast %161 : vector<1x64x64xf32> to vector<64x64xf32>
    %163 = arith.truncf %162 : vector<64x64xf32> to vector<64x64xbf16>
    %cst_98 = arith.constant dense<0.000000e+00> : vector<32x64xf32>
    %164 = tpu.matmul %160, %163, %cst_98 {dimension_numbers = #tpu.dot_dimension_numbers<[1], [0], [0], [1], [0, 0, 1, 1], [], []>} : vector<32x64xbf16>, vector<64x64xbf16>, vector<32x64xf32> -> vector<32x64xf32>
    %165 = arith.addf %157, %164 : vector<32x64xf32>
    %c0_99 = arith.constant 0 : index
    %c2_100 = arith.constant 2 : index
    %c0_101 = arith.constant 0 : index
    %166 = vector.load %arg14[%c0_99, %c2_100, %c0_101] : memref<2x72x64xf32, #tpu.memory_space<vmem>>, vector<2x16x64xf32>
    %167 = vector.shape_cast %166 : vector<2x16x64xf32> to vector<32x64xf32>
    %168 = arith.truncf %167 : vector<32x64xf32> to vector<32x64xbf16>
    %169 = vector.extract_strided_slice %147 {offsets = [2, 0, 0], sizes = [1, 64, 64], strides = [1, 1, 1]} : vector<3x64x64xf32> to vector<1x64x64xf32>
    %170 = vector.shape_cast %169 : vector<1x64x64xf32> to vector<64x64xf32>
    %171 = arith.truncf %170 : vector<64x64xf32> to vector<64x64xbf16>
    %cst_102 = arith.constant dense<0.000000e+00> : vector<32x64xf32>
    %172 = tpu.matmul %168, %171, %cst_102 {dimension_numbers = #tpu.dot_dimension_numbers<[1], [0], [0], [1], [0, 0, 1, 1], [], []>} : vector<32x64xbf16>, vector<64x64xbf16>, vector<32x64xf32> -> vector<32x64xf32>
    %173 = arith.addf %165, %172 : vector<32x64xf32>
    %c0_103 = arith.constant 0 : index
    %c0_104 = arith.constant 0 : index
    %c0_105 = arith.constant 0 : index
    %174 = vector.load %arg7[%c0_103, %c0_104, %c0_105] : memref<3x1x64xf32, #tpu.memory_space<vmem>>, vector<1x1x64xf32>
    %175 = vector.shape_cast %174 : vector<1x1x64xf32> to vector<1x64xf32>
    %c0_106 = arith.constant 0 : index
    %c0_107 = arith.constant 0 : index
    %c0_108 = arith.constant 0 : index
    %176 = vector.load %arg8[%c0_106, %c0_107, %c0_108] : memref<3x1x64xf32, #tpu.memory_space<vmem>>, vector<1x1x64xf32>
    %177 = vector.shape_cast %176 : vector<1x1x64xf32> to vector<1x64xf32>
    %cst_109 = arith.constant dense<0.000000e+00> : vector<64xf32>
    %178 = vector.multi_reduction <add>, %173, %cst_109 [0] : vector<32x64xf32> to vector<64xf32>
    %179 = vector.shape_cast %178 : vector<64xf32> to vector<1x64xf32>
    %180 = arith.mulf %173, %173 : vector<32x64xf32>
    %cst_110 = arith.constant dense<0.000000e+00> : vector<64xf32>
    %181 = vector.multi_reduction <add>, %180, %cst_110 [0] : vector<32x64xf32> to vector<64xf32>
    %182 = vector.shape_cast %181 : vector<64xf32> to vector<1x64xf32>
    %cst_111 = arith.constant 3.125000e-02 : f32
    %183 = vector.broadcast %cst_111 : f32 to vector<1x64xf32>
    %184 = arith.mulf %179, %183 : vector<1x64xf32>
    %cst_112 = arith.constant 3.125000e-02 : f32
    %185 = vector.broadcast %cst_112 : f32 to vector<1x64xf32>
    %186 = arith.mulf %182, %185 : vector<1x64xf32>
    %187 = arith.mulf %184, %184 : vector<1x64xf32>
    %188 = arith.subf %186, %187 : vector<1x64xf32>
    %cst_113 = arith.constant 0.000000e+00 : f32
    %189 = vector.broadcast %cst_113 : f32 to vector<1x64xf32>
    %190 = arith.maximumf %188, %189 : vector<1x64xf32>
    %cst_114 = arith.constant 9.99999974E-6 : f32
    %191 = vector.broadcast %cst_114 : f32 to vector<1x64xf32>
    %192 = arith.addf %190, %191 : vector<1x64xf32>
    %193 = math.rsqrt %192 : vector<1x64xf32>
    %194 = vector.broadcast %184 : vector<1x64xf32> to vector<32x64xf32>
    %195 = arith.subf %173, %194 : vector<32x64xf32>
    %196 = arith.mulf %193, %175 : vector<1x64xf32>
    %197 = vector.broadcast %196 : vector<1x64xf32> to vector<32x64xf32>
    %198 = arith.mulf %195, %197 : vector<32x64xf32>
    %199 = vector.broadcast %177 : vector<1x64xf32> to vector<32x64xf32>
    %200 = arith.addf %198, %199 : vector<32x64xf32>
    %201 = arith.addf %200, %83 : vector<32x64xf32>
    %202 = vector.shape_cast %201 : vector<32x64xf32> to vector<2x16x64xf32>
    %c0_115 = arith.constant 0 : index
    %c0_116 = arith.constant 0 : index
    %203 = vector.load %arg9[%c0_115, %c0_116] : memref<32x16xf32, #tpu.memory_space<vmem>>, vector<32x16xf32>
    %204 = vector.extract_strided_slice %202 {offsets = [0, 0, 0], sizes = [1, 16, 64], strides = [1, 1, 1]} : vector<2x16x64xf32> to vector<1x16x64xf32>
    %205 = vector.shape_cast %204 : vector<1x16x64xf32> to vector<16x64xf32>
    %cst_117 = arith.constant dense<0.000000e+00> : vector<32x64xf32>
    %206 = tpu.matmul %203, %205, %cst_117 {dimension_numbers = #tpu.dot_dimension_numbers<[1], [0], [0], [1], [0, 0, 1, 1], [], []>} : vector<32x16xf32>, vector<16x64xf32>, vector<32x64xf32> -> vector<32x64xf32>
    %207 = vector.extract_strided_slice %202 {offsets = [1, 0, 0], sizes = [1, 16, 64], strides = [1, 1, 1]} : vector<2x16x64xf32> to vector<1x16x64xf32>
    %208 = vector.shape_cast %207 : vector<1x16x64xf32> to vector<16x64xf32>
    %cst_118 = arith.constant dense<0.000000e+00> : vector<32x64xf32>
    %209 = tpu.matmul %203, %208, %cst_118 {dimension_numbers = #tpu.dot_dimension_numbers<[1], [0], [0], [1], [0, 0, 1, 1], [], []>} : vector<32x16xf32>, vector<16x64xf32>, vector<32x64xf32> -> vector<32x64xf32>
    %210 = tpu.concatenate %206, %209 in 0 : vector<32x64xf32>, vector<32x64xf32> -> vector<64x64xf32>
    %211 = vector.shape_cast %210 : vector<64x64xf32> to vector<2x32x64xf32>
    %c1_119 = arith.constant 1 : index
    %c0_120 = arith.constant 0 : index
    %c0_121 = arith.constant 0 : index
    %c0_122 = arith.constant 0 : index
    %212 = vector.load %arg3[%c1_119, %c0_120, %c0_121, %c0_122] : memref<3x3x64x64xf32, #tpu.memory_space<vmem>>, vector<1x3x64x64xf32>
    %213 = vector.shape_cast %212 : vector<1x3x64x64xf32> to vector<3x64x64xf32>
    %cst_123 = arith.constant 0.000000e+00 : f32
    %214 = vector.broadcast %cst_123 : f32 to vector<2x72x64xf32>
    %c0_124 = arith.constant 0 : index
    %c0_125 = arith.constant 0 : index
    %c0_126 = arith.constant 0 : index
    %215 = vector.load %arg14[%c0_124, %c0_125, %c0_126] : memref<2x72x64xf32, #tpu.memory_space<vmem>>, vector<2x72x64xf32>
    tpu.vector_store %arg14[%c0_124, %c0_125, %c0_126], %214 {strides = array<i32>} : memref<2x72x64xf32, #tpu.memory_space<vmem>>, vector<2x72x64xf32>,
    %c0_127 = arith.constant 0 : index
    %c1_128 = arith.constant 1 : index
    %c0_129 = arith.constant 0 : index
    %216 = vector.load %arg14[%c0_127, %c1_128, %c0_129] : memref<2x72x64xf32, #tpu.memory_space<vmem>>, vector<2x32x64xf32>
    tpu.vector_store %arg14[%c0_127, %c1_128, %c0_129], %211 {strides = array<i32>} : memref<2x72x64xf32, #tpu.memory_space<vmem>>, vector<2x32x64xf32>,
    %c0_130 = arith.constant 0 : index
    %c0_131 = arith.constant 0 : index
    %c0_132 = arith.constant 0 : index
    %217 = vector.load %arg14[%c0_130, %c0_131, %c0_132] : memref<2x72x64xf32, #tpu.memory_space<vmem>>, vector<2x32x64xf32>
    %218 = vector.shape_cast %217 : vector<2x32x64xf32> to vector<64x64xf32>
    %219 = arith.truncf %218 : vector<64x64xf32> to vector<64x64xbf16>
    %220 = vector.extract_strided_slice %213 {offsets = [0, 0, 0], sizes = [1, 64, 64], strides = [1, 1, 1]} : vector<3x64x64xf32> to vector<1x64x64xf32>
    %221 = vector.shape_cast %220 : vector<1x64x64xf32> to vector<64x64xf32>
    %222 = arith.truncf %221 : vector<64x64xf32> to vector<64x64xbf16>
    %cst_133 = arith.constant dense<0.000000e+00> : vector<64x64xf32>
    %223 = tpu.matmul %219, %222, %cst_133 {dimension_numbers = #tpu.dot_dimension_numbers<[1], [0], [0], [1], [0, 0, 1, 1], [], []>} : vector<64x64xbf16>, vector<64x64xbf16>, vector<64x64xf32> -> vector<64x64xf32>
    %c0_134 = arith.constant 0 : index
    %c1_135 = arith.constant 1 : index
    %c0_136 = arith.constant 0 : index
    %224 = vector.load %arg14[%c0_134, %c1_135, %c0_136] : memref<2x72x64xf32, #tpu.memory_space<vmem>>, vector<2x32x64xf32>
    %225 = vector.shape_cast %224 : vector<2x32x64xf32> to vector<64x64xf32>
    %226 = arith.truncf %225 : vector<64x64xf32> to vector<64x64xbf16>
    %227 = vector.extract_strided_slice %213 {offsets = [1, 0, 0], sizes = [1, 64, 64], strides = [1, 1, 1]} : vector<3x64x64xf32> to vector<1x64x64xf32>
    %228 = vector.shape_cast %227 : vector<1x64x64xf32> to vector<64x64xf32>
    %229 = arith.truncf %228 : vector<64x64xf32> to vector<64x64xbf16>
    %cst_137 = arith.constant dense<0.000000e+00> : vector<64x64xf32>
    %230 = tpu.matmul %226, %229, %cst_137 {dimension_numbers = #tpu.dot_dimension_numbers<[1], [0], [0], [1], [0, 0, 1, 1], [], []>} : vector<64x64xbf16>, vector<64x64xbf16>, vector<64x64xf32> -> vector<64x64xf32>
    %231 = arith.addf %223, %230 : vector<64x64xf32>
    %c0_138 = arith.constant 0 : index
    %c2_139 = arith.constant 2 : index
    %c0_140 = arith.constant 0 : index
    %232 = vector.load %arg14[%c0_138, %c2_139, %c0_140] : memref<2x72x64xf32, #tpu.memory_space<vmem>>, vector<2x32x64xf32>
    %233 = vector.shape_cast %232 : vector<2x32x64xf32> to vector<64x64xf32>
    %234 = arith.truncf %233 : vector<64x64xf32> to vector<64x64xbf16>
    %235 = vector.extract_strided_slice %213 {offsets = [2, 0, 0], sizes = [1, 64, 64], strides = [1, 1, 1]} : vector<3x64x64xf32> to vector<1x64x64xf32>
    %236 = vector.shape_cast %235 : vector<1x64x64xf32> to vector<64x64xf32>
    %237 = arith.truncf %236 : vector<64x64xf32> to vector<64x64xbf16>
    %cst_141 = arith.constant dense<0.000000e+00> : vector<64x64xf32>
    %238 = tpu.matmul %234, %237, %cst_141 {dimension_numbers = #tpu.dot_dimension_numbers<[1], [0], [0], [1], [0, 0, 1, 1], [], []>} : vector<64x64xbf16>, vector<64x64xbf16>, vector<64x64xf32> -> vector<64x64xf32>
    %239 = arith.addf %231, %238 : vector<64x64xf32>
    %c1_142 = arith.constant 1 : index
    %c0_143 = arith.constant 0 : index
    %c0_144 = arith.constant 0 : index
    %240 = vector.load %arg4[%c1_142, %c0_143, %c0_144] : memref<3x1x64xf32, #tpu.memory_space<vmem>>, vector<1x1x64xf32>
    %241 = vector.shape_cast %240 : vector<1x1x64xf32> to vector<1x64xf32>
    %c1_145 = arith.constant 1 : index
    %c0_146 = arith.constant 0 : index
    %c0_147 = arith.constant 0 : index
    %242 = vector.load %arg5[%c1_145, %c0_146, %c0_147] : memref<3x1x64xf32, #tpu.memory_space<vmem>>, vector<1x1x64xf32>
    %243 = vector.shape_cast %242 : vector<1x1x64xf32> to vector<1x64xf32>
    %cst_148 = arith.constant dense<0.000000e+00> : vector<64xf32>
    %244 = vector.multi_reduction <add>, %239, %cst_148 [0] : vector<64x64xf32> to vector<64xf32>
    %245 = vector.shape_cast %244 : vector<64xf32> to vector<1x64xf32>
    %246 = arith.mulf %239, %239 : vector<64x64xf32>
    %cst_149 = arith.constant dense<0.000000e+00> : vector<64xf32>
    %247 = vector.multi_reduction <add>, %246, %cst_149 [0] : vector<64x64xf32> to vector<64xf32>
    %248 = vector.shape_cast %247 : vector<64xf32> to vector<1x64xf32>
    %cst_150 = arith.constant 1.562500e-02 : f32
    %249 = vector.broadcast %cst_150 : f32 to vector<1x64xf32>
    %250 = arith.mulf %245, %249 : vector<1x64xf32>
    %cst_151 = arith.constant 1.562500e-02 : f32
    %251 = vector.broadcast %cst_151 : f32 to vector<1x64xf32>
    %252 = arith.mulf %248, %251 : vector<1x64xf32>
    %253 = arith.mulf %250, %250 : vector<1x64xf32>
    %254 = arith.subf %252, %253 : vector<1x64xf32>
    %cst_152 = arith.constant 0.000000e+00 : f32
    %255 = vector.broadcast %cst_152 : f32 to vector<1x64xf32>
    %256 = arith.maximumf %254, %255 : vector<1x64xf32>
    %cst_153 = arith.constant 9.99999974E-6 : f32
    %257 = vector.broadcast %cst_153 : f32 to vector<1x64xf32>
    %258 = arith.addf %256, %257 : vector<1x64xf32>
    %259 = math.rsqrt %258 : vector<1x64xf32>
    %260 = vector.broadcast %250 : vector<1x64xf32> to vector<64x64xf32>
    %261 = arith.subf %239, %260 : vector<64x64xf32>
    %262 = arith.mulf %259, %241 : vector<1x64xf32>
    %263 = vector.broadcast %262 : vector<1x64xf32> to vector<64x64xf32>
    %264 = arith.mulf %261, %263 : vector<64x64xf32>
    %265 = vector.broadcast %243 : vector<1x64xf32> to vector<64x64xf32>
    %266 = arith.addf %264, %265 : vector<64x64xf32>
    %cst_154 = arith.constant 0.000000e+00 : f32
    %267 = vector.broadcast %cst_154 : f32 to vector<64x64xf32>
    %268 = arith.cmpf oge, %266, %267 : vector<64x64xf32>
    %cst_155 = arith.constant 3.000000e-01 : f32
    %269 = vector.broadcast %cst_155 : f32 to vector<64x64xf32>
    %270 = arith.mulf %269, %266 : vector<64x64xf32>
    %271 = arith.select %268, %266, %270 : vector<64x64xi1>, vector<64x64xf32>
    %272 = vector.shape_cast %271 : vector<64x64xf32> to vector<2x32x64xf32>
    %c1_156 = arith.constant 1 : index
    %c0_157 = arith.constant 0 : index
    %c0_158 = arith.constant 0 : index
    %c0_159 = arith.constant 0 : index
    %273 = vector.load %arg6[%c1_156, %c0_157, %c0_158, %c0_159] : memref<3x3x64x64xf32, #tpu.memory_space<vmem>>, vector<1x3x64x64xf32>
    %274 = vector.shape_cast %273 : vector<1x3x64x64xf32> to vector<3x64x64xf32>
    %cst_160 = arith.constant 0.000000e+00 : f32
    %275 = vector.broadcast %cst_160 : f32 to vector<2x72x64xf32>
    %c0_161 = arith.constant 0 : index
    %c0_162 = arith.constant 0 : index
    %c0_163 = arith.constant 0 : index
    %276 = vector.load %arg14[%c0_161, %c0_162, %c0_163] : memref<2x72x64xf32, #tpu.memory_space<vmem>>, vector<2x72x64xf32>
    tpu.vector_store %arg14[%c0_161, %c0_162, %c0_163], %275 {strides = array<i32>} : memref<2x72x64xf32, #tpu.memory_space<vmem>>, vector<2x72x64xf32>,
    %c0_164 = arith.constant 0 : index
    %c1_165 = arith.constant 1 : index
    %c0_166 = arith.constant 0 : index
    %277 = vector.load %arg14[%c0_164, %c1_165, %c0_166] : memref<2x72x64xf32, #tpu.memory_space<vmem>>, vector<2x32x64xf32>
    tpu.vector_store %arg14[%c0_164, %c1_165, %c0_166], %272 {strides = array<i32>} : memref<2x72x64xf32, #tpu.memory_space<vmem>>, vector<2x32x64xf32>,
    %c0_167 = arith.constant 0 : index
    %c0_168 = arith.constant 0 : index
    %c0_169 = arith.constant 0 : index
    %278 = vector.load %arg14[%c0_167, %c0_168, %c0_169] : memref<2x72x64xf32, #tpu.memory_space<vmem>>, vector<2x32x64xf32>
    %279 = vector.shape_cast %278 : vector<2x32x64xf32> to vector<64x64xf32>
    %280 = arith.truncf %279 : vector<64x64xf32> to vector<64x64xbf16>
    %281 = vector.extract_strided_slice %274 {offsets = [0, 0, 0], sizes = [1, 64, 64], strides = [1, 1, 1]} : vector<3x64x64xf32> to vector<1x64x64xf32>
    %282 = vector.shape_cast %281 : vector<1x64x64xf32> to vector<64x64xf32>
    %283 = arith.truncf %282 : vector<64x64xf32> to vector<64x64xbf16>
    %cst_170 = arith.constant dense<0.000000e+00> : vector<64x64xf32>
    %284 = tpu.matmul %280, %283, %cst_170 {dimension_numbers = #tpu.dot_dimension_numbers<[1], [0], [0], [1], [0, 0, 1, 1], [], []>} : vector<64x64xbf16>, vector<64x64xbf16>, vector<64x64xf32> -> vector<64x64xf32>
    %c0_171 = arith.constant 0 : index
    %c1_172 = arith.constant 1 : index
    %c0_173 = arith.constant 0 : index
    %285 = vector.load %arg14[%c0_171, %c1_172, %c0_173] : memref<2x72x64xf32, #tpu.memory_space<vmem>>, vector<2x32x64xf32>
    %286 = vector.shape_cast %285 : vector<2x32x64xf32> to vector<64x64xf32>
    %287 = arith.truncf %286 : vector<64x64xf32> to vector<64x64xbf16>
    %288 = vector.extract_strided_slice %274 {offsets = [1, 0, 0], sizes = [1, 64, 64], strides = [1, 1, 1]} : vector<3x64x64xf32> to vector<1x64x64xf32>
    %289 = vector.shape_cast %288 : vector<1x64x64xf32> to vector<64x64xf32>
    %290 = arith.truncf %289 : vector<64x64xf32> to vector<64x64xbf16>
    %cst_174 = arith.constant dense<0.000000e+00> : vector<64x64xf32>
    %291 = tpu.matmul %287, %290, %cst_174 {dimension_numbers = #tpu.dot_dimension_numbers<[1], [0], [0], [1], [0, 0, 1, 1], [], []>} : vector<64x64xbf16>, vector<64x64xbf16>, vector<64x64xf32> -> vector<64x64xf32>
    %292 = arith.addf %284, %291 : vector<64x64xf32>
    %c0_175 = arith.constant 0 : index
    %c2_176 = arith.constant 2 : index
    %c0_177 = arith.constant 0 : index
    %293 = vector.load %arg14[%c0_175, %c2_176, %c0_177] : memref<2x72x64xf32, #tpu.memory_space<vmem>>, vector<2x32x64xf32>
    %294 = vector.shape_cast %293 : vector<2x32x64xf32> to vector<64x64xf32>
    %295 = arith.truncf %294 : vector<64x64xf32> to vector<64x64xbf16>
    %296 = vector.extract_strided_slice %274 {offsets = [2, 0, 0], sizes = [1, 64, 64], strides = [1, 1, 1]} : vector<3x64x64xf32> to vector<1x64x64xf32>
    %297 = vector.shape_cast %296 : vector<1x64x64xf32> to vector<64x64xf32>
    %298 = arith.truncf %297 : vector<64x64xf32> to vector<64x64xbf16>
    %cst_178 = arith.constant dense<0.000000e+00> : vector<64x64xf32>
    %299 = tpu.matmul %295, %298, %cst_178 {dimension_numbers = #tpu.dot_dimension_numbers<[1], [0], [0], [1], [0, 0, 1, 1], [], []>} : vector<64x64xbf16>, vector<64x64xbf16>, vector<64x64xf32> -> vector<64x64xf32>
    %300 = arith.addf %292, %299 : vector<64x64xf32>
    %c1_179 = arith.constant 1 : index
    %c0_180 = arith.constant 0 : index
    %c0_181 = arith.constant 0 : index
    %301 = vector.load %arg7[%c1_179, %c0_180, %c0_181] : memref<3x1x64xf32, #tpu.memory_space<vmem>>, vector<1x1x64xf32>
    %302 = vector.shape_cast %301 : vector<1x1x64xf32> to vector<1x64xf32>
    %c1_182 = arith.constant 1 : index
    %c0_183 = arith.constant 0 : index
    %c0_184 = arith.constant 0 : index
    %303 = vector.load %arg8[%c1_182, %c0_183, %c0_184] : memref<3x1x64xf32, #tpu.memory_space<vmem>>, vector<1x1x64xf32>
    %304 = vector.shape_cast %303 : vector<1x1x64xf32> to vector<1x64xf32>
    %cst_185 = arith.constant dense<0.000000e+00> : vector<64xf32>
    %305 = vector.multi_reduction <add>, %300, %cst_185 [0] : vector<64x64xf32> to vector<64xf32>
    %306 = vector.shape_cast %305 : vector<64xf32> to vector<1x64xf32>
    %307 = arith.mulf %300, %300 : vector<64x64xf32>
    %cst_186 = arith.constant dense<0.000000e+00> : vector<64xf32>
    %308 = vector.multi_reduction <add>, %307, %cst_186 [0] : vector<64x64xf32> to vector<64xf32>
    %309 = vector.shape_cast %308 : vector<64xf32> to vector<1x64xf32>
    %cst_187 = arith.constant 1.562500e-02 : f32
    %310 = vector.broadcast %cst_187 : f32 to vector<1x64xf32>
    %311 = arith.mulf %306, %310 : vector<1x64xf32>
    %cst_188 = arith.constant 1.562500e-02 : f32
    %312 = vector.broadcast %cst_188 : f32 to vector<1x64xf32>
    %313 = arith.mulf %309, %312 : vector<1x64xf32>
    %314 = arith.mulf %311, %311 : vector<1x64xf32>
    %315 = arith.subf %313, %314 : vector<1x64xf32>
    %cst_189 = arith.constant 0.000000e+00 : f32
    %316 = vector.broadcast %cst_189 : f32 to vector<1x64xf32>
    %317 = arith.maximumf %315, %316 : vector<1x64xf32>
    %cst_190 = arith.constant 9.99999974E-6 : f32
    %318 = vector.broadcast %cst_190 : f32 to vector<1x64xf32>
    %319 = arith.addf %317, %318 : vector<1x64xf32>
    %320 = math.rsqrt %319 : vector<1x64xf32>
    %321 = vector.broadcast %311 : vector<1x64xf32> to vector<64x64xf32>
    %322 = arith.subf %300, %321 : vector<64x64xf32>
    %323 = arith.mulf %320, %302 : vector<1x64xf32>
    %324 = vector.broadcast %323 : vector<1x64xf32> to vector<64x64xf32>
    %325 = arith.mulf %322, %324 : vector<64x64xf32>
    %326 = vector.broadcast %304 : vector<1x64xf32> to vector<64x64xf32>
    %327 = arith.addf %325, %326 : vector<64x64xf32>
    %328 = arith.addf %327, %210 : vector<64x64xf32>
    %329 = vector.shape_cast %328 : vector<64x64xf32> to vector<2x32x64xf32>
    %c0_191 = arith.constant 0 : index
    %c0_192 = arith.constant 0 : index
    %330 = vector.load %arg10[%c0_191, %c0_192] : memref<64x32xf32, #tpu.memory_space<vmem>>, vector<64x32xf32>
    %331 = vector.extract_strided_slice %329 {offsets = [0, 0, 0], sizes = [1, 32, 64], strides = [1, 1, 1]} : vector<2x32x64xf32> to vector<1x32x64xf32>
    %332 = vector.shape_cast %331 : vector<1x32x64xf32> to vector<32x64xf32>
    %cst_193 = arith.constant dense<0.000000e+00> : vector<64x64xf32>
    %333 = tpu.matmul %330, %332, %cst_193 {dimension_numbers = #tpu.dot_dimension_numbers<[1], [0], [0], [1], [0, 0, 1, 1], [], []>} : vector<64x32xf32>, vector<32x64xf32>, vector<64x64xf32> -> vector<64x64xf32>
    %334 = vector.extract_strided_slice %329 {offsets = [1, 0, 0], sizes = [1, 32, 64], strides = [1, 1, 1]} : vector<2x32x64xf32> to vector<1x32x64xf32>
    %335 = vector.shape_cast %334 : vector<1x32x64xf32> to vector<32x64xf32>
    %cst_194 = arith.constant dense<0.000000e+00> : vector<64x64xf32>
    %336 = tpu.matmul %330, %335, %cst_194 {dimension_numbers = #tpu.dot_dimension_numbers<[1], [0], [0], [1], [0, 0, 1, 1], [], []>} : vector<64x32xf32>, vector<32x64xf32>, vector<64x64xf32> -> vector<64x64xf32>
    %337 = tpu.concatenate %333, %336 in 0 : vector<64x64xf32>, vector<64x64xf32> -> vector<128x64xf32>
    %338 = vector.shape_cast %337 : vector<128x64xf32> to vector<2x64x64xf32>
    %c2_195 = arith.constant 2 : index
    %c0_196 = arith.constant 0 : index
    %c0_197 = arith.constant 0 : index
    %c0_198 = arith.constant 0 : index
    %339 = vector.load %arg3[%c2_195, %c0_196, %c0_197, %c0_198] : memref<3x3x64x64xf32, #tpu.memory_space<vmem>>, vector<1x3x64x64xf32>
    %340 = vector.shape_cast %339 : vector<1x3x64x64xf32> to vector<3x64x64xf32>
    %cst_199 = arith.constant 0.000000e+00 : f32
    %341 = vector.broadcast %cst_199 : f32 to vector<2x72x64xf32>
    %c0_200 = arith.constant 0 : index
    %c0_201 = arith.constant 0 : index
    %c0_202 = arith.constant 0 : index
    %342 = vector.load %arg14[%c0_200, %c0_201, %c0_202] : memref<2x72x64xf32, #tpu.memory_space<vmem>>, vector<2x72x64xf32>
    tpu.vector_store %arg14[%c0_200, %c0_201, %c0_202], %341 {strides = array<i32>} : memref<2x72x64xf32, #tpu.memory_space<vmem>>, vector<2x72x64xf32>,
    %c0_203 = arith.constant 0 : index
    %c1_204 = arith.constant 1 : index
    %c0_205 = arith.constant 0 : index
    %343 = vector.load %arg14[%c0_203, %c1_204, %c0_205] : memref<2x72x64xf32, #tpu.memory_space<vmem>>, vector<2x64x64xf32>
    tpu.vector_store %arg14[%c0_203, %c1_204, %c0_205], %338 {strides = array<i32>} : memref<2x72x64xf32, #tpu.memory_space<vmem>>, vector<2x64x64xf32>,
    %c0_206 = arith.constant 0 : index
    %c0_207 = arith.constant 0 : index
    %c0_208 = arith.constant 0 : index
    %344 = vector.load %arg14[%c0_206, %c0_207, %c0_208] : memref<2x72x64xf32, #tpu.memory_space<vmem>>, vector<2x64x64xf32>
    %345 = vector.shape_cast %344 : vector<2x64x64xf32> to vector<128x64xf32>
    %346 = arith.truncf %345 : vector<128x64xf32> to vector<128x64xbf16>
    %347 = vector.extract_strided_slice %340 {offsets = [0, 0, 0], sizes = [1, 64, 64], strides = [1, 1, 1]} : vector<3x64x64xf32> to vector<1x64x64xf32>
    %348 = vector.shape_cast %347 : vector<1x64x64xf32> to vector<64x64xf32>
    %349 = arith.truncf %348 : vector<64x64xf32> to vector<64x64xbf16>
    %cst_209 = arith.constant dense<0.000000e+00> : vector<128x64xf32>
    %350 = tpu.matmul %346, %349, %cst_209 {dimension_numbers = #tpu.dot_dimension_numbers<[1], [0], [0], [1], [0, 0, 1, 1], [], []>} : vector<128x64xbf16>, vector<64x64xbf16>, vector<128x64xf32> -> vector<128x64xf32>
    %c0_210 = arith.constant 0 : index
    %c1_211 = arith.constant 1 : index
    %c0_212 = arith.constant 0 : index
    %351 = vector.load %arg14[%c0_210, %c1_211, %c0_212] : memref<2x72x64xf32, #tpu.memory_space<vmem>>, vector<2x64x64xf32>
    %352 = vector.shape_cast %351 : vector<2x64x64xf32> to vector<128x64xf32>
    %353 = arith.truncf %352 : vector<128x64xf32> to vector<128x64xbf16>
    %354 = vector.extract_strided_slice %340 {offsets = [1, 0, 0], sizes = [1, 64, 64], strides = [1, 1, 1]} : vector<3x64x64xf32> to vector<1x64x64xf32>
    %355 = vector.shape_cast %354 : vector<1x64x64xf32> to vector<64x64xf32>
    %356 = arith.truncf %355 : vector<64x64xf32> to vector<64x64xbf16>
    %cst_213 = arith.constant dense<0.000000e+00> : vector<128x64xf32>
    %357 = tpu.matmul %353, %356, %cst_213 {dimension_numbers = #tpu.dot_dimension_numbers<[1], [0], [0], [1], [0, 0, 1, 1], [], []>} : vector<128x64xbf16>, vector<64x64xbf16>, vector<128x64xf32> -> vector<128x64xf32>
    %358 = arith.addf %350, %357 : vector<128x64xf32>
    %c0_214 = arith.constant 0 : index
    %c2_215 = arith.constant 2 : index
    %c0_216 = arith.constant 0 : index
    %359 = vector.load %arg14[%c0_214, %c2_215, %c0_216] : memref<2x72x64xf32, #tpu.memory_space<vmem>>, vector<2x64x64xf32>
    %360 = vector.shape_cast %359 : vector<2x64x64xf32> to vector<128x64xf32>
    %361 = arith.truncf %360 : vector<128x64xf32> to vector<128x64xbf16>
    %362 = vector.extract_strided_slice %340 {offsets = [2, 0, 0], sizes = [1, 64, 64], strides = [1, 1, 1]} : vector<3x64x64xf32> to vector<1x64x64xf32>
    %363 = vector.shape_cast %362 : vector<1x64x64xf32> to vector<64x64xf32>
    %364 = arith.truncf %363 : vector<64x64xf32> to vector<64x64xbf16>
    %cst_217 = arith.constant dense<0.000000e+00> : vector<128x64xf32>
    %365 = tpu.matmul %361, %364, %cst_217 {dimension_numbers = #tpu.dot_dimension_numbers<[1], [0], [0], [1], [0, 0, 1, 1], [], []>} : vector<128x64xbf16>, vector<64x64xbf16>, vector<128x64xf32> -> vector<128x64xf32>
    %366 = arith.addf %358, %365 : vector<128x64xf32>
    %c2_218 = arith.constant 2 : index
    %c0_219 = arith.constant 0 : index
    %c0_220 = arith.constant 0 : index
    %367 = vector.load %arg4[%c2_218, %c0_219, %c0_220] : memref<3x1x64xf32, #tpu.memory_space<vmem>>, vector<1x1x64xf32>
    %368 = vector.shape_cast %367 : vector<1x1x64xf32> to vector<1x64xf32>
    %c2_221 = arith.constant 2 : index
    %c0_222 = arith.constant 0 : index
    %c0_223 = arith.constant 0 : index
    %369 = vector.load %arg5[%c2_221, %c0_222, %c0_223] : memref<3x1x64xf32, #tpu.memory_space<vmem>>, vector<1x1x64xf32>
    %370 = vector.shape_cast %369 : vector<1x1x64xf32> to vector<1x64xf32>
    %cst_224 = arith.constant dense<0.000000e+00> : vector<64xf32>
    %371 = vector.multi_reduction <add>, %366, %cst_224 [0] : vector<128x64xf32> to vector<64xf32>
    %372 = vector.shape_cast %371 : vector<64xf32> to vector<1x64xf32>
    %373 = arith.mulf %366, %366 : vector<128x64xf32>
    %cst_225 = arith.constant dense<0.000000e+00> : vector<64xf32>
    %374 = vector.multi_reduction <add>, %373, %cst_225 [0] : vector<128x64xf32> to vector<64xf32>
    %375 = vector.shape_cast %374 : vector<64xf32> to vector<1x64xf32>
    %cst_226 = arith.constant 7.812500e-03 : f32
    %376 = vector.broadcast %cst_226 : f32 to vector<1x64xf32>
    %377 = arith.mulf %372, %376 : vector<1x64xf32>
    %cst_227 = arith.constant 7.812500e-03 : f32
    %378 = vector.broadcast %cst_227 : f32 to vector<1x64xf32>
    %379 = arith.mulf %375, %378 : vector<1x64xf32>
    %380 = arith.mulf %377, %377 : vector<1x64xf32>
    %381 = arith.subf %379, %380 : vector<1x64xf32>
    %cst_228 = arith.constant 0.000000e+00 : f32
    %382 = vector.broadcast %cst_228 : f32 to vector<1x64xf32>
    %383 = arith.maximumf %381, %382 : vector<1x64xf32>
    %cst_229 = arith.constant 9.99999974E-6 : f32
    %384 = vector.broadcast %cst_229 : f32 to vector<1x64xf32>
    %385 = arith.addf %383, %384 : vector<1x64xf32>
    %386 = math.rsqrt %385 : vector<1x64xf32>
    %387 = vector.broadcast %377 : vector<1x64xf32> to vector<128x64xf32>
    %388 = arith.subf %366, %387 : vector<128x64xf32>
    %389 = arith.mulf %386, %368 : vector<1x64xf32>
    %390 = vector.broadcast %389 : vector<1x64xf32> to vector<128x64xf32>
    %391 = arith.mulf %388, %390 : vector<128x64xf32>
    %392 = vector.broadcast %370 : vector<1x64xf32> to vector<128x64xf32>
    %393 = arith.addf %391, %392 : vector<128x64xf32>
    %cst_230 = arith.constant 0.000000e+00 : f32
    %394 = vector.broadcast %cst_230 : f32 to vector<128x64xf32>
    %395 = arith.cmpf oge, %393, %394 : vector<128x64xf32>
    %cst_231 = arith.constant 3.000000e-01 : f32
    %396 = vector.broadcast %cst_231 : f32 to vector<128x64xf32>
    %397 = arith.mulf %396, %393 : vector<128x64xf32>
    %398 = arith.select %395, %393, %397 : vector<128x64xi1>, vector<128x64xf32>
    %399 = vector.shape_cast %398 : vector<128x64xf32> to vector<2x64x64xf32>
    %c2_232 = arith.constant 2 : index
    %c0_233 = arith.constant 0 : index
    %c0_234 = arith.constant 0 : index
    %c0_235 = arith.constant 0 : index
    %400 = vector.load %arg6[%c2_232, %c0_233, %c0_234, %c0_235] : memref<3x3x64x64xf32, #tpu.memory_space<vmem>>, vector<1x3x64x64xf32>
    %401 = vector.shape_cast %400 : vector<1x3x64x64xf32> to vector<3x64x64xf32>
    %cst_236 = arith.constant 0.000000e+00 : f32
    %402 = vector.broadcast %cst_236 : f32 to vector<2x72x64xf32>
    %c0_237 = arith.constant 0 : index
    %c0_238 = arith.constant 0 : index
    %c0_239 = arith.constant 0 : index
    %403 = vector.load %arg14[%c0_237, %c0_238, %c0_239] : memref<2x72x64xf32, #tpu.memory_space<vmem>>, vector<2x72x64xf32>
    tpu.vector_store %arg14[%c0_237, %c0_238, %c0_239], %402 {strides = array<i32>} : memref<2x72x64xf32, #tpu.memory_space<vmem>>, vector<2x72x64xf32>,
    %c0_240 = arith.constant 0 : index
    %c1_241 = arith.constant 1 : index
    %c0_242 = arith.constant 0 : index
    %404 = vector.load %arg14[%c0_240, %c1_241, %c0_242] : memref<2x72x64xf32, #tpu.memory_space<vmem>>, vector<2x64x64xf32>
    tpu.vector_store %arg14[%c0_240, %c1_241, %c0_242], %399 {strides = array<i32>} : memref<2x72x64xf32, #tpu.memory_space<vmem>>, vector<2x64x64xf32>,
    %c0_243 = arith.constant 0 : index
    %c0_244 = arith.constant 0 : index
    %c0_245 = arith.constant 0 : index
    %405 = vector.load %arg14[%c0_243, %c0_244, %c0_245] : memref<2x72x64xf32, #tpu.memory_space<vmem>>, vector<2x64x64xf32>
    %406 = vector.shape_cast %405 : vector<2x64x64xf32> to vector<128x64xf32>
    %407 = arith.truncf %406 : vector<128x64xf32> to vector<128x64xbf16>
    %408 = vector.extract_strided_slice %401 {offsets = [0, 0, 0], sizes = [1, 64, 64], strides = [1, 1, 1]} : vector<3x64x64xf32> to vector<1x64x64xf32>
    %409 = vector.shape_cast %408 : vector<1x64x64xf32> to vector<64x64xf32>
    %410 = arith.truncf %409 : vector<64x64xf32> to vector<64x64xbf16>
    %cst_246 = arith.constant dense<0.000000e+00> : vector<128x64xf32>
    %411 = tpu.matmul %407, %410, %cst_246 {dimension_numbers = #tpu.dot_dimension_numbers<[1], [0], [0], [1], [0, 0, 1, 1], [], []>} : vector<128x64xbf16>, vector<64x64xbf16>, vector<128x64xf32> -> vector<128x64xf32>
    %c0_247 = arith.constant 0 : index
    %c1_248 = arith.constant 1 : index
    %c0_249 = arith.constant 0 : index
    %412 = vector.load %arg14[%c0_247, %c1_248, %c0_249] : memref<2x72x64xf32, #tpu.memory_space<vmem>>, vector<2x64x64xf32>
    %413 = vector.shape_cast %412 : vector<2x64x64xf32> to vector<128x64xf32>
    %414 = arith.truncf %413 : vector<128x64xf32> to vector<128x64xbf16>
    %415 = vector.extract_strided_slice %401 {offsets = [1, 0, 0], sizes = [1, 64, 64], strides = [1, 1, 1]} : vector<3x64x64xf32> to vector<1x64x64xf32>
    %416 = vector.shape_cast %415 : vector<1x64x64xf32> to vector<64x64xf32>
    %417 = arith.truncf %416 : vector<64x64xf32> to vector<64x64xbf16>
    %cst_250 = arith.constant dense<0.000000e+00> : vector<128x64xf32>
    %418 = tpu.matmul %414, %417, %cst_250 {dimension_numbers = #tpu.dot_dimension_numbers<[1], [0], [0], [1], [0, 0, 1, 1], [], []>} : vector<128x64xbf16>, vector<64x64xbf16>, vector<128x64xf32> -> vector<128x64xf32>
    %419 = arith.addf %411, %418 : vector<128x64xf32>
    %c0_251 = arith.constant 0 : index
    %c2_252 = arith.constant 2 : index
    %c0_253 = arith.constant 0 : index
    %420 = vector.load %arg14[%c0_251, %c2_252, %c0_253] : memref<2x72x64xf32, #tpu.memory_space<vmem>>, vector<2x64x64xf32>
    %421 = vector.shape_cast %420 : vector<2x64x64xf32> to vector<128x64xf32>
    %422 = arith.truncf %421 : vector<128x64xf32> to vector<128x64xbf16>
    %423 = vector.extract_strided_slice %401 {offsets = [2, 0, 0], sizes = [1, 64, 64], strides = [1, 1, 1]} : vector<3x64x64xf32> to vector<1x64x64xf32>
    %424 = vector.shape_cast %423 : vector<1x64x64xf32> to vector<64x64xf32>
    %425 = arith.truncf %424 : vector<64x64xf32> to vector<64x64xbf16>
    %cst_254 = arith.constant dense<0.000000e+00> : vector<128x64xf32>
    %426 = tpu.matmul %422, %425, %cst_254 {dimension_numbers = #tpu.dot_dimension_numbers<[1], [0], [0], [1], [0, 0, 1, 1], [], []>} : vector<128x64xbf16>, vector<64x64xbf16>, vector<128x64xf32> -> vector<128x64xf32>
    %427 = arith.addf %419, %426 : vector<128x64xf32>
    %c2_255 = arith.constant 2 : index
    %c0_256 = arith.constant 0 : index
    %c0_257 = arith.constant 0 : index
    %428 = vector.load %arg7[%c2_255, %c0_256, %c0_257] : memref<3x1x64xf32, #tpu.memory_space<vmem>>, vector<1x1x64xf32>
    %429 = vector.shape_cast %428 : vector<1x1x64xf32> to vector<1x64xf32>
    %c2_258 = arith.constant 2 : index
    %c0_259 = arith.constant 0 : index
    %c0_260 = arith.constant 0 : index
    %430 = vector.load %arg8[%c2_258, %c0_259, %c0_260] : memref<3x1x64xf32, #tpu.memory_space<vmem>>, vector<1x1x64xf32>
    %431 = vector.shape_cast %430 : vector<1x1x64xf32> to vector<1x64xf32>
    %cst_261 = arith.constant dense<0.000000e+00> : vector<64xf32>
    %432 = vector.multi_reduction <add>, %427, %cst_261 [0] : vector<128x64xf32> to vector<64xf32>
    %433 = vector.shape_cast %432 : vector<64xf32> to vector<1x64xf32>
    %434 = arith.mulf %427, %427 : vector<128x64xf32>
    %cst_262 = arith.constant dense<0.000000e+00> : vector<64xf32>
    %435 = vector.multi_reduction <add>, %434, %cst_262 [0] : vector<128x64xf32> to vector<64xf32>
    %436 = vector.shape_cast %435 : vector<64xf32> to vector<1x64xf32>
    %cst_263 = arith.constant 7.812500e-03 : f32
    %437 = vector.broadcast %cst_263 : f32 to vector<1x64xf32>
    %438 = arith.mulf %433, %437 : vector<1x64xf32>
    %cst_264 = arith.constant 7.812500e-03 : f32
    %439 = vector.broadcast %cst_264 : f32 to vector<1x64xf32>
    %440 = arith.mulf %436, %439 : vector<1x64xf32>
    %441 = arith.mulf %438, %438 : vector<1x64xf32>
    %442 = arith.subf %440, %441 : vector<1x64xf32>
    %cst_265 = arith.constant 0.000000e+00 : f32
    %443 = vector.broadcast %cst_265 : f32 to vector<1x64xf32>
    %444 = arith.maximumf %442, %443 : vector<1x64xf32>
    %cst_266 = arith.constant 9.99999974E-6 : f32
    %445 = vector.broadcast %cst_266 : f32 to vector<1x64xf32>
    %446 = arith.addf %444, %445 : vector<1x64xf32>
    %447 = math.rsqrt %446 : vector<1x64xf32>
    %448 = vector.broadcast %438 : vector<1x64xf32> to vector<128x64xf32>
    %449 = arith.subf %427, %448 : vector<128x64xf32>
    %450 = arith.mulf %447, %429 : vector<1x64xf32>
    %451 = vector.broadcast %450 : vector<1x64xf32> to vector<128x64xf32>
    %452 = arith.mulf %449, %451 : vector<128x64xf32>
    %453 = vector.broadcast %431 : vector<1x64xf32> to vector<128x64xf32>
    %454 = arith.addf %452, %453 : vector<128x64xf32>
    %455 = arith.addf %454, %337 : vector<128x64xf32>
    %456 = vector.shape_cast %455 : vector<128x64xf32> to vector<2x64x64xf32>
    %c0_267 = arith.constant 0 : index
    %c0_268 = arith.constant 0 : index
    %c0_269 = arith.constant 0 : index
    %457 = vector.load %arg11[%c0_267, %c0_268, %c0_269] : memref<3x64x12xf32, #tpu.memory_space<vmem>>, vector<3x64x12xf32>
    %cst_270 = arith.constant 0.000000e+00 : f32
    %458 = vector.broadcast %cst_270 : f32 to vector<2x72x64xf32>
    %c0_271 = arith.constant 0 : index
    %c0_272 = arith.constant 0 : index
    %c0_273 = arith.constant 0 : index
    %459 = vector.load %arg14[%c0_271, %c0_272, %c0_273] : memref<2x72x64xf32, #tpu.memory_space<vmem>>, vector<2x72x64xf32>
    tpu.vector_store %arg14[%c0_271, %c0_272, %c0_273], %458 {strides = array<i32>} : memref<2x72x64xf32, #tpu.memory_space<vmem>>, vector<2x72x64xf32>,
    %c0_274 = arith.constant 0 : index
    %c1_275 = arith.constant 1 : index
    %c0_276 = arith.constant 0 : index
    %460 = vector.load %arg14[%c0_274, %c1_275, %c0_276] : memref<2x72x64xf32, #tpu.memory_space<vmem>>, vector<2x64x64xf32>
    tpu.vector_store %arg14[%c0_274, %c1_275, %c0_276], %456 {strides = array<i32>} : memref<2x72x64xf32, #tpu.memory_space<vmem>>, vector<2x64x64xf32>,
    %c0_277 = arith.constant 0 : index
    %c0_278 = arith.constant 0 : index
    %c0_279 = arith.constant 0 : index
    %461 = vector.load %arg14[%c0_277, %c0_278, %c0_279] : memref<2x72x64xf32, #tpu.memory_space<vmem>>, vector<2x64x64xf32>
    %462 = vector.shape_cast %461 : vector<2x64x64xf32> to vector<128x64xf32>
    %463 = arith.truncf %462 : vector<128x64xf32> to vector<128x64xbf16>
    %464 = vector.extract_strided_slice %457 {offsets = [0, 0, 0], sizes = [1, 64, 12], strides = [1, 1, 1]} : vector<3x64x12xf32> to vector<1x64x12xf32>
    %465 = vector.shape_cast %464 : vector<1x64x12xf32> to vector<64x12xf32>
    %466 = arith.truncf %465 : vector<64x12xf32> to vector<64x12xbf16>
    %cst_280 = arith.constant dense<0.000000e+00> : vector<128x12xf32>
    %467 = tpu.matmul %463, %466, %cst_280 {dimension_numbers = #tpu.dot_dimension_numbers<[1], [0], [0], [1], [0, 0, 1, 1], [], []>} : vector<128x64xbf16>, vector<64x12xbf16>, vector<128x12xf32> -> vector<128x12xf32>
    %c0_281 = arith.constant 0 : index
    %c1_282 = arith.constant 1 : index
    %c0_283 = arith.constant 0 : index
    %468 = vector.load %arg14[%c0_281, %c1_282, %c0_283] : memref<2x72x64xf32, #tpu.memory_space<vmem>>, vector<2x64x64xf32>
    %469 = vector.shape_cast %468 : vector<2x64x64xf32> to vector<128x64xf32>
    %470 = arith.truncf %469 : vector<128x64xf32> to vector<128x64xbf16>
    %471 = vector.extract_strided_slice %457 {offsets = [1, 0, 0], sizes = [1, 64, 12], strides = [1, 1, 1]} : vector<3x64x12xf32> to vector<1x64x12xf32>
    %472 = vector.shape_cast %471 : vector<1x64x12xf32> to vector<64x12xf32>
    %473 = arith.truncf %472 : vector<64x12xf32> to vector<64x12xbf16>
    %cst_284 = arith.constant dense<0.000000e+00> : vector<128x12xf32>
    %474 = tpu.matmul %470, %473, %cst_284 {dimension_numbers = #tpu.dot_dimension_numbers<[1], [0], [0], [1], [0, 0, 1, 1], [], []>} : vector<128x64xbf16>, vector<64x12xbf16>, vector<128x12xf32> -> vector<128x12xf32>
    %475 = arith.addf %467, %474 : vector<128x12xf32>
    %c0_285 = arith.constant 0 : index
    %c2_286 = arith.constant 2 : index
    %c0_287 = arith.constant 0 : index
    %476 = vector.load %arg14[%c0_285, %c2_286, %c0_287] : memref<2x72x64xf32, #tpu.memory_space<vmem>>, vector<2x64x64xf32>
    %477 = vector.shape_cast %476 : vector<2x64x64xf32> to vector<128x64xf32>
    %478 = arith.truncf %477 : vector<128x64xf32> to vector<128x64xbf16>
    %479 = vector.extract_strided_slice %457 {offsets = [2, 0, 0], sizes = [1, 64, 12], strides = [1, 1, 1]} : vector<3x64x12xf32> to vector<1x64x12xf32>
    %480 = vector.shape_cast %479 : vector<1x64x12xf32> to vector<64x12xf32>
    %481 = arith.truncf %480 : vector<64x12xf32> to vector<64x12xbf16>
    %cst_288 = arith.constant dense<0.000000e+00> : vector<128x12xf32>
    %482 = tpu.matmul %478, %481, %cst_288 {dimension_numbers = #tpu.dot_dimension_numbers<[1], [0], [0], [1], [0, 0, 1, 1], [], []>} : vector<128x64xbf16>, vector<64x12xbf16>, vector<128x12xf32> -> vector<128x12xf32>
    %483 = arith.addf %475, %482 : vector<128x12xf32>
    %c0_289 = arith.constant 0 : index
    %c0_290 = arith.constant 0 : index
    %484 = vector.load %arg12[%c0_289, %c0_290] : memref<1x12xf32, #tpu.memory_space<vmem>>, vector<1x12xf32>
    %485 = vector.broadcast %484 : vector<1x12xf32> to vector<128x12xf32>
    %486 = arith.addf %483, %485 : vector<128x12xf32>
    %487 = math.tanh %486 : vector<128x12xf32>
    %cst_291 = arith.constant 5.000000e-01 : f32
    %488 = vector.broadcast %cst_291 : f32 to vector<128x12xf32>
    %489 = arith.mulf %487, %488 : vector<128x12xf32>
    %490 = vector.shape_cast %489 : vector<128x12xf32> to vector<2x64x12xf32>
    %c0_292 = arith.constant 0 : index
    %c0_293 = arith.constant 0 : index
    %c0_294 = arith.constant 0 : index
    %491 = vector.load %arg13[%c0_292, %c0_293, %c0_294] : memref<2x64x12xf32, #tpu.memory_space<vmem>>, vector<2x64x12xf32>
    tpu.vector_store %arg13[%c0_292, %c0_293, %c0_294], %490 {strides = array<i32>} : memref<2x64x12xf32, #tpu.memory_space<vmem>>, vector<2x64x12xf32>,
    return
  }
}

</mosaic_0001>

<bundles_post_ra>
// kernel: generator_forward.1
= control target key start
LH: loop header
LB: loop body
LE: loop exit
PB: predicated region body
PF: predicated region fallthrough
CT: control target
= control target key end

     0   :  { %18 = vsyncpa [#allocation4], 0  ;;  %s7749_s0 = inlined_call_operand.vmem [shape: f32[2,16,12], index: 0, kind: input, shape index: {}]   ;;  %s7750_s1 = inlined_call_operand.vmem [shape: f32[9,12,64], index: 1, kind: input, shape index: {}]   ;;  %s7751_s2 = inlined_call_operand.vmem [shape: f32[1,64], index: 2, kind: input, shape index: {}]   ;;  %s7752_s3 = inlined_call_operand.hbm [shape: f32[3,3,64,64], index: 3, kind: input, shape index: {}]   ;;  %s7753_s4 = inlined_call_operand.vmem [shape: f32[3,1,64], index: 4, kind: input, shape index: {}]   ;;  %s7754_s5 = inlined_call_operand.vmem [shape: f32[3,1,64], index: 5, kind: input, shape index: {}]   ;;  %s7755_s6 = inlined_call_operand.hbm [shape: f32[3,3,64,64], index: 6, kind: input, shape index: {}]   ;;  %s7756_s7 = inlined_call_operand.vmem [shape: f32[3,1,64], index: 7, kind: input, shape index: {}]   ;;  %s7757_s8 = inlined_call_operand.vmem [shape: f32[3,1,64], index: 8, kind: input, shape index: {}]   ;;  %s7758_s9 = inlined_call_operand.vmem [shape: f32[32,16], index: 9, kind: input, shape index: {}]   ;;  %s7759_s10 = inlined_call_operand.vmem [shape: f32[64,32], index: 10, kind: input, shape index: {}]   ;;  %s7760_s11 = inlined_call_operand.vmem [shape: f32[3,64,12], index: 11, kind: input, shape index: {}]   ;;  %s7761_s12 = inlined_call_operand.vmem [shape: f32[1,12], index: 12, kind: input, shape index: {}]   ;;  %s7762_s13 = inlined_call_operand.vmem [shape: f32[2,64,12], index: 13, kind: output, shape index: {}]  }
   0x1   :  { %19 = vsyncpa [#allocation6], 0  ;;  %s5967_s25 = smov [#allocation3]   ;;  %s5919_s29 = scalar_lea.hbm %s7752_s3, 9216 }
   0x2   :  { %s31_s26 = sshll.u32 %s5967_s25, 4  ;;  %p5920_p0 = scmp.ne.s32.totalorder %s7752_s3, %s5919_s29  ;;  %s32_s26 = int_to_ptr.vmem [resolvable:$true] %s31_s26 }
   0x3   :  { %p5923_p1 = scmp.lt.u32.totalorder %s5919_s29, %s7752_s3 }
   0x5   :  { %p5925_p2 = pnand %p5923_p1, %p5920_p0 }
   0x7   :  { %5928 = shalt.err (!%p5925_p2)
}
   0x8   :  { %s5929_s17 = scalar_lea.vmem %s32_s26, 9216  ;;  %p5934_p4 = scmp.lt.s32.totalorder %s32_s26, %s32_s26 }
   0x9   :  { %p5930_p3 = scmp.ne.s32.totalorder %s32_s26, %s5929_s17  ;;  %p5935_p5 = scmp.lt.s32.totalorder %s5929_s17, %s5929_s17 }
   0xb   :  { %p5936_p6 = por %p5935_p5, %p5934_p4 }
   0xd   :  { %p5937_p7 = pnand %p5936_p6, %p5930_p3 }
   0xf   :  { %5940 = shalt.err (!%p5937_p7)
}
  0x10   :  { %s5968_s18 = smov 128   ;;  %s5969_s19 = smov 8  }
  0x11   :  { %37 = dma.hbm_to_vmem [thread:$0]  %s7752_s3, 9216, %s32_s26, [#allocation4], %s5968_s18, %s5968_s18, %s5969_s19  }
  0x12   :  { %s5970_s22 = smov [#allocation5]   ;;  %s5941_s27 = scalar_lea.hbm %s7755_s6, 9216 }
  0x13   :  { %s47_s23 = sshll.u32 %s5970_s22, 4  ;;  %p5942_p8 = scmp.ne.s32.totalorder %s7755_s6, %s5941_s27  ;;  %s48_s23 = int_to_ptr.vmem [resolvable:$true] %s47_s23 }
  0x14   :  { %p5945_p9 = scmp.lt.u32.totalorder %s5941_s27, %s7755_s6 }
  0x16   :  { %p5947_p10 = pnand %p5945_p9, %p5942_p8 }
  0x18   :  { %5950 = shalt.err (!%p5947_p10)
}
  0x19   :  { %s5951_s15 = scalar_lea.vmem %s48_s23, 9216  ;;  %p5956_p12 = scmp.lt.s32.totalorder %s48_s23, %s48_s23 }
  0x1a   :  { %p5952_p11 = scmp.ne.s32.totalorder %s48_s23, %s5951_s15  ;;  %p5957_p13 = scmp.lt.s32.totalorder %s5951_s15, %s5951_s15 }
  0x1c   :  { %p5958_p0 = por %p5957_p13, %p5956_p12 }
  0x1e   :  { %p5959_p1 = pnand %p5958_p0, %p5952_p11 }
  0x20   :  { %5962 = shalt.err (!%p5959_p1)
}
  0x21   :  { %53 = dma.hbm_to_vmem [thread:$0]  %s7755_s6, 9216, %s48_s23, [#allocation6], %s5968_s18, %s5968_s18, %s5969_s19  }
  0x22   :  { %5963 = dma.done.wait [#allocation4], 9216  }
  0x23   :  { %5964 = vsyncadd [#allocation4], 4294958080 }
  0x24   :  { %5965 = dma.done.wait [#allocation6], 9216  }
  0x25   :  { %5966 = vsyncadd [#allocation6], 4294958080  ;;  %vm95_vm0 = vcmask 523264   ;;  %v5971_v0 = vmov 0.0   ;;  %vm114_vm1 = vcmask 97280   ;;  %v77_v1 = vld [vmem:[%s7750_s1] sm:$0xff] }
  0x26   :  { %96 = vst.msk [vmem:[#allocation2] sm:$0xff] %vm95_vm0, %v5971_v0  ;;  %97 = vst.msk [vmem:[#allocation2 + $0x8] sm:$0xff] %vm95_vm0, %v5971_v0  ;;  %v78_v2 = vld [vmem:[%s7750_s1 + $0x8] sm:$0xf]  ;;  %vm139_vm2 = vcmask 1045504   ;;  %v73_v3 = vld [vmem:[%s7749_s0] sm:$0xff] }
  0x27   :  { %98 = vst.msk [vmem:[#allocation2 + $0x10] sm:$0xff] %vm95_vm0, %v5971_v0  ;;  %99 = vst.msk [vmem:[#allocation2 + $0x18] sm:$0xff] %vm95_vm0, %v5971_v0  ;;  %v125_v4 = vpack.c.bf16 %v78_v2, %v77_v1  ;;  %v74_v5 = vld [vmem:[%s7749_s0 + $0x8] sm:$0xff]  ;;  %v75_v6 = vld [vmem:[%s7749_s0 + $0x10] sm:$0xff]  ;;  %vm1390_vm11 = vcmask 130048  }
  0x28   :  { %100 = vst.msk [vmem:[#allocation2 + $0x20] sm:$0xff] %vm95_vm0, %v5971_v0  ;;  %101 = vst.msk [vmem:[#allocation2 + $0x28] sm:$0xff] %vm95_vm0, %v5971_v0  ;;  %v76_v7 = vld [vmem:[%s7749_s0 + $0x18] sm:$0xff]  ;;  %v81_v8 = vld [vmem:[%s7750_s1 + $0x20] sm:$0xff] }
  0x29   :  { %102 = vst.msk [vmem:[#allocation2 + $0x30] sm:$0xff] %vm95_vm0, %v5971_v0  ;;  %103 = vst.msk [vmem:[#allocation2 + $0x38] sm:$0xff] %vm95_vm0, %v5971_v0  ;;  %v82_v9 = vld [vmem:[%s7750_s1 + $0x28] sm:$0xf]  ;;  %5862 = vmatprep.subr.msk.bf16.mxu0 %vm139_vm2, %v125_v4  ;;  %v199_v10 = vsel %vm139_vm2, %v125_v4, 0  ;;  %v79_v12 = vld [vmem:[%s7750_s1 + $0x10] sm:$0xff] }
  0x2a   :  { %104 = vst.msk [vmem:[#allocation2 + $0x40] sm:$0xff] %vm95_vm0, %v5971_v0  ;;  %105 = vst.msk [vmem:[#allocation2 + $0x48] sm:$0xff] %vm95_vm0, %v5971_v0  ;;  %v256_v11 = vpack.c.bf16 %v82_v9, %v81_v8  ;;  %5170 = vmatpush3.bf16.msra.mxu0 %v199_v10  ;;  %v80_v13 = vld [vmem:[%s7750_s1 + $0x18] sm:$0xf]  ;;  %v83_v21 = vld [vmem:[%s7750_s1 + $0x30] sm:$0xff] }
  0x2b   :  { %106 = vst.msk [vmem:[#allocation2 + $0x50] sm:$0xff] %vm95_vm0, %v5971_v0  ;;  %107 = vst.msk [vmem:[#allocation2 + $0x58] sm:$0xff] %vm95_vm0, %v5971_v0  ;;  %v132_v14 = vpack.c.bf16 %v80_v13, %v79_v12  ;;  %v84_v22 = vld [vmem:[%s7750_s1 + $0x38] sm:$0xf]  ;;  %v85_v61 = vld [vmem:[%s7750_s1 + $0x40] sm:$0xff] }
  0x2c   :  { %108 = vst.msk [vmem:[#allocation2 + $0x60] sm:$0xff] %vm95_vm0, %v5971_v0  ;;  %109 = vst.msk [vmem:[#allocation2 + $0x68] sm:$0xff] %vm95_vm0, %v5971_v0  ;;  %5863 = vmatprep.subr.msk.bf16.mxu0 %vm139_vm2, %v256_v11  ;;  %v264_v27 = vsel %vm139_vm2, %v256_v11, 0  ;;  %v325_v28 = vpack.c.bf16 %v84_v22, %v83_v21  ;;  %v86_v62 = vld [vmem:[%s7750_s1 + $0x48] sm:$0xf]  ;;  %v87_v4 = vld [vmem:[%s7750_s1 + $0x50] sm:$0xff] }
  0x2d   :  { %110 = vst.msk [vmem:[#allocation2 + $0x70] sm:$0xff] %vm95_vm0, %v5971_v0  ;;  %111 = vst.msk [vmem:[#allocation2 + $0x78] sm:$0xff] %vm95_vm0, %v5971_v0  ;;  %5861 = vmatprep.subr.msk.bf16.mxu1 %vm139_vm2, %v132_v14  ;;  %v141_v17 = vsel %vm139_vm2, %v132_v14, 0  ;;  %v89_v10 = vld [vmem:[%s7750_s1 + $0x60] sm:$0xff]  ;;  %v90_v11 = vld [vmem:[%s7750_s1 + $0x68] sm:$0xf] }
  0x2e   :  { %112 = vst.msk [vmem:[#allocation2 + $0x80] sm:$0xff] %vm95_vm0, %v5971_v0  ;;  %113 = vst.msk [vmem:[#allocation2 + $0x88] sm:$0xff] %vm95_vm0, %v5971_v0  ;;  %5164 = vmatpush3.bf16.msra.mxu1 %v141_v17  ;;  %v333_v2 = vsel %vm139_vm2, %v325_v28, 0  ;;  %v92_v17 = vld [vmem:[%s7750_s1 + $0x78] sm:$0xf]  ;;  %v93_v22 = vld [vmem:[%s7750_s1 + $0x80] sm:$0xff] }
  0x2f   :  { %783 = vst.msk [vmem:[#allocation2 + $0x18] sm:$0xff] %vm95_vm0, %v5971_v0  ;;  %784 = vst.msk [vmem:[#allocation2 + $0x20] sm:$0xff] %vm95_vm0, %v5971_v0 }
  0x30   :  { %785 = vst.msk [vmem:[#allocation2 + $0x28] sm:$0xff] %vm95_vm0, %v5971_v0  ;;  %786 = vst.msk [vmem:[#allocation2 + $0x30] sm:$0xff] %vm95_vm0, %v5971_v0 }
  0x31   :  { %787 = vst.msk [vmem:[#allocation2 + $0x38] sm:$0xff] %vm95_vm0, %v5971_v0  ;;  %788 = vst.msk [vmem:[#allocation2 + $0x40] sm:$0xff] %vm95_vm0, %v5971_v0 }
  0x32   :  { %792 = vst.msk [vmem:[#allocation2 + $0x60] sm:$0xff] %vm95_vm0, %v5971_v0  ;;  %793 = vst.msk [vmem:[#allocation2 + $0x68] sm:$0xff] %vm95_vm0, %v5971_v0 }
  0x33   :  { %794 = vst.msk [vmem:[#allocation2 + $0x70] sm:$0xff] %vm95_vm0, %v5971_v0  ;;  %795 = vst.msk [vmem:[#allocation2 + $0x78] sm:$0xff] %vm95_vm0, %v5971_v0 }
  0x34   :  { %796 = vst.msk [vmem:[#allocation2 + $0x80] sm:$0xff] %vm95_vm0, %v5971_v0  ;;  %797 = vst.msk [vmem:[#allocation2 + $0x88] sm:$0xff] %vm95_vm0, %v5971_v0 }
  0x35   :  { %1102 = vst.msk [vmem:[#allocation2 + $0x18] sm:$0xff] %vm95_vm0, %v5971_v0  ;;  %1103 = vst.msk [vmem:[#allocation2 + $0x20] sm:$0xff] %vm95_vm0, %v5971_v0 }
  0x36   :  { %1104 = vst.msk [vmem:[#allocation2 + $0x28] sm:$0xff] %vm95_vm0, %v5971_v0  ;;  %1105 = vst.msk [vmem:[#allocation2 + $0x30] sm:$0xff] %vm95_vm0, %v5971_v0 }
  0x37   :  { %1106 = vst.msk [vmem:[#allocation2 + $0x38] sm:$0xff] %vm95_vm0, %v5971_v0  ;;  %1107 = vst.msk [vmem:[#allocation2 + $0x40] sm:$0xff] %vm95_vm0, %v5971_v0 }
  0x38   :  { %1111 = vst.msk [vmem:[#allocation2 + $0x60] sm:$0xff] %vm95_vm0, %v5971_v0  ;;  %1112 = vst.msk [vmem:[#allocation2 + $0x68] sm:$0xff] %vm95_vm0, %v5971_v0 }
  0x39   :  { %1113 = vst.msk [vmem:[#allocation2 + $0x70] sm:$0xff] %vm95_vm0, %v5971_v0  ;;  %1114 = vst.msk [vmem:[#allocation2 + $0x78] sm:$0xff] %vm95_vm0, %v5971_v0 }
  0x3a   :  { %1115 = vst.msk [vmem:[#allocation2 + $0x80] sm:$0xff] %vm95_vm0, %v5971_v0  ;;  %1116 = vst.msk [vmem:[#allocation2 + $0x88] sm:$0xff] %vm95_vm0, %v5971_v0 }
  0x3b   :  { %1601 = vst.msk [vmem:[#allocation2 + $0x18] sm:$0xff] %vm95_vm0, %v5971_v0  ;;  %1602 = vst.msk [vmem:[#allocation2 + $0x20] sm:$0xff] %vm95_vm0, %v5971_v0 }
  0x3c   :  { %1603 = vst.msk [vmem:[#allocation2 + $0x28] sm:$0xff] %vm95_vm0, %v5971_v0  ;;  %1604 = vst.msk [vmem:[#allocation2 + $0x30] sm:$0xff] %vm95_vm0, %v5971_v0 }
  0x3d   :  { %1605 = vst.msk [vmem:[#allocation2 + $0x38] sm:$0xff] %vm95_vm0, %v5971_v0  ;;  %1606 = vst.msk [vmem:[#allocation2 + $0x40] sm:$0xff] %vm95_vm0, %v5971_v0 }
  0x3e   :  { %1610 = vst.msk [vmem:[#allocation2 + $0x60] sm:$0xff] %vm95_vm0, %v5971_v0  ;;  %1611 = vst.msk [vmem:[#allocation2 + $0x68] sm:$0xff] %vm95_vm0, %v5971_v0 }
  0x3f   :  { %1612 = vst.msk [vmem:[#allocation2 + $0x70] sm:$0xff] %vm95_vm0, %v5971_v0  ;;  %1613 = vst.msk [vmem:[#allocation2 + $0x78] sm:$0xff] %vm95_vm0, %v5971_v0 }
  0x40   :  { %1614 = vst.msk [vmem:[#allocation2 + $0x80] sm:$0xff] %vm95_vm0, %v5971_v0  ;;  %1615 = vst.msk [vmem:[#allocation2 + $0x88] sm:$0xff] %vm95_vm0, %v5971_v0 }
  0x41   :  { %2061 = vst.msk [vmem:[#allocation2 + $0x28] sm:$0xff] %vm95_vm0, %v5971_v0  ;;  %2062 = vst.msk [vmem:[#allocation2 + $0x30] sm:$0xff] %vm95_vm0, %v5971_v0 }
  0x42   :  { %2063 = vst.msk [vmem:[#allocation2 + $0x38] sm:$0xff] %vm95_vm0, %v5971_v0  ;;  %2064 = vst.msk [vmem:[#allocation2 + $0x40] sm:$0xff] %vm95_vm0, %v5971_v0 }
  0x43   :  { %2070 = vst.msk [vmem:[#allocation2 + $0x70] sm:$0xff] %vm95_vm0, %v5971_v0  ;;  %2071 = vst.msk [vmem:[#allocation2 + $0x78] sm:$0xff] %vm95_vm0, %v5971_v0 }
  0x44   :  { %2072 = vst.msk [vmem:[#allocation2 + $0x80] sm:$0xff] %vm95_vm0, %v5971_v0  ;;  %2073 = vst.msk [vmem:[#allocation2 + $0x88] sm:$0xff] %vm95_vm0, %v5971_v0 }
  0x45   :  { %2746 = vst.msk [vmem:[#allocation2 + $0x28] sm:$0xff] %vm95_vm0, %v5971_v0  ;;  %2747 = vst.msk [vmem:[#allocation2 + $0x30] sm:$0xff] %vm95_vm0, %v5971_v0 }
  0x46   :  { %2748 = vst.msk [vmem:[#allocation2 + $0x38] sm:$0xff] %vm95_vm0, %v5971_v0  ;;  %2749 = vst.msk [vmem:[#allocation2 + $0x40] sm:$0xff] %vm95_vm0, %v5971_v0 }
  0x47   :  { %2755 = vst.msk [vmem:[#allocation2 + $0x70] sm:$0xff] %vm95_vm0, %v5971_v0  ;;  %2756 = vst.msk [vmem:[#allocation2 + $0x78] sm:$0xff] %vm95_vm0, %v5971_v0 }
  0x48   :  { %2757 = vst.msk [vmem:[#allocation2 + $0x80] sm:$0xff] %vm95_vm0, %v5971_v0  ;;  %2758 = vst.msk [vmem:[#allocation2 + $0x88] sm:$0xff] %vm95_vm0, %v5971_v0 }
  0x49   :  { %115 = vst.msk [vmem:[#allocation2 + $0x4] sm:$0xff] %vm114_vm1, %v73_v3  ;;  %116 = vst.msk [vmem:[#allocation2 + $0xc] sm:$0xff] %vm114_vm1, %v74_v5  ;;  %v394_v3 = vpack.c.bf16 %v86_v62, %v85_v61  ;;  %v88_v5 = vld [vmem:[%s7750_s1 + $0x58] sm:$0xf] }
  0x4a   :  { %117 = vst.msk [vmem:[#allocation2 + $0x4c] sm:$0xff] %vm114_vm1, %v75_v6  ;;  %118 = vst.msk [vmem:[#allocation2 + $0x54] sm:$0xff] %vm114_vm1, %v76_v7  ;;  %v463_v9 = vpack.c.bf16 %v88_v5, %v87_v4 }
  0x4b   :  { %v402_v8 = vsel %vm139_vm2, %v394_v3, 0 }
  0x4c   :  { %v471_v14 = vsel %vm139_vm2, %v463_v9, 0 }
  0x50   :  { %v119_v15 = vld [vmem:[#allocation2] sm:$0xff]  ;;  %v6243_v16 = vld [vmem:[#allocation2 + $0x8] sm:$0xff]  ;;  %v6288_v56 = vld [vmem:[#allocation2 + $0x10] sm:$0xff] }
  0x51   :  { %v123_v18 = vpack.c.bf16 %v6243_v16, %v119_v15  ;;  %v250_v19 = vld [vmem:[#allocation2 + $0x2] sm:$0xff]  ;;  %v251_v20 = vld [vmem:[#allocation2 + $0xa] sm:$0xff]  ;;  %v253_v40 = vld [vmem:[#allocation2 + $0x52] sm:$0xff]  ;;  %v668_v58 = vpack.c.bf16 %v6288_v56, %v6243_v16  ;;  %v532_v15 = vpack.c.bf16 %v90_v11, %v89_v10 }
  0x52   :  { %v121_v23 = vld [vmem:[#allocation2 + $0x48] sm:$0xff]  ;;  %v6255_v24 = vld [vmem:[#allocation2 + $0x50] sm:$0xff]  ;;  %v254_v25 = vpack.c.bf16 %v251_v20, %v250_v19  ;;  %v667_v59 = vld [vmem:[#allocation2 + $0x58] sm:$0xff] }
  0x53   :  { %5171 = vmatprep.mubr.msk.bf16.mxu0 %vm114_vm1, %v123_v18  ;;  %v124_v26 = vpack.c.bf16 %v6255_v24, %v121_v23  ;;  %v319_v29 = vld [vmem:[#allocation2 + $0x3] sm:$0xff]  ;;  %v320_v30 = vld [vmem:[#allocation2 + $0xb] sm:$0xff]  ;;  %v322_v42 = vld [vmem:[#allocation2 + $0x53] sm:$0xff]  ;;  %v669_v60 = vpack.c.bf16 %v667_v59, %v6255_v24  ;;  %v540_v20 = vsel %vm139_vm2, %v532_v15, 0 }
  0x54   :  { %v388_v31 = vld [vmem:[#allocation2 + $0x4] sm:$0xff]  ;;  %v389_v32 = vld [vmem:[#allocation2 + $0xc] sm:$0xff]  ;;  %v391_v44 = vld [vmem:[#allocation2 + $0x54] sm:$0xff]  ;;  %v323_v1 = vpack.c.bf16 %v320_v30, %v319_v29 }
  0x55   :  { %v6259_v33 = vld [vmem:[#allocation2 + $0x5] sm:$0xff]  ;;  %v6261_v34 = vld [vmem:[#allocation2 + $0xd] sm:$0xff]  ;;  %5172 = vmatmul.mubr.msk.bf16.vlgmr.msra.gmra.mrb[0].mxu0 %vm114_vm1, %v124_v26  ;;  %v6274_v46 = vld [vmem:[#allocation2 + $0x55] sm:$0xff]  ;;  %v392_v7 = vpack.c.bf16 %v389_v32, %v388_v31 }
  0x56   :  { %v6263_v35 = vld [vmem:[#allocation2 + $0x6] sm:$0xff]  ;;  %v6265_v36 = vld [vmem:[#allocation2 + $0xe] sm:$0xff]  ;;  %v6278_v48 = vld [vmem:[#allocation2 + $0x56] sm:$0xff]  ;;  %5176 = vmatpush3.bf16.msra.mxu0 %v264_v27  ;;  %5177 = vmatprep.mubr.msk.bf16.mxu0 %vm114_vm1, %v254_v25  ;;  %v461_v13 = vpack.c.bf16 %v6261_v34, %v6259_v33 }
  0x57   :  { %v6267_v37 = vld [vmem:[#allocation2 + $0x7] sm:$0xff]  ;;  %v6269_v38 = vld [vmem:[#allocation2 + $0xf] sm:$0xff]  ;;  %v6282_v50 = vld [vmem:[#allocation2 + $0x57] sm:$0xff]  ;;  %5864 = vmatprep.subr.msk.bf16.mxu0 %vm139_vm2, %v325_v28  ;;  %v530_v19 = vpack.c.bf16 %v6265_v36, %v6263_v35 }
  0x58   :  { %v252_v39 = vld [vmem:[#allocation2 + $0x4a] sm:$0xff]  ;;  %v126_v51 = vld [vmem:[#allocation2 + $0x1] sm:$0xff]  ;;  %v599_v25 = vpack.c.bf16 %v6269_v38, %v6267_v37  ;;  %v765_v31 = vld [vmem:[#allocation3 + $0x48] sm:$0xff] }
  0x59   :  { %v321_v41 = vld [vmem:[#allocation2 + $0x4b] sm:$0xff]  ;;  %780 = vst.msk [vmem:[#allocation2] sm:$0xff] %vm95_vm0, %v5971_v0  ;;  %v255_v63 = vpack.c.bf16 %v253_v40, %v252_v39  ;;  %v766_v33 = vld [vmem:[#allocation3 + $0x50] sm:$0xff]  ;;  %v769_v37 = vld [vmem:[#allocation3 + $0x68] sm:$0xff] }
  0x5a   :  { %v390_v43 = vld [vmem:[#allocation2 + $0x4c] sm:$0xff]  ;;  %v324_v6 = vpack.c.bf16 %v322_v42, %v321_v41  ;;  %v94_v23 = vld [vmem:[%s7750_s1 + $0x88] sm:$0xf]  ;;  %v770_v39 = vld [vmem:[#allocation3 + $0x70] sm:$0xff] }
  0x5b   :  { %v6272_v45 = vld [vmem:[#allocation2 + $0x4d] sm:$0xff]  ;;  %v393_v12 = vpack.c.bf16 %v391_v44, %v390_v43  ;;  %v670_v27 = vpack.c.bf16 %v94_v23, %v93_v22  ;;  %v757_v43 = vld [vmem:[#allocation3 + $0x8] sm:$0xff] }
  0x5c   :  { %v6276_v47 = vld [vmem:[#allocation2 + $0x4e] sm:$0xff]  ;;  %v462_v18 = vpack.c.bf16 %v6274_v46, %v6272_v45 }
  0x5d   :  { %v6280_v49 = vld [vmem:[#allocation2 + $0x4f] sm:$0xff]  ;;  %v531_v24 = vpack.c.bf16 %v6278_v48, %v6276_v47  ;;  %v678_v29 = vsel %vm139_vm2, %v670_v27, 0 }
  0x5e   :  { %v127_v52 = vld [vmem:[#allocation2 + $0x9] sm:$0xff]  ;;  %v129_v55 = vld [vmem:[#allocation2 + $0x51] sm:$0xff]  ;;  %v600_v28 = vpack.c.bf16 %v6282_v50, %v6280_v49  ;;  %v4760_v50 = vld [vmem:[%s7751_s2] ss:$0 sm:$0xff] }
  0x5f   :  { %v130_v53 = vpack.c.bf16 %v127_v52, %v126_v51  ;;  %v128_v54 = vld [vmem:[#allocation2 + $0x49] sm:$0xff]  ;;  %781 = vst.msk [vmem:[#allocation2 + $0x8] sm:$0xff] %vm95_vm0, %v5971_v0  ;;  %782 = vst.msk [vmem:[#allocation2 + $0x10] sm:$0xff] %vm95_vm0, %v5971_v0 }
  0x60   :  { %v131_v57 = vpack.c.bf16 %v129_v55, %v128_v54  ;;  %789 = vst.msk [vmem:[#allocation2 + $0x48] sm:$0xff] %vm95_vm0, %v5971_v0  ;;  %790 = vst.msk [vmem:[#allocation2 + $0x50] sm:$0xff] %vm95_vm0, %v5971_v0  ;;  %v91_v16 = vld [vmem:[%s7750_s1 + $0x70] sm:$0xff]  ;;  %v767_v34 = vld [vmem:[#allocation3 + $0x58] sm:$0xff] }
  0x61   :  { %5165 = vmatprep.mubr.msk.bf16.mxu1 %vm114_vm1, %v130_v53  ;;  %791 = vst.msk [vmem:[#allocation2 + $0x58] sm:$0xff] %vm95_vm0, %v5971_v0  ;;  %5178 = vmatmul.mubr.msk.bf16.vlgmr.msra.gmra.mrb[0].mxu0 %vm114_vm1, %v255_v63  ;;  %v601_v21 = vpack.c.bf16 %v92_v17, %v91_v16  ;;  %v764_v30 = vld [vmem:[#allocation3 + $0x40] sm:$0xff]  ;;  %v819_v35 = vpack.c.bf16 %v767_v34, %v766_v33  ;;  %v771_v40 = vld [vmem:[#allocation3 + $0x78] sm:$0xff]  ;;  %v774_v34 = vld [vmem:[#allocation3 + $0x90] sm:$0xff] }
  0x62   :  { %5166 = vmatmul.mubr.msk.bf16.vlgmr.msra.gmra.mrb[0].mxu1 %vm114_vm1, %v131_v57  ;;  %5182 = vmatpush3.bf16.msra.mxu0 %v333_v2  ;;  %v818_v32 = vpack.c.bf16 %v765_v31, %v764_v30  ;;  %v768_v36 = vld [vmem:[#allocation3 + $0x60] sm:$0xff]  ;;  %v821_v41 = vpack.c.bf16 %v771_v40, %v770_v39  ;;  %v777_v40 = vld [vmem:[#allocation3 + $0xa8] sm:$0xff] }
  0x63   :  { %5183 = vmatprep.mubr.msk.bf16.mxu0 %vm114_vm1, %v323_v1  ;;  %5865 = vmatprep.subr.msk.bf16.mxu0 %vm139_vm2, %v394_v3  ;;  %v609_v26 = vsel %vm139_vm2, %v601_v21, 0  ;;  %v820_v38 = vpack.c.bf16 %v769_v37, %v768_v36  ;;  %v756_v42 = vld [vmem:[#allocation3] sm:$0xff] }
  0x64   :  { %5217 = vmatprep.subr.bf16.mxu1 %v818_v32  ;;  %v6371_v44 = vpack.c.bf16 %v757_v43, %v756_v42  ;;  %v772_v31 = vld [vmem:[#allocation3 + $0x80] sm:$0xff]  ;;  %v778_v42 = vld [vmem:[#allocation3 + $0xb0] sm:$0xff]  ;;  %v779_v43 = vld [vmem:[#allocation3 + $0xb8] sm:$0xff] }
  0x65   :  { %5218 = vmatpush3.bf16.msra.mxu1 %v818_v32  ;;  %v773_v32 = vld [vmem:[#allocation3 + $0x88] sm:$0xff]  ;;  %v776_v39 = vld [vmem:[#allocation3 + $0xa0] sm:$0xff] }
  0x66   :  { %5219 = vmatprep.subr.bf16.mxu1 %v819_v35  ;;  %v938_v33 = vpack.c.bf16 %v773_v32, %v772_v31 }
  0x69   :  { %5220 = vmatpush3.bf16.msra.mxu1 %v819_v35  ;;  %v775_v35 = vld [vmem:[#allocation3 + $0x98] sm:$0xff] }
  0x6a   :  { %5221 = vmatprep.subr.bf16.mxu1 %v820_v38  ;;  %v939_v37 = vpack.c.bf16 %v775_v35, %v774_v34 }
  0x6d   :  { %5184 = vmatmul.mubr.msk.bf16.vlgmr.msra.gmra.mrb[0].mxu0 %vm114_vm1, %v324_v6  ;;  %5222 = vmatpush3.bf16.msra.mxu1 %v820_v38 }
  0x6e   :  { %5188 = vmatpush3.bf16.msra.mxu0 %v402_v8  ;;  %5189 = vmatprep.mubr.msk.bf16.mxu0 %vm114_vm1, %v392_v7  ;;  %v758_v8 = vld [vmem:[#allocation3 + $0x10] sm:$0xff] }
  0x6f   :  { %5866 = vmatprep.subr.msk.bf16.mxu0 %vm139_vm2, %v463_v9  ;;  %5223 = vmatprep.subr.bf16.mxu1 %v821_v41  ;;  %v759_v9 = vld [vmem:[#allocation3 + $0x18] sm:$0xff] }
  0x70   :  { %v809_v23 = vpack.c.bf16 %v759_v9, %v758_v8 }
  0x71   :  { %5224 = vmatpush3.bf16.msra.mxu1 %v821_v41  ;;  %v940_v41 = vpack.c.bf16 %v777_v40, %v776_v39 }
  0x72   :  { %5229 = vmatprep.subr.bf16.mxu1 %v6371_v44 }
  0x79   :  { %5190 = vmatmul.mubr.msk.bf16.vlgmr.msra.gmra.mrb[0].mxu0 %vm114_vm1, %v393_v12 }
  0x7a   :  { %5194 = vmatpush3.bf16.msra.mxu0 %v471_v14  ;;  %5195 = vmatprep.mubr.msk.bf16.mxu0 %vm114_vm1, %v461_v13 }
  0x7b   :  { %5867 = vmatprep.subr.msk.bf16.mxu0 %vm139_vm2, %v532_v15 }
  0x85   :  { %5196 = vmatmul.mubr.msk.bf16.vlgmr.msra.gmra.mrb[0].mxu0 %vm114_vm1, %v462_v18 }
  0x86   :  { %5200 = vmatpush3.bf16.msra.mxu0 %v540_v20  ;;  %5201 = vmatprep.mubr.msk.bf16.mxu0 %vm114_vm1, %v530_v19 }
  0x87   :  { %5868 = vmatprep.subr.msk.bf16.mxu0 %vm139_vm2, %v601_v21 }
  0x91   :  { %5202 = vmatmul.mubr.msk.bf16.vlgmr.msra.gmra.mrb[0].mxu0 %vm114_vm1, %v531_v24 }
  0x92   :  { %5206 = vmatpush3.bf16.msra.mxu0 %v609_v26  ;;  %5207 = vmatprep.mubr.msk.bf16.mxu0 %vm114_vm1, %v599_v25  ;;  %v760_v25 = vld [vmem:[#allocation3 + $0x20] sm:$0xff]  ;;  %v761_v26 = vld [vmem:[#allocation3 + $0x28] sm:$0xff] }
  0x93   :  { %5869 = vmatprep.subr.msk.bf16.mxu0 %vm139_vm2, %v670_v27  ;;  %v810_v27 = vpack.c.bf16 %v761_v26, %v760_v25 }
  0x9d   :  { %5208 = vmatmul.mubr.msk.bf16.vlgmr.msra.gmra.mrb[0].mxu0 %vm114_vm1, %v600_v28  ;;  %v762_v28 = vld [vmem:[#allocation3 + $0x30] sm:$0xff] }
  0x9e   :  { %5212 = vmatpush3.bf16.msra.mxu0 %v678_v29  ;;  %5213 = vmatprep.mubr.msk.bf16.mxu0 %vm114_vm1, %v668_v58  ;;  %v763_v29 = vld [vmem:[#allocation3 + $0x38] sm:$0xff] }
  0x9f   :  { %v811_v30 = vpack.c.bf16 %v763_v29, %v762_v28 }
  0xa9   :  { %5214 = vmatmul.mubr.msk.bf16.vlgmr.msra.gmra.mrb[0].mxu0 %vm114_vm1, %v669_v60 }
 0x135   :  { %v5167_v45 = vpop.f32.mrb[0].mxu1 }
 0x136   :  { %v177_v46 = vpop.f32.mrb[1].mxu1 }
 0x137   :  { %v5168_v47 = vpop.f32.mrb[2].mxu1 }
 0x138   :  { %v180_v48 = vpop.f32.mrb[3].mxu1 }
 0x17c   :  { %v5215_v49 = vpop.f32.mrb[0].mxu0 }
 0x17d   :  { %v5685_v51 = vadd.f32 %v5215_v49, %v5167_v45  ;;  %v714_v52 = vpop.f32.mrb[1].mxu0  ;;  %v1085_v49 = vld [vmem:[#allocation5 + $0x50] sm:$0xff] }
 0x17e   :  { %v5686_v53 = vadd.f32 %v714_v52, %v177_v46  ;;  %v5216_v54 = vpop.f32.mrb[2].mxu0  ;;  %v1083_v46 = vld [vmem:[#allocation5 + $0x40] sm:$0xff] }
 0x17f   :  { %v742_v55 = vadd.f32 %v5685_v51, %v4760_v50  ;;  %v5687_v56 = vadd.f32 %v5216_v54, %v5168_v47  ;;  %v717_v57 = vpop.f32.mrb[3].mxu0  ;;  %v1084_v47 = vld [vmem:[#allocation5 + $0x48] sm:$0xff]  ;;  %v1087_v52 = vld [vmem:[#allocation5 + $0x60] sm:$0xff] }
 0x180   :  { %v740_v58 = vadd.f32 %v5686_v53, %v4760_v50  ;;  %v5688_v59 = vadd.f32 %v717_v57, %v180_v48  ;;  %v1137_v48 = vpack.c.bf16 %v1084_v47, %v1083_v46  ;;  %v1088_v53 = vld [vmem:[#allocation5 + $0x68] sm:$0xff]  ;;  %v1045_v46 = vlaneseq }
 0x181   :  { %vm746_vm3 = vcmp.ge.f32.partialorder %v742_v55, 0.0  ;;  %v750_v60 = vmul.f32 0.3, %v742_v55  ;;  %v743_v61 = vadd.f32 %v5687_v56, %v4760_v50  ;;  %v1139_v54 = vpack.c.bf16 %v1088_v53, %v1087_v52  ;;  %v1090_v56 = vld [vmem:[#allocation5 + $0x78] sm:$0xff]  ;;  %v4767_v53 = vld [vmem:[%s7754_s5] ss:$0 sm:$0xff] }
 0x182   :  { %vm744_vm4 = vcmp.ge.f32.partialorder %v740_v58, 0.0  ;;  %v748_v62 = vmul.f32 0.3, %v740_v58  ;;  %v741_v63 = vadd.f32 %v5688_v59, %v4760_v50  ;;  %v1086_v50 = vld [vmem:[#allocation5 + $0x58] sm:$0xff]  ;;  %v1076_v59 = vld [vmem:[#allocation5 + $0x8] sm:$0xff]  ;;  %v1046_v47 = vshrl.u32 %v1045_v46, 7 }
 0x183   :  { %v6377_v1 = vsel %vm746_vm3, %v742_v55, %v750_v60  ;;  %vm747_vm5 = vcmp.ge.f32.partialorder %v743_v61, 0.0  ;;  %v751_v2 = vmul.f32 0.3, %v743_v61  ;;  %v1138_v51 = vpack.c.bf16 %v1086_v50, %v1085_v49  ;;  %v1089_v55 = vld [vmem:[#allocation5 + $0x70] sm:$0xff] }
 0x184   :  { %800 = vst.msk [vmem:[#allocation2 + $0x49] sm:$0xff] %vm95_vm0, %v6377_v1  ;;  %v6381_v3 = vsel %vm744_vm4, %v740_v58, %v748_v62  ;;  %vm745_vm6 = vcmp.ge.f32.partialorder %v741_v63, 0.0  ;;  %v749_v4 = vmul.f32 0.3, %v741_v63  ;;  %v1140_v57 = vpack.c.bf16 %v1090_v56, %v1089_v55  ;;  %v1075_v58 = vld [vmem:[#allocation5] sm:$0xff]  ;;  %v1097_v46 = vld [vmem:[#allocation5 + $0xb0] sm:$0xff] }
 0x185   :  { %798 = vst.msk [vmem:[#allocation2 + $0x1] sm:$0xff] %vm95_vm0, %v6381_v3  ;;  %v6385_v5 = vsel %vm747_vm5, %v743_v61, %v751_v2  ;;  %v6412_v60 = vpack.c.bf16 %v1076_v59, %v1075_v58  ;;  %v6426_v49 = vsub.s32 0, %v1046_v47  ;;  %v1098_v47 = vld [vmem:[#allocation5 + $0xb8] sm:$0xff] }
 0x186   :  { %801 = vst.msk [vmem:[#allocation2 + $0x51] sm:$0xff] %vm95_vm0, %v6385_v5  ;;  %v6389_v6 = vsel %vm745_vm6, %v741_v63, %v749_v4  ;;  %vm2481_vm6 = vcmask 261120  }
 0x187   :  { %799 = vst.msk [vmem:[#allocation2 + $0x9] sm:$0xff] %vm95_vm0, %v6389_v6 }
 0x18b   :  { %v814_v7 = vld [vmem:[#allocation2 + $0x49] sm:$0xff] }
 0x18c   :  { %v812_v10 = vld [vmem:[#allocation2 + $0x1] sm:$0xff] }
 0x18d   :  { %v802_v11 = vld [vmem:[#allocation2] sm:$0xff]  ;;  %v804_v12 = vld [vmem:[#allocation2 + $0x48] sm:$0xff]  ;;  %v935_v14 = vld [vmem:[#allocation2 + $0x52] sm:$0xff] }
 0x18e   :  { %v934_v13 = vld [vmem:[#allocation2 + $0x4a] sm:$0xff]  ;;  %v932_v16 = vld [vmem:[#allocation2 + $0x2] sm:$0xff] }
 0x18f   :  { %v815_v15 = vld [vmem:[#allocation2 + $0x51] sm:$0xff]  ;;  %v813_v18 = vld [vmem:[#allocation2 + $0x9] sm:$0xff]  ;;  %1108 = vst.msk [vmem:[#allocation2 + $0x48] sm:$0xff] %vm95_vm0, %v5971_v0  ;;  %1099 = vst.msk [vmem:[#allocation2] sm:$0xff] %vm95_vm0, %v5971_v0  ;;  %v937_v45 = vpack.c.bf16 %v935_v14, %v934_v13 }
 0x190   :  { %v933_v17 = vld [vmem:[#allocation2 + $0xa] sm:$0xff]  ;;  %1110 = vst.msk [vmem:[#allocation2 + $0x58] sm:$0xff] %vm95_vm0, %v5971_v0  ;;  %v816_v19 = vpack.c.bf16 %v813_v18, %v812_v10  ;;  %v817_v22 = vpack.c.bf16 %v815_v15, %v814_v7 }
 0x191   :  { %1101 = vst.msk [vmem:[#allocation2 + $0x10] sm:$0xff] %vm95_vm0, %v5971_v0  ;;  %v803_v20 = vld [vmem:[#allocation2 + $0x8] sm:$0xff]  ;;  %v805_v21 = vld [vmem:[#allocation2 + $0x50] sm:$0xff]  ;;  %v936_v38 = vpack.c.bf16 %v933_v17, %v932_v16 }
 0x192   :  { %1100 = vst.msk [vmem:[#allocation2 + $0x8] sm:$0xff] %vm95_vm0, %v5971_v0  ;;  %1109 = vst.msk [vmem:[#allocation2 + $0x50] sm:$0xff] %vm95_vm0, %v5971_v0  ;;  %5225 = vmatprep.mubr.msk.bf16.mxu1 %vm95_vm0, %v816_v19  ;;  %v806_v24 = vpack.c.bf16 %v803_v20, %v802_v11  ;;  %v807_v36 = vpack.c.bf16 %v805_v21, %v804_v12 }
 0x193   :  { %5226 = vmatmul.mubr.msk.bf16.vlgmr.msra.gmra.mrb[4].mxu1 %vm95_vm0, %v817_v22 }
 0x194   :  { %5230 = vmatpush3.bf16.msra.mxu1 %v6371_v44  ;;  %5237 = vmatprep.mubr.msk.bf16.mxu1 %vm95_vm0, %v806_v24  ;;  %v941_v44 = vpack.c.bf16 %v779_v43, %v778_v42 }
 0x195   :  { %5231 = vmatprep.subr.bf16.mxu1 %v809_v23 }
 0x198   :  { %5232 = vmatpush3.bf16.msra.mxu1 %v809_v23 }
 0x199   :  { %5233 = vmatprep.subr.bf16.mxu1 %v810_v27 }
 0x19c   :  { %5234 = vmatpush3.bf16.msra.mxu1 %v810_v27 }
 0x19d   :  { %5235 = vmatprep.subr.bf16.mxu1 %v811_v30 }
 0x1a0   :  { %5236 = vmatpush3.bf16.msra.mxu1 %v811_v30 }
 0x1a1   :  { %5241 = vmatprep.subr.bf16.mxu1 %v938_v33 }
 0x1a3   :  { %5238 = vmatmul.mubr.msk.bf16.vlgmr.msra.gmra.mrb[4].mxu1 %vm95_vm0, %v807_v36 }
 0x1a4   :  { %5242 = vmatpush3.bf16.msra.mxu1 %v938_v33  ;;  %5249 = vmatprep.mubr.msk.bf16.mxu1 %vm95_vm0, %v936_v38 }
 0x1a5   :  { %5243 = vmatprep.subr.bf16.mxu1 %v939_v37 }
 0x1a8   :  { %5244 = vmatpush3.bf16.msra.mxu1 %v939_v37 }
 0x1a9   :  { %5245 = vmatprep.subr.bf16.mxu1 %v940_v41 }
 0x1ac   :  { %5246 = vmatpush3.bf16.msra.mxu1 %v940_v41 }
 0x1ad   :  { %5247 = vmatprep.subr.bf16.mxu1 %v941_v44 }
 0x1b0   :  { %5248 = vmatpush3.bf16.msra.mxu1 %v941_v44 }
 0x1b1   :  { %5253 = vmatprep.subr.bf16.mxu1 %v1137_v48 }
 0x1b3   :  { %5250 = vmatmul.mubr.msk.bf16.vlgmr.msra.gmra.mrb[4].mxu1 %vm95_vm0, %v937_v45 }
 0x1b4   :  { %5254 = vmatpush3.bf16.msra.mxu1 %v1137_v48  ;;  %v1001_v48 = vld [vmem:[%s7753_s4] sm:$0x1] }
 0x1b5   :  { %5255 = vmatprep.subr.bf16.mxu1 %v1138_v51 }
 0x1b8   :  { %5256 = vmatpush3.bf16.msra.mxu1 %v1138_v51 }
 0x1b9   :  { %5257 = vmatprep.subr.bf16.mxu1 %v1139_v54 }
 0x1bc   :  { %5258 = vmatpush3.bf16.msra.mxu1 %v1139_v54 }
 0x1bd   :  { %5259 = vmatprep.subr.bf16.mxu1 %v1140_v57 }
 0x1c0   :  { %5260 = vmatpush3.bf16.msra.mxu1 %v1140_v57 }
 0x1c1   :  { %5265 = vmatprep.subr.bf16.mxu1 %v6412_v60 }
 0x286   :  { %v5251_v61 = vpop.f32.mrb[4].mxu1 }
 0x287   :  { %v982_v62 = vpop.f32.mrb[5].mxu1  ;;  %v1018_v7 = vmul.f32 %v5251_v61, %v5251_v61  ;;  %v1006_v12 = vsel %vm95_vm0, %v5251_v61, 0.0 }
 0x288   :  { %v1016_v63 = vmul.f32 %v982_v62, %v982_v62  ;;  %v5252_v2 = vpop.f32.mrb[6].mxu1  ;;  %v1003_v8 = vsel %vm95_vm0, %v982_v62, 0.0 }
 0x289   :  { %v985_v4 = vpop.f32.mrb[7].mxu1  ;;  %v1019_v14 = vmul.f32 %v5252_v2, %v5252_v2  ;;  %v1023_v18 = vsel %vm95_vm0, %v1018_v7, 0.0  ;;  %v1008_v19 = vsel %vm95_vm0, %v5252_v2, 0.0 }
 0x28a   :  { %v1004_v9 = vsel %vm95_vm0, %v985_v4, 0.0  ;;  %v1017_v10 = vmul.f32 %v985_v4, %v985_v4  ;;  %v1020_v13 = vsel %vm95_vm0, %v1016_v63, 0.0 }
 0x28b   :  { %v1005_v11 = vadd.f32 %v1004_v9, %v1003_v8  ;;  %v1025_v22 = vsel %vm95_vm0, %v1019_v14, 0.0 }
 0x28c   :  { %v1021_v15 = vsel %vm95_vm0, %v1017_v10, 0.0 }
 0x28d   :  { %v1007_v16 = vadd.f32 %v1006_v12, %v1005_v11  ;;  %v1022_v17 = vadd.f32 %v1021_v15, %v1020_v13  ;;  %v1077_v12 = vld [vmem:[#allocation5 + $0x10] sm:$0xff]  ;;  %v1078_v13 = vld [vmem:[#allocation5 + $0x18] sm:$0xff] }
 0x28f   :  { %v1009_v20 = vadd.f32 %v1008_v19, %v1007_v16  ;;  %v1024_v21 = vadd.f32 %v1023_v18, %v1022_v17 }
 0x291   :  { %v1010_v23 = vrot.slane %v1009_v20, 4  ;;  %v1026_v24 = vadd.f32 %v1025_v22, %v1024_v21 }
 0x293   :  { %v1011_v25 = vadd.f32 %v1010_v23, %v1009_v20  ;;  %v1027_v26 = vrot.slane %v1026_v24, 4 }
 0x295   :  { %v1012_v27 = vrot.slane %v1011_v25, 2  ;;  %v1028_v28 = vadd.f32 %v1027_v26, %v1026_v24  ;;  %v1128_v26 = vpack.c.bf16 %v1078_v13, %v1077_v12 }
 0x297   :  { %v1013_v29 = vadd.f32 %v1012_v27, %v1011_v25  ;;  %v1029_v30 = vrot.slane %v1028_v28, 2 }
 0x299   :  { %v1014_v31 = vrot.slane %v1013_v29, 1  ;;  %v1030_v32 = vadd.f32 %v1029_v30, %v1028_v28  ;;  %v1079_v30 = vld [vmem:[#allocation5 + $0x20] sm:$0xff] }
 0x29b   :  { %v1015_v33 = vadd.f32 %v1014_v31, %v1013_v29  ;;  %v1031_v34 = vrot.slane %v1030_v32, 1  ;;  %v1080_v31 = vld [vmem:[#allocation5 + $0x28] sm:$0xff] }
 0x29d   :  { %v1032_v35 = vadd.f32 %v1031_v34, %v1030_v32  ;;  %v1033_v36 = vmul.f32 0.03125, %v1015_v33  ;;  %v1129_v32 = vpack.c.bf16 %v1080_v31, %v1079_v30  ;;  %v1081_v33 = vld [vmem:[#allocation5 + $0x30] sm:$0xff]  ;;  %v1082_v34 = vld [vmem:[#allocation5 + $0x38] sm:$0xff] }
 0x29f   :  { %v1034_v37 = vmul.f32 0.03125, %v1032_v35  ;;  %v1035_v38 = vmul.f32 %v1033_v36, %v1033_v36  ;;  %v1040_v39 = vsub.f32 %v982_v62, %v1033_v36  ;;  %v1041_v40 = vsub.f32 %v985_v4, %v1033_v36 }
 0x2a0   :  { %v1042_v41 = vsub.f32 %v5251_v61, %v1033_v36  ;;  %v1043_v42 = vsub.f32 %v5252_v2, %v1033_v36  ;;  %v1130_v35 = vpack.c.bf16 %v1082_v34, %v1081_v33  ;;  %v1091_v36 = vld [vmem:[#allocation5 + $0x80] sm:$0xff] }
 0x2a1   :  { %v1036_v43 = vsub.f32 %v1034_v37, %v1035_v38  ;;  %v1092_v37 = vld [vmem:[#allocation5 + $0x88] sm:$0xff] }
 0x2a2   :  { %v1257_v38 = vpack.c.bf16 %v1092_v37, %v1091_v36 }
 0x2a3   :  { %v1037_v44 = vmax.f32 %v1036_v43, 0.0  ;;  %v1095_v43 = vld [vmem:[#allocation5 + $0xa0] sm:$0xff] }
 0x2a5   :  { %v1038_v45 = vadd.f32 1e-05, %v1037_v44  ;;  %v1096_v44 = vld [vmem:[#allocation5 + $0xa8] sm:$0xff] }
 0x2a7   :  { %5875 = vrsqrt.f32 %v1038_v45  ;;  %v1259_v45 = vpack.c.bf16 %v1096_v44, %v1095_v43 }
 0x2b1   :  { %v5876_v50 = vpop.eup %5875 }
 0x2b2   :  { %v1044_v51 = vmul.f32 %v5876_v50, %v1001_v48  ;;  %v1260_v48 = vpack.c.bf16 %v1098_v47, %v1097_v46 }
 0x2b4   :  { %v1048_v52 = vrot.slane %v1044_v51, %v6426_v49  ;;  %v6458_v51 = vld [vmem:[%s7758_s9] sm:$0xff] }
 0x2b5   :  { %5293 = vmatprep.mubr.msk.f32.mxu0 %vm1390_vm11, %v6458_v51 }
 0x2b6   :  { %v1049_v54 = vmul.f32 %v1048_v52, %v1040_v39  ;;  %v1050_v55 = vmul.f32 %v1048_v52, %v1041_v40  ;;  %v1051_v56 = vmul.f32 %v1048_v52, %v1042_v41  ;;  %v1052_v57 = vmul.f32 %v1048_v52, %v1043_v42  ;;  %v1093_v39 = vld [vmem:[#allocation5 + $0x90] sm:$0xff]  ;;  %v1094_v40 = vld [vmem:[#allocation5 + $0x98] sm:$0xff] }
 0x2b8   :  { %v1059_v58 = vadd.f32 %v4767_v53, %v1049_v54  ;;  %v1060_v59 = vadd.f32 %v4767_v53, %v1050_v55  ;;  %v1061_v61 = vadd.f32 %v4767_v53, %v1051_v56  ;;  %v1062_v62 = vadd.f32 %v4767_v53, %v1052_v57 }
 0x2ba   :  { %vm1063_vm7 = vcmp.ge.f32.partialorder %v1059_v58, 0.0  ;;  %vm1064_vm8 = vcmp.ge.f32.partialorder %v1060_v59, 0.0  ;;  %vm1065_vm9 = vcmp.ge.f32.partialorder %v1061_v61, 0.0  ;;  %vm1066_vm10 = vcmp.ge.f32.partialorder %v1062_v62, 0.0 }
 0x2bb   :  { %v1067_v63 = vmul.f32 0.3, %v1059_v58  ;;  %v1068_v2 = vmul.f32 0.3, %v1060_v59  ;;  %v1069_v4 = vmul.f32 0.3, %v1061_v61 }
 0x2bc   :  { %v1070_v7 = vmul.f32 0.3, %v1062_v62 }
 0x2bd   :  { %v1071_v8 = vsel %vm1063_vm7, %v1059_v58, %v1067_v63  ;;  %v1072_v9 = vsel %vm1064_vm8, %v1060_v59, %v1068_v2  ;;  %v1073_v10 = vsel %vm1065_vm9, %v1061_v61, %v1069_v4 }
 0x2be   :  { %v1074_v11 = vsel %vm1066_vm10, %v1062_v62, %v1070_v7  ;;  %1118 = vst.msk [vmem:[#allocation2 + $0x9] sm:$0xff] %vm95_vm0, %v1072_v9  ;;  %1117 = vst.msk [vmem:[#allocation2 + $0x1] sm:$0xff] %vm95_vm0, %v1071_v8 }
 0x2bf   :  { %1119 = vst.msk [vmem:[#allocation2 + $0x49] sm:$0xff] %vm95_vm0, %v1073_v10  ;;  %1120 = vst.msk [vmem:[#allocation2 + $0x51] sm:$0xff] %vm95_vm0, %v1074_v11 }
 0x2c5   :  { %v1252_v14 = vld [vmem:[#allocation2 + $0xa] sm:$0xff]  ;;  %v1131_v15 = vld [vmem:[#allocation2 + $0x1] sm:$0xff] }
 0x2c6   :  { %v1132_v16 = vld [vmem:[#allocation2 + $0x9] sm:$0xff]  ;;  %v1254_v17 = vld [vmem:[#allocation2 + $0x52] sm:$0xff]  ;;  %v1121_v23 = vld [vmem:[#allocation2] sm:$0xff] }
 0x2c7   :  { %v1135_v18 = vpack.c.bf16 %v1132_v16, %v1131_v15  ;;  %v1251_v19 = vld [vmem:[#allocation2 + $0x2] sm:$0xff]  ;;  %1600 = vst.msk [vmem:[#allocation2 + $0x10] sm:$0xff] %vm95_vm0, %v5971_v0  ;;  %v1134_v21 = vld [vmem:[#allocation2 + $0x51] sm:$0xff] }
 0x2c8   :  { %v1133_v20 = vld [vmem:[#allocation2 + $0x49] sm:$0xff]  ;;  %1609 = vst.msk [vmem:[#allocation2 + $0x58] sm:$0xff] %vm95_vm0, %v5971_v0  ;;  %1598 = vst.msk [vmem:[#allocation2] sm:$0xff] %vm95_vm0, %v5971_v0  ;;  %v1255_v42 = vpack.c.bf16 %v1252_v14, %v1251_v19 }
 0x2c9   :  { %v1253_v22 = vld [vmem:[#allocation2 + $0x4a] sm:$0xff]  ;;  %5261 = vmatprep.mubr.msk.bf16.mxu1 %vm95_vm0, %v1135_v18  ;;  %v1136_v24 = vpack.c.bf16 %v1134_v21, %v1133_v20 }
 0x2ca   :  { %v1122_v25 = vld [vmem:[#allocation2 + $0x8] sm:$0xff]  ;;  %v1124_v28 = vld [vmem:[#allocation2 + $0x50] sm:$0xff]  ;;  %v1256_v50 = vpack.c.bf16 %v1254_v17, %v1253_v22 }
 0x2cb   :  { %v1123_v27 = vld [vmem:[#allocation2 + $0x48] sm:$0xff]  ;;  %v1125_v29 = vpack.c.bf16 %v1122_v25, %v1121_v23  ;;  %1599 = vst.msk [vmem:[#allocation2 + $0x8] sm:$0xff] %vm95_vm0, %v5971_v0  ;;  %1608 = vst.msk [vmem:[#allocation2 + $0x50] sm:$0xff] %vm95_vm0, %v5971_v0  ;;  %5262 = vmatmul.mubr.msk.bf16.vlgmr.msra.gmra.mrb[8].mxu1 %vm95_vm0, %v1136_v24 }
 0x2cc   :  { %1607 = vst.msk [vmem:[#allocation2 + $0x48] sm:$0xff] %vm95_vm0, %v5971_v0  ;;  %5266 = vmatpush3.bf16.msra.mxu1 %v6412_v60  ;;  %v1126_v41 = vpack.c.bf16 %v1124_v28, %v1123_v27  ;;  %v1258_v60 = vpack.c.bf16 %v1094_v40, %v1093_v39 }
 0x2cd   :  { %5273 = vmatprep.mubr.msk.bf16.mxu1 %vm95_vm0, %v1125_v29  ;;  %5267 = vmatprep.subr.bf16.mxu1 %v1128_v26 }
 0x2d0   :  { %5268 = vmatpush3.bf16.msra.mxu1 %v1128_v26 }
 0x2d1   :  { %5269 = vmatprep.subr.bf16.mxu1 %v1129_v32 }
 0x2d4   :  { %5270 = vmatpush3.bf16.msra.mxu1 %v1129_v32 }
 0x2d5   :  { %5271 = vmatprep.subr.bf16.mxu1 %v1130_v35 }
 0x2d8   :  { %5272 = vmatpush3.bf16.msra.mxu1 %v1130_v35 }
 0x2d9   :  { %5277 = vmatprep.subr.bf16.mxu1 %v1257_v38 }
 0x2db   :  { %5274 = vmatmul.mubr.msk.bf16.vlgmr.msra.gmra.mrb[8].mxu1 %vm95_vm0, %v1126_v41 }
 0x2dc   :  { %5278 = vmatpush3.bf16.msra.mxu1 %v1257_v38  ;;  %5285 = vmatprep.mubr.msk.bf16.mxu1 %vm95_vm0, %v1255_v42  ;;  %v1320_v38 = vld [vmem:[%s7756_s7] sm:$0x1] }
 0x2dd   :  { %5279 = vmatprep.subr.bf16.mxu1 %v1258_v60 }
 0x2e0   :  { %5280 = vmatpush3.bf16.msra.mxu1 %v1258_v60  ;;  %v4774_v60 = vld [vmem:[%s7757_s8] ss:$0 sm:$0xff] }
 0x2e1   :  { %5281 = vmatprep.subr.bf16.mxu1 %v1259_v45 }
 0x2e4   :  { %5282 = vmatpush3.bf16.msra.mxu1 %v1259_v45 }
 0x2e5   :  { %5283 = vmatprep.subr.bf16.mxu1 %v1260_v48 }
 0x2e8   :  { %5284 = vmatpush3.bf16.msra.mxu1 %v1260_v48 }
 0x2eb   :  { %5286 = vmatmul.mubr.msk.bf16.vlgmr.msra.gmra.mrb[8].mxu1 %vm95_vm0, %v1256_v50 }
 0x3be   :  { %v5287_v52 = vpop.f32.mrb[8].mxu1 }
 0x3bf   :  { %v1301_v53 = vpop.f32.mrb[9].mxu1  ;;  %v1337_v57 = vmul.f32 %v5287_v52, %v5287_v52  ;;  %v1325_v63 = vsel %vm95_vm0, %v5287_v52, 0.0 }
 0x3c0   :  { %v1335_v54 = vmul.f32 %v1301_v53, %v1301_v53  ;;  %v5288_v55 = vpop.f32.mrb[10].mxu1  ;;  %v1322_v58 = vsel %vm95_vm0, %v1301_v53, 0.0 }
 0x3c1   :  { %v1304_v56 = vpop.f32.mrb[11].mxu1  ;;  %v1338_v4 = vmul.f32 %v5288_v55, %v5288_v55  ;;  %v1342_v10 = vsel %vm95_vm0, %v1337_v57, 0.0  ;;  %v1327_v11 = vsel %vm95_vm0, %v5288_v55, 0.0 }
 0x3c2   :  { %v1323_v59 = vsel %vm95_vm0, %v1304_v56, 0.0  ;;  %v1336_v61 = vmul.f32 %v1304_v56, %v1304_v56  ;;  %v1339_v2 = vsel %vm95_vm0, %v1335_v54, 0.0 }
 0x3c3   :  { %v1324_v62 = vadd.f32 %v1323_v59, %v1322_v58  ;;  %v1344_v14 = vsel %vm95_vm0, %v1338_v4, 0.0  ;;  %v1387_v58 = vld [vmem:[%s7758_s9 + $0x8] sm:$0xff]  ;;  %v1388_v59 = vld [vmem:[%s7758_s9 + $0x10] sm:$0xff]  ;;  %v1587_v4 = vld [vmem:[#allocation3 + $0x128] sm:$0xff] }
 0x3c4   :  { %v1340_v7 = vsel %vm95_vm0, %v1336_v61, 0.0  ;;  %v1584_v61 = vld [vmem:[#allocation3 + $0x110] sm:$0xff] }
 0x3c5   :  { %v1326_v8 = vadd.f32 %v1325_v63, %v1324_v62  ;;  %v1341_v9 = vadd.f32 %v1340_v7, %v1339_v2  ;;  %v1585_v62 = vld [vmem:[#allocation3 + $0x118] sm:$0xff]  ;;  %v1586_v2 = vld [vmem:[#allocation3 + $0x120] sm:$0xff] }
 0x3c6   :  { %v1653_v63 = vpack.c.bf16 %v1585_v62, %v1584_v61  ;;  %v1654_v7 = vpack.c.bf16 %v1587_v4, %v1586_v2  ;;  %v1593_v61 = vld [vmem:[#allocation3 + $0x158] sm:$0xff]  ;;  %v1594_v4 = vld [vmem:[#allocation3 + $0x160] sm:$0xff] }
 0x3c7   :  { %v1328_v12 = vadd.f32 %v1327_v11, %v1326_v8  ;;  %v1343_v13 = vadd.f32 %v1342_v10, %v1341_v9  ;;  %v1589_v8 = vld [vmem:[#allocation3 + $0x138] sm:$0xff]  ;;  %v1574_v10 = vld [vmem:[#allocation3 + $0xc0] sm:$0xff]  ;;  %v1575_v11 = vld [vmem:[#allocation3 + $0xc8] sm:$0xff] }
 0x3c9   :  { %v1329_v15 = vrot.slane %v1328_v12, 4  ;;  %v1345_v16 = vadd.f32 %v1344_v14, %v1343_v13 }
 0x3cb   :  { %v1330_v17 = vadd.f32 %v1329_v15, %v1328_v12  ;;  %v1346_v18 = vrot.slane %v1345_v16, 4  ;;  %v1636_v12 = vpack.c.bf16 %v1575_v11, %v1574_v10 }
 0x3cd   :  { %v1331_v19 = vrot.slane %v1330_v17, 2  ;;  %v1347_v20 = vadd.f32 %v1346_v18, %v1345_v16 }
 0x3cf   :  { %v1332_v21 = vadd.f32 %v1331_v19, %v1330_v17  ;;  %v1348_v22 = vrot.slane %v1347_v20, 2 }
 0x3d1   :  { %v1333_v23 = vrot.slane %v1332_v21, 1  ;;  %v1349_v24 = vadd.f32 %v1348_v22, %v1347_v20 }
 0x3d3   :  { %v1334_v25 = vadd.f32 %v1333_v23, %v1332_v21  ;;  %v1350_v26 = vrot.slane %v1349_v24, 1 }
 0x3d5   :  { %v1351_v27 = vadd.f32 %v1350_v26, %v1349_v24  ;;  %v1352_v28 = vmul.f32 0.03125, %v1334_v25  ;;  %v1576_v24 = vld [vmem:[#allocation3 + $0xd0] sm:$0xff]  ;;  %v1577_v25 = vld [vmem:[#allocation3 + $0xd8] sm:$0xff] }
 0x3d7   :  { %v1353_v29 = vmul.f32 0.03125, %v1351_v27  ;;  %v1354_v30 = vmul.f32 %v1352_v28, %v1352_v28  ;;  %v1360_v31 = vsub.f32 %v1304_v56, %v1352_v28  ;;  %v1359_v32 = vsub.f32 %v1301_v53, %v1352_v28 }
 0x3d8   :  { %v1361_v33 = vsub.f32 %v5287_v52, %v1352_v28  ;;  %v1362_v34 = vsub.f32 %v5288_v55, %v1352_v28 }
 0x3d9   :  { %v1355_v35 = vsub.f32 %v1353_v29, %v1354_v30 }
 0x3db   :  { %v1356_v36 = vmax.f32 %v1355_v35, 0.0  ;;  %v1637_v35 = vpack.c.bf16 %v1577_v25, %v1576_v24  ;;  %v2042_v25 = vld [vmem:[#allocation5 + $0x110] sm:$0xff] }
 0x3dd   :  { %v1357_v37 = vadd.f32 1e-05, %v1356_v36 }
 0x3df   :  { %5877 = vrsqrt.f32 %v1357_v37 }
 0x3e9   :  { %v5878_v39 = vpop.eup %5877 }
 0x3ea   :  { %v1363_v40 = vmul.f32 %v5878_v39, %v1320_v38  ;;  %v1578_v38 = vld [vmem:[#allocation3 + $0xe0] sm:$0xff]  ;;  %v1579_v39 = vld [vmem:[#allocation3 + $0xe8] sm:$0xff] }
 0x3ec   :  { %v1367_v41 = vrot.slane %v1363_v40, %v6426_v49 }
 0x3ee   :  { %v1369_v42 = vmul.f32 %v1367_v41, %v1360_v31  ;;  %v1368_v43 = vmul.f32 %v1367_v41, %v1359_v32  ;;  %v1370_v44 = vmul.f32 %v1367_v41, %v1361_v33  ;;  %v1371_v45 = vmul.f32 %v1367_v41, %v1362_v34 }
 0x3f0   :  { %v1379_v46 = vadd.f32 %v4774_v60, %v1369_v42  ;;  %v1378_v47 = vadd.f32 %v4774_v60, %v1368_v43  ;;  %v1380_v48 = vadd.f32 %v4774_v60, %v1370_v44  ;;  %v1381_v50 = vadd.f32 %v4774_v60, %v1371_v45  ;;  %v1580_v45 = vld [vmem:[#allocation3 + $0xf0] sm:$0xff] }
 0x3f1   :  { %v1638_v44 = vpack.c.bf16 %v1579_v39, %v1578_v38 }
 0x3f2   :  { %v1382_v52 = vadd.f32 %v1378_v47, %v6381_v3  ;;  %v1383_v53 = vadd.f32 %v1379_v46, %v6389_v6  ;;  %v1384_v54 = vadd.f32 %v1380_v48, %v6377_v1  ;;  %v1385_v55 = vadd.f32 %v1381_v50, %v6385_v5  ;;  %v1389_v1 = vld [vmem:[%s7758_s9 + $0x18] sm:$0xff]  ;;  %v1582_v3 = vld [vmem:[#allocation3 + $0x100] sm:$0xff]  ;;  %v1581_v46 = vld [vmem:[#allocation3 + $0xf8] sm:$0xff] }
 0x3f3   :  { %v1583_v5 = vld [vmem:[#allocation3 + $0x108] sm:$0xff] }
 0x3f4   :  { %v5661_v56 = vpack.c.bf16 %v1383_v53, %v1382_v52  ;;  %v5665_v57 = vpack.c.bf16 %v1385_v55, %v1384_v54  ;;  %v1652_v6 = vpack.c.bf16 %v1583_v5, %v1582_v3  ;;  %v1591_v3 = vld [vmem:[#allocation3 + $0x148] sm:$0xff] }
 0x3f6   :  { %5662 = vmatprep.subr.bf16.mxu0 %v5661_v56 }
 0x3f7   :  { %5664 = vmatpush3.bf16.msra.mxu0 %v5661_v56  ;;  %v1639_v56 = vpack.c.bf16 %v1581_v46, %v1580_v45 }
 0x3f8   :  { %5666 = vmatprep.subr.bf16.mxu0 %v5665_v57 }
 0x3fa   :  { %5294 = vmatmul.mubr.msk.f32.vlgmr.msra.gmra.mrb[4].mxu0 %vm1390_vm11, %v1387_v58 }
 0x3fb   :  { %5668 = vmatpush3.bf16.msra.mxu0 %v5665_v57  ;;  %5296 = vmatprep.mubr.msk.f32.mxu0 %vm1390_vm11, %v1388_v59 }
 0x3fc   :  { %5309 = vmatprep.subr.bf16.mxu0 %v1652_v6 }
 0x3fe   :  { %5297 = vmatmul.mubr.msk.f32.gmra.mrb[6].mxu0 %vm1390_vm11, %v1389_v1 }
 0x3ff   :  { %5303 = vmatprep.mubr.msk.f32.mxu0 %vm1390_vm11, %v6458_v51  ;;  %v1588_v51 = vld [vmem:[#allocation3 + $0x130] sm:$0xff] }
 0x400   :  { %v1655_v9 = vpack.c.bf16 %v1589_v8, %v1588_v51  ;;  %v1596_v8 = vld [vmem:[#allocation3 + $0x170] sm:$0xff] }
 0x402   :  { %5304 = vmatmul.mubr.msk.f32.vlgmr.msra.gmra.mrb[8].mxu0 %vm1390_vm11, %v1387_v58 }
 0x403   :  { %5306 = vmatprep.mubr.msk.f32.mxu0 %vm1390_vm11, %v1388_v59  ;;  %5310 = vmatpush3.bf16.msra.mxu0 %v1652_v6  ;;  %v1592_v6 = vld [vmem:[#allocation3 + $0x150] sm:$0xff] }
 0x404   :  { %5311 = vmatprep.subr.bf16.mxu0 %v1653_v63 }
 0x406   :  { %5307 = vmatmul.mubr.msk.f32.gmra.mrb[10].mxu0 %vm1390_vm11, %v1389_v1  ;;  %v1590_v1 = vld [vmem:[#allocation3 + $0x140] sm:$0xff] }
 0x407   :  { %5312 = vmatpush3.bf16.msra.mxu0 %v1653_v63  ;;  %v1822_v5 = vpack.c.bf16 %v1591_v3, %v1590_v1  ;;  %v1823_v63 = vpack.c.bf16 %v1593_v61, %v1592_v6 }
 0x408   :  { %5313 = vmatprep.subr.bf16.mxu0 %v1654_v7 }
 0x40b   :  { %5314 = vmatpush3.bf16.msra.mxu0 %v1654_v7  ;;  %v1595_v7 = vld [vmem:[#allocation3 + $0x168] sm:$0xff] }
 0x40c   :  { %5315 = vmatprep.subr.bf16.mxu0 %v1655_v9  ;;  %v1824_v51 = vpack.c.bf16 %v1595_v7, %v1594_v4 }
 0x40f   :  { %5316 = vmatpush3.bf16.msra.mxu0 %v1655_v9  ;;  %v1597_v9 = vld [vmem:[#allocation3 + $0x178] sm:$0xff] }
 0x410   :  { %5325 = vmatprep.subr.bf16.mxu0 %v1636_v12  ;;  %v1825_v11 = vpack.c.bf16 %v1597_v9, %v1596_v8 }
 0x4cd   :  { %v6498_v13 = vpop.f32.mrb[4].mxu0 }
 0x4ce   :  { %1617 = vst.msk [vmem:[#allocation2 + $0x9] sm:$0xff] %vm95_vm0, %v6498_v13  ;;  %v6502_v14 = vpop.f32.mrb[5].mxu0 }
 0x4cf   :  { %1616 = vst.msk [vmem:[#allocation2 + $0x1] sm:$0xff] %vm95_vm0, %v6502_v14 }
 0x4d1   :  { %v6506_v15 = vpop.f32.mrb[6].mxu0 }
 0x4d2   :  { %1619 = vst.msk [vmem:[#allocation2 + $0x19] sm:$0xff] %vm95_vm0, %v6506_v15  ;;  %v6510_v16 = vpop.f32.mrb[7].mxu0 }
 0x4d3   :  { %1618 = vst.msk [vmem:[#allocation2 + $0x11] sm:$0xff] %vm95_vm0, %v6510_v16 }
 0x4d5   :  { %v6514_v17 = vpop.f32.mrb[8].mxu0  ;;  %v1641_v18 = vld [vmem:[#allocation2 + $0x9] sm:$0xff] }
 0x4d6   :  { %1621 = vst.msk [vmem:[#allocation2 + $0x51] sm:$0xff] %vm95_vm0, %v6514_v17  ;;  %v6518_v19 = vpop.f32.mrb[9].mxu0  ;;  %v1640_v20 = vld [vmem:[#allocation2 + $0x1] sm:$0xff] }
 0x4d7   :  { %v6520_v21 = vld [vmem:[#allocation2 + $0x2] sm:$0xff]  ;;  %1620 = vst.msk [vmem:[#allocation2 + $0x49] sm:$0xff] %vm95_vm0, %v6518_v19  ;;  %v1648_v23 = vpack.c.bf16 %v1641_v18, %v1640_v20 }
 0x4d8   :  { %v1624_v22 = vld [vmem:[#allocation2] sm:$0xff]  ;;  %v1625_v32 = vld [vmem:[#allocation2 + $0x8] sm:$0xff] }
 0x4d9   :  { %2056 = vst.msk [vmem:[#allocation2] sm:$0xff] %vm95_vm0, %v5971_v0  ;;  %v1643_v26 = vld [vmem:[#allocation2 + $0x19] sm:$0xff]  ;;  %v6528_v28 = vpop.f32.mrb[10].mxu0  ;;  %5317 = vmatprep.mubr.msk.bf16.mxu0 %vm95_vm0, %v1648_v23  ;;  %v1632_v59 = vpack.c.bf16 %v1625_v32, %v1624_v22 }
 0x4da   :  { %v6526_v27 = vld [vmem:[#allocation2 + $0x1a] sm:$0xff]  ;;  %v6533_v29 = vld [vmem:[#allocation2 + $0xa] sm:$0xff]  ;;  %1623 = vst.msk [vmem:[#allocation2 + $0x61] sm:$0xff] %vm95_vm0, %v6528_v28  ;;  %v6537_v30 = vpop.f32.mrb[11].mxu0  ;;  %v6539_v33 = vld [vmem:[#allocation2 + $0x12] sm:$0xff] }
 0x4db   :  { %2060 = vst.msk [vmem:[#allocation2 + $0x20] sm:$0xff] %vm95_vm0, %v5971_v0  ;;  %v1642_v31 = vld [vmem:[#allocation2 + $0x11] sm:$0xff]  ;;  %1622 = vst.msk [vmem:[#allocation2 + $0x59] sm:$0xff] %vm95_vm0, %v6537_v30  ;;  %v1819_v18 = vpack.c.bf16 %v6526_v27, %v6539_v33  ;;  %v2046_v32 = vld [vmem:[#allocation5 + $0x130] sm:$0xff] }
 0x4dc   :  { %v1649_v34 = vpack.c.bf16 %v1643_v26, %v1642_v31  ;;  %2057 = vst.msk [vmem:[#allocation2 + $0x8] sm:$0xff] %vm95_vm0, %v5971_v0  ;;  %v1626_v36 = vld [vmem:[#allocation2 + $0x10] sm:$0xff]  ;;  %v1627_v37 = vld [vmem:[#allocation2 + $0x18] sm:$0xff]  ;;  %v2043_v26 = vld [vmem:[#allocation5 + $0x118] sm:$0xff] }
 0x4dd   :  { %2058 = vst.msk [vmem:[#allocation2 + $0x10] sm:$0xff] %vm95_vm0, %v5971_v0  ;;  %2059 = vst.msk [vmem:[#allocation2 + $0x18] sm:$0xff] %vm95_vm0, %v5971_v0  ;;  %v1645_v40 = vld [vmem:[#allocation2 + $0x51] sm:$0xff]  ;;  %v1633_v62 = vpack.c.bf16 %v1627_v37, %v1626_v36 }
 0x4de   :  { %5318 = vmatmul.mubr.msk.bf16.vlgmr.msra.gmra.mrb[12].mxu0 %vm95_vm0, %v1649_v34  ;;  %v1644_v41 = vld [vmem:[#allocation2 + $0x49] sm:$0xff]  ;;  %v2041_v23 = vld [vmem:[#allocation5 + $0x108] sm:$0xff] }
 0x4df   :  { %5326 = vmatpush3.bf16.msra.mxu0 %v1636_v12  ;;  %v6550_v60 = vld [vmem:[#allocation2 + $0x4a] sm:$0xff]  ;;  %v1650_v43 = vpack.c.bf16 %v1645_v40, %v1644_v41  ;;  %v1818_v12 = vpack.c.bf16 %v6533_v29, %v6520_v21  ;;  %v2111_v29 = vpack.c.bf16 %v2043_v26, %v2042_v25  ;;  %v2045_v31 = vld [vmem:[#allocation5 + $0x128] sm:$0xff] }
 0x4e0   :  { %v1628_v42 = vld [vmem:[#allocation2 + $0x48] sm:$0xff]  ;;  %5327 = vmatprep.subr.bf16.mxu0 %v1637_v35  ;;  %v1629_v53 = vld [vmem:[#allocation2 + $0x50] sm:$0xff]  ;;  %v2033_v37 = vld [vmem:[#allocation5 + $0xc8] sm:$0xff] }
 0x4e1   :  { %2065 = vst.msk [vmem:[#allocation2 + $0x48] sm:$0xff] %vm95_vm0, %v5971_v0  ;;  %v1817_v47 = vld [vmem:[#allocation2 + $0x62] sm:$0xff]  ;;  %5321 = vmatprep.mubr.msk.bf16.mxu0 %vm95_vm0, %v1650_v43  ;;  %v1634_v2 = vpack.c.bf16 %v1629_v53, %v1628_v42  ;;  %v2040_v21 = vld [vmem:[#allocation5 + $0x100] sm:$0xff] }
 0x4e2   :  { %v1647_v48 = vld [vmem:[#allocation2 + $0x61] sm:$0xff]  ;;  %v1815_v50 = vld [vmem:[#allocation2 + $0x52] sm:$0xff]  ;;  %v2110_v24 = vpack.c.bf16 %v2041_v23, %v2040_v21 }
 0x4e3   :  { %5328 = vmatpush3.bf16.msra.mxu0 %v1637_v35  ;;  %v1646_v52 = vld [vmem:[#allocation2 + $0x59] sm:$0xff]  ;;  %2069 = vst.msk [vmem:[#allocation2 + $0x68] sm:$0xff] %vm95_vm0, %v5971_v0  ;;  %2066 = vst.msk [vmem:[#allocation2 + $0x50] sm:$0xff] %vm95_vm0, %v5971_v0  ;;  %v1820_v20 = vpack.c.bf16 %v1815_v50, %v6550_v60  ;;  %v2044_v27 = vld [vmem:[#allocation5 + $0x120] sm:$0xff] }
 0x4e4   :  { %v1816_v54 = vld [vmem:[#allocation2 + $0x5a] sm:$0xff]  ;;  %v1651_v55 = vpack.c.bf16 %v1647_v48, %v1646_v52  ;;  %5329 = vmatprep.subr.bf16.mxu0 %v1638_v44  ;;  %5357 = vmatprep.subr.bf16.mxu1 %v2110_v24  ;;  %v2112_v33 = vpack.c.bf16 %v2045_v31, %v2044_v27  ;;  %v2047_v34 = vld [vmem:[#allocation5 + $0x138] sm:$0xff]  ;;  %v2032_v36 = vld [vmem:[#allocation5 + $0xc0] sm:$0xff] }
 0x4e5   :  { %v1630_v57 = vld [vmem:[#allocation2 + $0x58] sm:$0xff]  ;;  %v1631_v58 = vld [vmem:[#allocation2 + $0x60] sm:$0xff]  ;;  %v1821_v22 = vpack.c.bf16 %v1817_v47, %v1816_v54  ;;  %5358 = vmatpush3.bf16.msra.mxu1 %v2110_v24  ;;  %v2113_v35 = vpack.c.bf16 %v2047_v34, %v2046_v32  ;;  %v6577_v38 = vpack.c.bf16 %v2033_v37, %v2032_v36 }
 0x4e6   :  { %2067 = vst.msk [vmem:[#allocation2 + $0x58] sm:$0xff] %vm95_vm0, %v5971_v0  ;;  %2068 = vst.msk [vmem:[#allocation2 + $0x60] sm:$0xff] %vm95_vm0, %v5971_v0  ;;  %5322 = vmatmul.mubr.msk.bf16.gmra.mrb[16].mxu0 %vm95_vm0, %v1651_v55  ;;  %v1635_v10 = vpack.c.bf16 %v1631_v58, %v1630_v57  ;;  %5359 = vmatprep.subr.bf16.mxu1 %v2111_v29 }
 0x4e7   :  { %5330 = vmatpush3.bf16.msra.mxu0 %v1638_v44  ;;  %5333 = vmatprep.mubr.msk.bf16.mxu0 %vm95_vm0, %v1632_v59 }
 0x4e8   :  { %5331 = vmatprep.subr.bf16.mxu0 %v1639_v56 }
 0x4e9   :  { %5360 = vmatpush3.bf16.msra.mxu1 %v2111_v29 }
 0x4ea   :  { %5361 = vmatprep.subr.bf16.mxu1 %v2112_v33 }
 0x4eb   :  { %5332 = vmatpush3.bf16.msra.mxu0 %v1639_v56 }
 0x4ec   :  { %5341 = vmatprep.subr.bf16.mxu0 %v1822_v5 }
 0x4ed   :  { %5362 = vmatpush3.bf16.msra.mxu1 %v2112_v33 }
 0x4ee   :  { %5334 = vmatmul.mubr.msk.bf16.vlgmr.msra.gmra.mrb[12].mxu0 %vm95_vm0, %v1633_v62  ;;  %5363 = vmatprep.subr.bf16.mxu1 %v2113_v35 }
 0x4ef   :  { %5337 = vmatprep.mubr.msk.bf16.mxu0 %vm95_vm0, %v1634_v2  ;;  %5342 = vmatpush3.bf16.msra.mxu0 %v1822_v5 }
 0x4f0   :  { %5343 = vmatprep.subr.bf16.mxu0 %v1823_v63 }
 0x4f1   :  { %5364 = vmatpush3.bf16.msra.mxu1 %v2113_v35 }
 0x4f2   :  { %5373 = vmatprep.subr.bf16.mxu1 %v6577_v38 }
 0x4f3   :  { %5344 = vmatpush3.bf16.msra.mxu0 %v1823_v63 }
 0x4f4   :  { %5345 = vmatprep.subr.bf16.mxu0 %v1824_v51 }
 0x4f6   :  { %5338 = vmatmul.mubr.msk.bf16.gmra.mrb[16].mxu0 %vm95_vm0, %v1635_v10 }
 0x4f7   :  { %5346 = vmatpush3.bf16.msra.mxu0 %v1824_v51  ;;  %5349 = vmatprep.mubr.msk.bf16.mxu0 %vm95_vm0, %v1818_v12 }
 0x4f8   :  { %5347 = vmatprep.subr.bf16.mxu0 %v1825_v11 }
 0x4fb   :  { %5348 = vmatpush3.bf16.msra.mxu0 %v1825_v11 }
 0x4fe   :  { %5350 = vmatmul.mubr.msk.bf16.vlgmr.msra.gmra.mrb[12].mxu0 %vm95_vm0, %v1819_v18 }
 0x4ff   :  { %5353 = vmatprep.mubr.msk.bf16.mxu0 %vm95_vm0, %v1820_v20 }
 0x506   :  { %5354 = vmatmul.mubr.msk.bf16.gmra.mrb[16].mxu0 %vm95_vm0, %v1821_v22 }
 0x5d1   :  { %v6580_v39 = vpop.f32.mrb[12].mxu0 }
 0x5d2   :  { %v6582_v40 = vpop.f32.mrb[13].mxu0  ;;  %v1938_v43 = vmul.f32 %v6580_v39, %v6580_v39  ;;  %v1918_v48 = vsel %vm95_vm0, %v6580_v39, 0.0 }
 0x5d3   :  { %v1936_v41 = vmul.f32 %v6582_v40, %v6582_v40  ;;  %v6586_v60 = vpop.f32.mrb[14].mxu0  ;;  %v1915_v44 = vsel %vm95_vm0, %v6582_v40, 0.0 }
 0x5d4   :  { %v6588_v42 = vpop.f32.mrb[15].mxu0  ;;  %v1939_v52 = vmul.f32 %v6586_v60, %v6586_v60  ;;  %v1947_v56 = vsel %vm95_vm0, %v1938_v43, 0.0  ;;  %v1920_v57 = vsel %vm95_vm0, %v6586_v60, 0.0 }
 0x5d5   :  { %v1916_v45 = vsel %vm95_vm0, %v6588_v42, 0.0  ;;  %v1937_v46 = vmul.f32 %v6588_v42, %v6588_v42  ;;  %v1944_v50 = vsel %vm95_vm0, %v1936_v41, 0.0 }
 0x5d6   :  { %v1917_v47 = vadd.f32 %v1916_v45, %v1915_v44  ;;  %v1949_v5 = vsel %vm95_vm0, %v1939_v52, 0.0 }
 0x5d7   :  { %v1945_v53 = vsel %vm95_vm0, %v1937_v46, 0.0 }
 0x5d8   :  { %v1919_v54 = vadd.f32 %v1918_v48, %v1917_v47  ;;  %v1946_v55 = vadd.f32 %v1945_v53, %v1944_v50 }
 0x5d9   :  { %v6607_v58 = vpop.f32.mrb[16].mxu0 }
 0x5da   :  { %v1948_v59 = vadd.f32 %v1947_v56, %v1946_v55  ;;  %v6609_v1 = vpop.f32.mrb[17].mxu0  ;;  %v1921_v3 = vadd.f32 %v1920_v57, %v1919_v54  ;;  %v1942_v7 = vmul.f32 %v6607_v58, %v6607_v58  ;;  %v1926_v12 = vsel %vm95_vm0, %v6607_v58, 0.0 }
 0x5db   :  { %v1922_v6 = vsel %vm95_vm0, %v6609_v1, 0.0  ;;  %v1940_v61 = vmul.f32 %v6609_v1, %v6609_v1  ;;  %v5356_v62 = vpop.f32.mrb[18].mxu0 }
 0x5dc   :  { %v1923_v63 = vadd.f32 %v1922_v6, %v1921_v3  ;;  %v1950_v2 = vadd.f32 %v1949_v5, %v1948_v59  ;;  %v1891_v4 = vpop.f32.mrb[19].mxu0  ;;  %v1943_v18 = vmul.f32 %v5356_v62, %v5356_v62  ;;  %v1955_v23 = vsel %vm95_vm0, %v1942_v7, 0.0 }
 0x5dd   :  { %v1951_v51 = vsel %vm95_vm0, %v1940_v61, 0.0  ;;  %v1924_v8 = vsel %vm95_vm0, %v1891_v4, 0.0  ;;  %v1941_v9 = vmul.f32 %v1891_v4, %v1891_v4  ;;  %v1928_v24 = vsel %vm95_vm0, %v5356_v62, 0.0 }
 0x5de   :  { %v1952_v10 = vadd.f32 %v1951_v51, %v1950_v2  ;;  %v1925_v11 = vadd.f32 %v1924_v8, %v1923_v63  ;;  %v1957_v29 = vsel %vm95_vm0, %v1943_v18, 0.0 }
 0x5df   :  { %v1953_v20 = vsel %vm95_vm0, %v1941_v9, 0.0 }
 0x5e0   :  { %v1927_v22 = vadd.f32 %v1926_v12, %v1925_v11  ;;  %v1954_v21 = vadd.f32 %v1953_v20, %v1952_v10 }
 0x5e2   :  { %v1929_v25 = vadd.f32 %v1928_v24, %v1927_v22  ;;  %v1956_v26 = vadd.f32 %v1955_v23, %v1954_v21 }
 0x5e4   :  { %v1930_v27 = vrot.slane %v1929_v25, 4  ;;  %v1958_v31 = vadd.f32 %v1957_v29, %v1956_v26 }
 0x5e6   :  { %v1931_v32 = vadd.f32 %v1930_v27, %v1929_v25  ;;  %v1959_v33 = vrot.slane %v1958_v31, 4 }
 0x5e8   :  { %v1932_v34 = vrot.slane %v1931_v32, 2  ;;  %v1960_v35 = vadd.f32 %v1959_v33, %v1958_v31 }
 0x5ea   :  { %v1933_v36 = vadd.f32 %v1932_v34, %v1931_v32  ;;  %v1961_v37 = vrot.slane %v1960_v35, 2 }
 0x5ec   :  { %v1934_v41 = vrot.slane %v1933_v36, 1  ;;  %v1962_v43 = vadd.f32 %v1961_v37, %v1960_v35 }
 0x5ee   :  { %v1935_v44 = vadd.f32 %v1934_v41, %v1933_v36  ;;  %v1963_v45 = vrot.slane %v1962_v43, 1 }
 0x5f0   :  { %v1964_v46 = vadd.f32 %v1963_v45, %v1962_v43  ;;  %v1965_v47 = vmul.f32 0.015625, %v1935_v44  ;;  %v2034_v45 = vld [vmem:[#allocation5 + $0xd0] sm:$0xff] }
 0x5f2   :  { %v1966_v48 = vmul.f32 0.015625, %v1964_v46  ;;  %v1967_v50 = vmul.f32 %v1965_v47, %v1965_v47  ;;  %v1972_v52 = vsub.f32 %v6582_v40, %v1965_v47  ;;  %v1973_v53 = vsub.f32 %v6588_v42, %v1965_v47  ;;  %v4795_v40 = vld [vmem:[%s7753_s4 + $0x1] sm:$0x1]  ;;  %v2035_v46 = vld [vmem:[#allocation5 + $0xd8] sm:$0xff] }
 0x5f3   :  { %v1974_v54 = vsub.f32 %v6580_v39, %v1965_v47  ;;  %v1975_v55 = vsub.f32 %v6586_v60, %v1965_v47  ;;  %v1976_v56 = vsub.f32 %v6609_v1, %v1965_v47  ;;  %v1977_v57 = vsub.f32 %v1891_v4, %v1965_v47  ;;  %v4797_v60 = vld [vmem:[%s7754_s5 + $0x1] ss:$0 sm:$0xff] }
 0x5f4   :  { %v1968_v59 = vsub.f32 %v1966_v48, %v1967_v50  ;;  %v1978_v3 = vsub.f32 %v6607_v58, %v1965_v47  ;;  %v1979_v5 = vsub.f32 %v5356_v62, %v1965_v47 }
 0x5f6   :  { %v1969_v6 = vmax.f32 %v1968_v59, 0.0  ;;  %v2095_v59 = vpack.c.bf16 %v2035_v46, %v2034_v45 }
 0x5f8   :  { %v1970_v61 = vadd.f32 1e-05, %v1969_v6  ;;  %v2036_v6 = vld [vmem:[#allocation5 + $0xe0] sm:$0xff] }
 0x5fa   :  { %5879 = vrsqrt.f32 %v1970_v61  ;;  %v2037_v61 = vld [vmem:[#allocation5 + $0xe8] sm:$0xff] }
 0x604   :  { %v5880_v63 = vpop.eup %5879 }
 0x605   :  { %v1980_v42 = vmul.f32 %v5880_v63, %v4795_v40 }
 0x607   :  { %v1984_v39 = vrot.slane %v1980_v42, %v6426_v49 }
 0x609   :  { %v1985_v1 = vmul.f32 %v1984_v39, %v1972_v52  ;;  %v1986_v2 = vmul.f32 %v1984_v39, %v1973_v53  ;;  %v1987_v4 = vmul.f32 %v1984_v39, %v1974_v54  ;;  %v1988_v58 = vmul.f32 %v1984_v39, %v1975_v55 }
 0x60a   :  { %v1989_v62 = vmul.f32 %v1984_v39, %v1976_v56  ;;  %v1990_v7 = vmul.f32 %v1984_v39, %v1977_v57  ;;  %v1991_v51 = vmul.f32 %v1984_v39, %v1978_v3  ;;  %v1992_v8 = vmul.f32 %v1984_v39, %v1979_v5 }
 0x60b   :  { %v1999_v9 = vadd.f32 %v4797_v60, %v1985_v1  ;;  %v2000_v10 = vadd.f32 %v4797_v60, %v1986_v2  ;;  %v2001_v11 = vadd.f32 %v4797_v60, %v1987_v4  ;;  %v2002_v12 = vadd.f32 %v4797_v60, %v1988_v58  ;;  %v2038_v2 = vld [vmem:[#allocation5 + $0xf0] sm:$0xff]  ;;  %v2039_v4 = vld [vmem:[#allocation5 + $0xf8] sm:$0xff] }
 0x60c   :  { %v2003_v18 = vadd.f32 %v4797_v60, %v1989_v62  ;;  %v2004_v20 = vadd.f32 %v4797_v60, %v1990_v7  ;;  %v2005_v22 = vadd.f32 %v4797_v60, %v1991_v51  ;;  %v2006_v21 = vadd.f32 %v4797_v60, %v1992_v8 }
 0x60d   :  { %vm2007_vm12 = vcmp.ge.f32.partialorder %v1999_v9, 0.0  ;;  %vm2008_vm13 = vcmp.ge.f32.partialorder %v2000_v10, 0.0  ;;  %vm2009_vm14 = vcmp.ge.f32.partialorder %v2001_v11, 0.0  ;;  %vm2010_vm15 = vcmp.ge.f32.partialorder %v2002_v12, 0.0 }
 0x60e   :  { %vm2011_vm2 = vcmp.ge.f32.partialorder %v2003_v18, 0.0  ;;  %vm2012_vm3 = vcmp.ge.f32.partialorder %v2004_v20, 0.0  ;;  %vm2013_vm4 = vcmp.ge.f32.partialorder %v2005_v22, 0.0  ;;  %vm2014_vm5 = vcmp.ge.f32.partialorder %v2006_v21, 0.0 }
 0x60f   :  { %v2015_v23 = vmul.f32 0.3, %v1999_v9  ;;  %v2016_v24 = vmul.f32 0.3, %v2000_v10  ;;  %v2017_v25 = vmul.f32 0.3, %v2001_v11  ;;  %v2096_v8 = vpack.c.bf16 %v2037_v61, %v2036_v6 }
 0x610   :  { %v2018_v26 = vmul.f32 0.3, %v2002_v12  ;;  %v2019_v29 = vmul.f32 0.3, %v2003_v18  ;;  %v2020_v27 = vmul.f32 0.3, %v2004_v20 }
 0x611   :  { %v2021_v31 = vmul.f32 0.3, %v2005_v22  ;;  %v2022_v32 = vmul.f32 0.3, %v2006_v21  ;;  %v2023_v33 = vsel %vm2007_vm12, %v1999_v9, %v2015_v23  ;;  %v2024_v34 = vsel %vm2008_vm13, %v2000_v10, %v2016_v24  ;;  %v2048_v23 = vld [vmem:[#allocation5 + $0x140] sm:$0xff]  ;;  %v2049_v24 = vld [vmem:[#allocation5 + $0x148] sm:$0xff] }
 0x612   :  { %v2025_v35 = vsel %vm2009_vm14, %v2001_v11, %v2017_v25  ;;  %v2026_v36 = vsel %vm2010_vm15, %v2002_v12, %v2018_v26  ;;  %v2027_v37 = vsel %vm2011_vm2, %v2003_v18, %v2019_v29  ;;  %v2028_v41 = vsel %vm2012_vm3, %v2004_v20, %v2020_v27  ;;  %2074 = vst.msk [vmem:[#allocation2 + $0x1] sm:$0xff] %vm95_vm0, %v2023_v33  ;;  %v2050_v26 = vld [vmem:[#allocation5 + $0x150] sm:$0xff]  ;;  %v2051_v29 = vld [vmem:[#allocation5 + $0x158] sm:$0xff]  ;;  %v2052_v33 = vld [vmem:[#allocation5 + $0x160] sm:$0xff] }
 0x613   :  { %2075 = vst.msk [vmem:[#allocation2 + $0x9] sm:$0xff] %vm95_vm0, %v2024_v34  ;;  %v2029_v43 = vsel %vm2013_vm4, %v2005_v22, %v2021_v31  ;;  %v2030_v44 = vsel %vm2014_vm5, %v2006_v21, %v2022_v32  ;;  %2076 = vst.msk [vmem:[#allocation2 + $0x11] sm:$0xff] %vm95_vm0, %v2025_v35  ;;  %v2097_v22 = vpack.c.bf16 %v2039_v4, %v2038_v2  ;;  %v2053_v34 = vld [vmem:[#allocation5 + $0x168] sm:$0xff] }
 0x614   :  { %2077 = vst.msk [vmem:[#allocation2 + $0x19] sm:$0xff] %vm95_vm0, %v2026_v36  ;;  %2078 = vst.msk [vmem:[#allocation2 + $0x49] sm:$0xff] %vm95_vm0, %v2027_v37  ;;  %v2280_v25 = vpack.c.bf16 %v2049_v24, %v2048_v23  ;;  %v2281_v31 = vpack.c.bf16 %v2051_v29, %v2050_v26  ;;  %v2282_v35 = vpack.c.bf16 %v2053_v34, %v2052_v33  ;;  %v2054_v36 = vld [vmem:[#allocation5 + $0x170] sm:$0xff]  ;;  %v2055_v37 = vld [vmem:[#allocation5 + $0x178] sm:$0xff] }
 0x615   :  { %2079 = vst.msk [vmem:[#allocation2 + $0x51] sm:$0xff] %vm95_vm0, %v2028_v41  ;;  %2080 = vst.msk [vmem:[#allocation2 + $0x59] sm:$0xff] %vm95_vm0, %v2029_v43  ;;  %v2283_v43 = vpack.c.bf16 %v2055_v37, %v2054_v36 }
 0x616   :  { %2081 = vst.msk [vmem:[#allocation2 + $0x61] sm:$0xff] %vm95_vm0, %v2030_v44 }
 0x619   :  { %v2098_v47 = vld [vmem:[#allocation2 + $0x1] sm:$0xff] }
 0x61a   :  { %v2099_v48 = vld [vmem:[#allocation2 + $0x9] sm:$0xff]  ;;  %v2100_v52 = vld [vmem:[#allocation2 + $0x11] sm:$0xff]  ;;  %v2082_v60 = vld [vmem:[#allocation2] sm:$0xff] }
 0x61b   :  { %v2106_v50 = vpack.c.bf16 %v2099_v48, %v2098_v47  ;;  %v2101_v53 = vld [vmem:[#allocation2 + $0x19] sm:$0xff]  ;;  %v2102_v56 = vld [vmem:[#allocation2 + $0x49] sm:$0xff] }
 0x61c   :  { %v2107_v54 = vpack.c.bf16 %v2101_v53, %v2100_v52  ;;  %v6655_v55 = vld [vmem:[#allocation2 + $0x1a] sm:$0xff]  ;;  %v2103_v57 = vld [vmem:[#allocation2 + $0x51] sm:$0xff]  ;;  %v2083_v1 = vld [vmem:[#allocation2 + $0x8] sm:$0xff] }
 0x61d   :  { %5365 = vmatprep.mubr.msk.bf16.mxu1 %vm95_vm0, %v2106_v50  ;;  %v6658_v3 = vld [vmem:[#allocation2 + $0x12] sm:$0xff]  ;;  %2745 = vst.msk [vmem:[#allocation2 + $0x20] sm:$0xff] %vm95_vm0, %v5971_v0  ;;  %v2108_v5 = vpack.c.bf16 %v2103_v57, %v2102_v56  ;;  %v2105_v63 = vld [vmem:[#allocation2 + $0x61] sm:$0xff]  ;;  %v2272_v12 = vld [vmem:[#allocation2 + $0x4a] sm:$0xff]  ;;  %v2090_v21 = vpack.c.bf16 %v2083_v1, %v2082_v60 }
 0x61e   :  { %5366 = vmatmul.mubr.msk.bf16.vlgmr.msra.gmra.mrb[12].mxu1 %vm95_vm0, %v2107_v54  ;;  %v2104_v40 = vld [vmem:[#allocation2 + $0x59] sm:$0xff]  ;;  %v6665_v39 = vld [vmem:[#allocation2 + $0x62] sm:$0xff]  ;;  %v2084_v58 = vld [vmem:[#allocation2 + $0x10] sm:$0xff]  ;;  %v2277_v45 = vpack.c.bf16 %v6655_v55, %v6658_v3 }
 0x61f   :  { %v6663_v42 = vld [vmem:[#allocation2 + $0x5a] sm:$0xff]  ;;  %5369 = vmatprep.mubr.msk.bf16.mxu1 %vm95_vm0, %v2108_v5  ;;  %5374 = vmatpush3.bf16.msra.mxu1 %v6577_v38  ;;  %2754 = vst.msk [vmem:[#allocation2 + $0x68] sm:$0xff] %vm95_vm0, %v5971_v0  ;;  %v2086_v7 = vld [vmem:[#allocation2 + $0x48] sm:$0xff]  ;;  %v2087_v51 = vld [vmem:[#allocation2 + $0x50] sm:$0xff]  ;;  %v2109_v20 = vpack.c.bf16 %v2105_v63, %v2104_v40 }
 0x620   :  { %v2085_v62 = vld [vmem:[#allocation2 + $0x18] sm:$0xff]  ;;  %5375 = vmatprep.subr.bf16.mxu1 %v2095_v59  ;;  %v2089_v10 = vld [vmem:[#allocation2 + $0x60] sm:$0xff]  ;;  %v2269_v38 = vld [vmem:[#allocation2 + $0xa] sm:$0xff]  ;;  %2750 = vst.msk [vmem:[#allocation2 + $0x48] sm:$0xff] %vm95_vm0, %v5971_v0  ;;  %v2092_v32 = vpack.c.bf16 %v2087_v51, %v2086_v7  ;;  %v2279_v47 = vpack.c.bf16 %v6665_v39, %v6663_v42 }
 0x621   :  { %2744 = vst.msk [vmem:[#allocation2 + $0x18] sm:$0xff] %vm95_vm0, %v5971_v0  ;;  %v2088_v9 = vld [vmem:[#allocation2 + $0x58] sm:$0xff]  ;;  %v2268_v11 = vld [vmem:[#allocation2 + $0x2] sm:$0xff]  ;;  %2753 = vst.msk [vmem:[#allocation2 + $0x60] sm:$0xff] %vm95_vm0, %v5971_v0  ;;  %v2091_v27 = vpack.c.bf16 %v2085_v62, %v2084_v58 }
 0x622   :  { %2741 = vst.msk [vmem:[#allocation2] sm:$0xff] %vm95_vm0, %v5971_v0  ;;  %v2273_v18 = vld [vmem:[#allocation2 + $0x52] sm:$0xff]  ;;  %2743 = vst.msk [vmem:[#allocation2 + $0x10] sm:$0xff] %vm95_vm0, %v5971_v0  ;;  %v2093_v41 = vpack.c.bf16 %v2089_v10, %v2088_v9  ;;  %v2276_v44 = vpack.c.bf16 %v2269_v38, %v2268_v11  ;;  %v2473_v48 = vld [vmem:[%s7759_s10] sm:$0xff] }
 0x623   :  { %2742 = vst.msk [vmem:[#allocation2 + $0x8] sm:$0xff] %vm95_vm0, %v5971_v0  ;;  %2752 = vst.msk [vmem:[#allocation2 + $0x58] sm:$0xff] %vm95_vm0, %v5971_v0  ;;  %5376 = vmatpush3.bf16.msra.mxu1 %v2095_v59  ;;  %v2278_v46 = vpack.c.bf16 %v2273_v18, %v2272_v12  ;;  %5413 = vmatprep.mubr.msk.f32.mxu0 %vm2481_vm6, %v2473_v48 }
 0x624   :  { %2751 = vst.msk [vmem:[#allocation2 + $0x50] sm:$0xff] %vm95_vm0, %v5971_v0  ;;  %5377 = vmatprep.subr.bf16.mxu1 %v2096_v8 }
 0x626   :  { %5370 = vmatmul.mubr.msk.bf16.gmra.mrb[16].mxu1 %vm95_vm0, %v2109_v20 }
 0x627   :  { %5378 = vmatpush3.bf16.msra.mxu1 %v2096_v8  ;;  %5381 = vmatprep.mubr.msk.bf16.mxu1 %vm95_vm0, %v2090_v21 }
 0x628   :  { %5379 = vmatprep.subr.bf16.mxu1 %v2097_v22 }
 0x62b   :  { %5380 = vmatpush3.bf16.msra.mxu1 %v2097_v22 }
 0x62c   :  { %5389 = vmatprep.subr.bf16.mxu1 %v2280_v25 }
 0x62e   :  { %5382 = vmatmul.mubr.msk.bf16.vlgmr.msra.gmra.mrb[12].mxu1 %vm95_vm0, %v2091_v27 }
 0x62f   :  { %5385 = vmatprep.mubr.msk.bf16.mxu1 %vm95_vm0, %v2092_v32  ;;  %5390 = vmatpush3.bf16.msra.mxu1 %v2280_v25 }
 0x630   :  { %5391 = vmatprep.subr.bf16.mxu1 %v2281_v31 }
 0x633   :  { %5392 = vmatpush3.bf16.msra.mxu1 %v2281_v31 }
 0x634   :  { %5393 = vmatprep.subr.bf16.mxu1 %v2282_v35 }
 0x636   :  { %5386 = vmatmul.mubr.msk.bf16.gmra.mrb[16].mxu1 %vm95_vm0, %v2093_v41 }
 0x637   :  { %5394 = vmatpush3.bf16.msra.mxu1 %v2282_v35  ;;  %5397 = vmatprep.mubr.msk.bf16.mxu1 %vm95_vm0, %v2276_v44 }
 0x638   :  { %5395 = vmatprep.subr.bf16.mxu1 %v2283_v43 }
 0x63b   :  { %5396 = vmatpush3.bf16.msra.mxu1 %v2283_v43 }
 0x63e   :  { %5398 = vmatmul.mubr.msk.bf16.vlgmr.msra.gmra.mrb[12].mxu1 %vm95_vm0, %v2277_v45 }
 0x63f   :  { %5401 = vmatprep.mubr.msk.bf16.mxu1 %vm95_vm0, %v2278_v46 }
 0x646   :  { %5402 = vmatmul.mubr.msk.bf16.gmra.mrb[16].mxu1 %vm95_vm0, %v2279_v47 }
 0x647   :  { %5433 = vmatprep.mubr.msk.f32.mxu1 %vm2481_vm6, %v2473_v48 }
 0x711   :  { %v6705_v50 = vpop.f32.mrb[12].mxu1 }
 0x712   :  { %v6707_v52 = vpop.f32.mrb[13].mxu1  ;;  %v2396_v56 = vmul.f32 %v6705_v50, %v6705_v50  ;;  %v2376_v6 = vsel %vm95_vm0, %v6705_v50, 0.0 }
 0x713   :  { %v2394_v53 = vmul.f32 %v6707_v52, %v6707_v52  ;;  %v6711_v54 = vpop.f32.mrb[14].mxu1  ;;  %v2373_v57 = vsel %vm95_vm0, %v6707_v52, 0.0 }
 0x714   :  { %v6713_v55 = vpop.f32.mrb[15].mxu1  ;;  %v2397_v40 = vmul.f32 %v6711_v54, %v6711_v54  ;;  %v2405_v60 = vsel %vm95_vm0, %v2396_v56, 0.0  ;;  %v2378_v1 = vsel %vm95_vm0, %v6711_v54, 0.0 }
 0x715   :  { %v2374_v59 = vsel %vm95_vm0, %v6713_v55, 0.0  ;;  %v2395_v3 = vmul.f32 %v6713_v55, %v6713_v55  ;;  %v2402_v61 = vsel %vm95_vm0, %v2394_v53, 0.0 }
 0x716   :  { %v2375_v5 = vadd.f32 %v2374_v59, %v2373_v57  ;;  %v2407_v7 = vsel %vm95_vm0, %v2397_v40, 0.0 }
 0x717   :  { %v2403_v63 = vsel %vm95_vm0, %v2395_v3, 0.0 }
 0x718   :  { %v2377_v42 = vadd.f32 %v2376_v6, %v2375_v5  ;;  %v2404_v39 = vadd.f32 %v2403_v63, %v2402_v61 }
 0x719   :  { %v6732_v2 = vpop.f32.mrb[16].mxu1 }
 0x71a   :  { %v2406_v4 = vadd.f32 %v2405_v60, %v2404_v39  ;;  %v2346_v58 = vpop.f32.mrb[17].mxu1  ;;  %v2379_v62 = vadd.f32 %v2378_v1, %v2377_v42  ;;  %v2400_v12 = vmul.f32 %v6732_v2, %v6732_v2  ;;  %v2384_v24 = vsel %vm95_vm0, %v6732_v2, 0.0 }
 0x71b   :  { %v2380_v51 = vsel %vm95_vm0, %v2346_v58, 0.0  ;;  %v2398_v8 = vmul.f32 %v2346_v58, %v2346_v58  ;;  %v5404_v9 = vpop.f32.mrb[18].mxu1 }
 0x71c   :  { %v2381_v10 = vadd.f32 %v2380_v51, %v2379_v62  ;;  %v2408_v11 = vadd.f32 %v2407_v7, %v2406_v4  ;;  %v2349_v38 = vpop.f32.mrb[19].mxu1  ;;  %v2401_v25 = vmul.f32 %v5404_v9, %v5404_v9  ;;  %v2413_v31 = vsel %vm95_vm0, %v2400_v12, 0.0 }
 0x71d   :  { %v2409_v18 = vsel %vm95_vm0, %v2398_v8, 0.0  ;;  %v2382_v20 = vsel %vm95_vm0, %v2349_v38, 0.0  ;;  %v2399_v22 = vmul.f32 %v2349_v38, %v2349_v38  ;;  %v2386_v32 = vsel %vm95_vm0, %v5404_v9, 0.0  ;;  %v4810_v8 = vld [vmem:[%s7756_s7 + $0x1] sm:$0x1] }
 0x71e   :  { %v2410_v21 = vadd.f32 %v2409_v18, %v2408_v11  ;;  %v2383_v23 = vadd.f32 %v2382_v20, %v2381_v10  ;;  %v2415_v35 = vsel %vm95_vm0, %v2401_v25, 0.0 }
 0x71f   :  { %v2411_v26 = vsel %vm95_vm0, %v2399_v22, 0.0 }
 0x720   :  { %v2385_v29 = vadd.f32 %v2384_v24, %v2383_v23  ;;  %v2412_v27 = vadd.f32 %v2411_v26, %v2410_v21 }
 0x722   :  { %v2387_v33 = vadd.f32 %v2386_v32, %v2385_v29  ;;  %v2414_v34 = vadd.f32 %v2413_v31, %v2412_v27 }
 0x724   :  { %v2388_v36 = vrot.slane %v2387_v33, 4  ;;  %v2416_v37 = vadd.f32 %v2415_v35, %v2414_v34 }
 0x726   :  { %v2389_v41 = vadd.f32 %v2388_v36, %v2387_v33  ;;  %v2417_v43 = vrot.slane %v2416_v37, 4 }
 0x728   :  { %v2390_v44 = vrot.slane %v2389_v41, 2  ;;  %v2418_v45 = vadd.f32 %v2417_v43, %v2416_v37 }
 0x72a   :  { %v2391_v46 = vadd.f32 %v2390_v44, %v2389_v41  ;;  %v2419_v47 = vrot.slane %v2418_v45, 2 }
 0x72c   :  { %v2392_v48 = vrot.slane %v2391_v46, 1  ;;  %v2420_v53 = vadd.f32 %v2419_v47, %v2418_v45  ;;  %v2480_v47 = vld [vmem:[%s7759_s10 + $0x38] sm:$0xff] }
 0x72e   :  { %v2393_v56 = vadd.f32 %v2392_v48, %v2391_v46  ;;  %v2421_v57 = vrot.slane %v2420_v53, 1  ;;  %v2717_v46 = vld [vmem:[#allocation3 + $0x180] sm:$0xff] }
 0x72f   :  { %v2725_v48 = vld [vmem:[#allocation3 + $0x1c0] sm:$0xff] }
 0x730   :  { %v2422_v59 = vadd.f32 %v2421_v57, %v2420_v53  ;;  %v2423_v3 = vmul.f32 0.015625, %v2393_v56  ;;  %v2726_v53 = vld [vmem:[#allocation3 + $0x1c8] sm:$0xff]  ;;  %v2719_v56 = vld [vmem:[#allocation3 + $0x190] sm:$0xff]  ;;  %v2720_v57 = vld [vmem:[#allocation3 + $0x198] sm:$0xff] }
 0x732   :  { %v2424_v5 = vmul.f32 0.015625, %v2422_v59  ;;  %v2425_v6 = vmul.f32 %v2423_v3, %v2423_v3  ;;  %v2435_v61 = vsub.f32 %v2349_v38, %v2423_v3  ;;  %v2430_v40 = vsub.f32 %v6707_v52, %v2423_v3 }
 0x733   :  { %v2431_v63 = vsub.f32 %v6713_v55, %v2423_v3  ;;  %v2434_v42 = vsub.f32 %v2346_v58, %v2423_v3  ;;  %v2432_v39 = vsub.f32 %v6705_v50, %v2423_v3  ;;  %v2433_v60 = vsub.f32 %v6711_v54, %v2423_v3  ;;  %v4812_v50 = vld [vmem:[%s7757_s8 + $0x1] ss:$0 sm:$0xff] }
 0x734   :  { %v2426_v1 = vsub.f32 %v2424_v5, %v2425_v6  ;;  %v2436_v4 = vsub.f32 %v6732_v2, %v2423_v3  ;;  %v2437_v62 = vsub.f32 %v5404_v9, %v2423_v3  ;;  %v2827_v59 = vpack.c.bf16 %v2726_v53, %v2725_v48  ;;  %v2721_v5 = vld [vmem:[#allocation3 + $0x1a0] sm:$0xff]  ;;  %v2722_v6 = vld [vmem:[#allocation3 + $0x1a8] sm:$0xff] }
 0x735   :  { %v2800_v3 = vpack.c.bf16 %v2720_v57, %v2719_v56 }
 0x736   :  { %v2427_v7 = vmax.f32 %v2426_v1, 0.0  ;;  %v2723_v1 = vld [vmem:[#allocation3 + $0x1b0] sm:$0xff] }
 0x738   :  { %v2428_v51 = vadd.f32 1e-05, %v2427_v7 }
 0x73a   :  { %5881 = vrsqrt.f32 %v2428_v51  ;;  %v2731_v51 = vld [vmem:[#allocation3 + $0x1f0] sm:$0xff] }
 0x744   :  { %v5882_v10 = vpop.eup %5881 }
 0x745   :  { %v2438_v52 = vmul.f32 %v5882_v10, %v4810_v8  ;;  %v2732_v8 = vld [vmem:[#allocation3 + $0x1f8] sm:$0xff] }
 0x746   :  { %v2830_v10 = vpack.c.bf16 %v2732_v8, %v2731_v51 }
 0x747   :  { %v2442_v55 = vrot.slane %v2438_v52, %v6426_v49  ;;  %v2733_v52 = vld [vmem:[#allocation3 + $0x200] sm:$0xff] }
 0x749   :  { %v2448_v54 = vmul.f32 %v2442_v55, %v2435_v61  ;;  %v2443_v58 = vmul.f32 %v2442_v55, %v2430_v40  ;;  %v2444_v11 = vmul.f32 %v2442_v55, %v2431_v63  ;;  %v2447_v2 = vmul.f32 %v2442_v55, %v2434_v42  ;;  %v2727_v61 = vld [vmem:[#allocation3 + $0x1d0] sm:$0xff]  ;;  %v2728_v63 = vld [vmem:[#allocation3 + $0x1d8] sm:$0xff] }
 0x74a   :  { %v2445_v9 = vmul.f32 %v2442_v55, %v2432_v39  ;;  %v2446_v38 = vmul.f32 %v2442_v55, %v2433_v60  ;;  %v2449_v12 = vmul.f32 %v2442_v55, %v2436_v4  ;;  %v2450_v18 = vmul.f32 %v2442_v55, %v2437_v62  ;;  %v2729_v39 = vld [vmem:[#allocation3 + $0x1e0] sm:$0xff]  ;;  %v2730_v60 = vld [vmem:[#allocation3 + $0x1e8] sm:$0xff]  ;;  %v2724_v4 = vld [vmem:[#allocation3 + $0x1b8] sm:$0xff] }
 0x74b   :  { %v2462_v20 = vadd.f32 %v4812_v50, %v2448_v54  ;;  %v2457_v22 = vadd.f32 %v4812_v50, %v2443_v58  ;;  %v2458_v21 = vadd.f32 %v4812_v50, %v2444_v11  ;;  %v2461_v23 = vadd.f32 %v4812_v50, %v2447_v2  ;;  %v2734_v55 = vld [vmem:[#allocation3 + $0x208] sm:$0xff] }
 0x74c   :  { %v2459_v24 = vadd.f32 %v4812_v50, %v2445_v9  ;;  %v2460_v25 = vadd.f32 %v4812_v50, %v2446_v38  ;;  %v2463_v26 = vadd.f32 %v4812_v50, %v2449_v12  ;;  %v2464_v29 = vadd.f32 %v4812_v50, %v2450_v18 }
 0x74d   :  { %v2465_v27 = vadd.f32 %v2457_v22, %v6502_v14  ;;  %v2466_v31 = vadd.f32 %v6498_v13, %v2458_v21  ;;  %v2469_v32 = vadd.f32 %v2461_v23, %v6518_v19  ;;  %v2470_v33 = vadd.f32 %v6514_v17, %v2462_v20  ;;  %v2718_v14 = vld [vmem:[#allocation3 + $0x188] sm:$0xff]  ;;  %v2477_v19 = vld [vmem:[%s7759_s10 + $0x20] sm:$0xff] }
 0x74e   :  { %v2467_v34 = vadd.f32 %v2459_v24, %v6510_v16  ;;  %v2468_v35 = vadd.f32 %v6506_v15, %v2460_v25  ;;  %v2471_v36 = vadd.f32 %v2463_v26, %v6537_v30  ;;  %v2472_v37 = vadd.f32 %v6528_v28, %v2464_v29  ;;  %v2474_v15 = vld [vmem:[%s7759_s10 + $0x8] sm:$0xff]  ;;  %v2475_v16 = vld [vmem:[%s7759_s10 + $0x10] sm:$0xff]  ;;  %v2476_v17 = vld [vmem:[%s7759_s10 + $0x18] sm:$0xff] }
 0x74f   :  { %v5669_v41 = vpack.c.bf16 %v2466_v31, %v2465_v27  ;;  %v5677_v43 = vpack.c.bf16 %v2470_v33, %v2469_v32  ;;  %v2799_v13 = vpack.c.bf16 %v2718_v14, %v2717_v46  ;;  %v2478_v28 = vld [vmem:[%s7759_s10 + $0x28] sm:$0xff]  ;;  %v2479_v30 = vld [vmem:[%s7759_s10 + $0x30] sm:$0xff]  ;;  %v2801_v40 = vpack.c.bf16 %v2722_v6, %v2721_v5  ;;  %v2735_v33 = vld [vmem:[#allocation3 + $0x210] sm:$0xff] }
 0x750   :  { %v5673_v44 = vpack.c.bf16 %v2468_v35, %v2467_v34  ;;  %v5681_v45 = vpack.c.bf16 %v2472_v37, %v2471_v36  ;;  %v2828_v42 = vpack.c.bf16 %v2728_v63, %v2727_v61  ;;  %v2829_v62 = vpack.c.bf16 %v2730_v60, %v2729_v39  ;;  %v2736_v34 = vld [vmem:[#allocation3 + $0x218] sm:$0xff] }
 0x751   :  { %5670 = vmatprep.subr.bf16.mxu0 %v5669_v41  ;;  %5678 = vmatprep.subr.bf16.mxu1 %v5677_v43  ;;  %v2802_v7 = vpack.c.bf16 %v2724_v4, %v2723_v1  ;;  %v6801_v50 = vpack.c.bf16 %v2734_v55, %v2733_v52  ;;  %v3098_v48 = vpack.c.bf16 %v2736_v34, %v2735_v33  ;;  %v2740_v55 = vld [vmem:[#allocation3 + $0x238] sm:$0xff] }
 0x752   :  { %5672 = vmatpush3.bf16.msra.mxu0 %v5669_v41  ;;  %5680 = vmatpush3.bf16.msra.mxu1 %v5677_v43 }
 0x753   :  { %5674 = vmatprep.subr.bf16.mxu0 %v5673_v44  ;;  %5682 = vmatprep.subr.bf16.mxu1 %v5681_v45 }
 0x756   :  { %5676 = vmatpush3.bf16.msra.mxu0 %v5673_v44  ;;  %5684 = vmatpush3.bf16.msra.mxu1 %v5681_v45 }
 0x757   :  { %5469 = vmatprep.subr.bf16.mxu0 %v2799_v13  ;;  %5445 = vmatprep.subr.bf16.mxu1 %v2827_v59 }
 0x759   :  { %5414 = vmatmul.mubr.msk.f32.vlgmr.msra.gmra.mrb[20].mxu0 %vm2481_vm6, %v2474_v15  ;;  %5434 = vmatmul.mubr.msk.f32.vlgmr.msra.gmra.mrb[20].mxu1 %vm2481_vm6, %v2474_v15 }
 0x75a   :  { %5416 = vmatprep.mubr.msk.f32.mxu0 %vm2481_vm6, %v2475_v16  ;;  %5436 = vmatprep.mubr.msk.f32.mxu1 %vm2481_vm6, %v2475_v16  ;;  %v2737_v16 = vld [vmem:[#allocation3 + $0x220] sm:$0xff] }
 0x75b   :  { %5470 = vmatpush3.bf16.msra.mxu0 %v2799_v13  ;;  %5446 = vmatpush3.bf16.msra.mxu1 %v2827_v59 }
 0x75c   :  { %5471 = vmatprep.subr.bf16.mxu0 %v2800_v3  ;;  %5447 = vmatprep.subr.bf16.mxu1 %v2828_v42 }
 0x75d   :  { %5417 = vmatmul.mubr.msk.f32.gmra.mrb[22].mxu0 %vm2481_vm6, %v2476_v17  ;;  %5437 = vmatmul.mubr.msk.f32.gmra.mrb[22].mxu1 %vm2481_vm6, %v2476_v17  ;;  %v2738_v17 = vld [vmem:[#allocation3 + $0x228] sm:$0xff] }
 0x75e   :  { %5419 = vmatprep.mubr.msk.f32.mxu0 %vm2481_vm6, %v2477_v19  ;;  %5439 = vmatprep.mubr.msk.f32.mxu1 %vm2481_vm6, %v2477_v19  ;;  %v3099_v4 = vpack.c.bf16 %v2738_v17, %v2737_v16 }
 0x75f   :  { %5472 = vmatpush3.bf16.msra.mxu0 %v2800_v3  ;;  %5448 = vmatpush3.bf16.msra.mxu1 %v2828_v42 }
 0x760   :  { %5473 = vmatprep.subr.bf16.mxu0 %v2801_v40  ;;  %5449 = vmatprep.subr.bf16.mxu1 %v2829_v62 }
 0x761   :  { %5420 = vmatmul.mubr.msk.f32.gmra.mrb[24].mxu0 %vm2481_vm6, %v2478_v28  ;;  %5440 = vmatmul.mubr.msk.f32.gmra.mrb[24].mxu1 %vm2481_vm6, %v2478_v28 }
 0x762   :  { %5422 = vmatprep.mubr.msk.f32.mxu0 %vm2481_vm6, %v2479_v30  ;;  %5442 = vmatprep.mubr.msk.f32.mxu1 %vm2481_vm6, %v2479_v30 }
 0x763   :  { %5474 = vmatpush3.bf16.msra.mxu0 %v2801_v40  ;;  %5450 = vmatpush3.bf16.msra.mxu1 %v2829_v62  ;;  %v2739_v62 = vld [vmem:[#allocation3 + $0x230] sm:$0xff] }
 0x764   :  { %5475 = vmatprep.subr.bf16.mxu0 %v2802_v7  ;;  %5451 = vmatprep.subr.bf16.mxu1 %v2830_v10 }
 0x765   :  { %5423 = vmatmul.mubr.msk.f32.gmra.mrb[26].mxu0 %vm2481_vm6, %v2480_v47  ;;  %5443 = vmatmul.mubr.msk.f32.gmra.mrb[26].mxu1 %vm2481_vm6, %v2480_v47 }
 0x767   :  { %5476 = vmatpush3.bf16.msra.mxu0 %v2802_v7  ;;  %5452 = vmatpush3.bf16.msra.mxu1 %v2830_v10 }
 0x768   :  { %5493 = vmatprep.subr.bf16.mxu0 %v6801_v50 }
 0x82c   :  { %v6804_v54 = vpop.f32.mrb[20].mxu0  ;;  %v6806_v58 = vpop.f32.mrb[20].mxu1 }
 0x82d   :  { %2760 = vst.msk [vmem:[#allocation2 + $0x9] sm:$0xff] %vm95_vm0, %v6804_v54  ;;  %v6810_v11 = vpop.f32.mrb[21].mxu0  ;;  %2768 = vst.msk [vmem:[#allocation2 + $0x51] sm:$0xff] %vm95_vm0, %v6806_v58  ;;  %v6814_v2 = vpop.f32.mrb[21].mxu1 }
 0x82e   :  { %2759 = vst.msk [vmem:[#allocation2 + $0x1] sm:$0xff] %vm95_vm0, %v6810_v11  ;;  %2767 = vst.msk [vmem:[#allocation2 + $0x49] sm:$0xff] %vm95_vm0, %v6814_v2 }
 0x830   :  { %v6820_v9 = vpop.f32.mrb[22].mxu0  ;;  %v6822_v38 = vpop.f32.mrb[22].mxu1 }
 0x831   :  { %2762 = vst.msk [vmem:[#allocation2 + $0x19] sm:$0xff] %vm95_vm0, %v6820_v9  ;;  %v6826_v12 = vpop.f32.mrb[23].mxu0  ;;  %2770 = vst.msk [vmem:[#allocation2 + $0x61] sm:$0xff] %vm95_vm0, %v6822_v38  ;;  %v6830_v18 = vpop.f32.mrb[23].mxu1 }
 0x832   :  { %2761 = vst.msk [vmem:[#allocation2 + $0x11] sm:$0xff] %vm95_vm0, %v6826_v12  ;;  %2769 = vst.msk [vmem:[#allocation2 + $0x59] sm:$0xff] %vm95_vm0, %v6830_v18 }
 0x834   :  { %v6836_v20 = vpop.f32.mrb[24].mxu0  ;;  %v2804_v22 = vld [vmem:[#allocation2 + $0x9] sm:$0xff]  ;;  %v6838_v21 = vpop.f32.mrb[24].mxu1  ;;  %v6886_v53 = vld [vmem:[#allocation2 + $0x51] sm:$0xff] }
 0x835   :  { %2764 = vst.msk [vmem:[#allocation2 + $0x29] sm:$0xff] %vm95_vm0, %v6836_v20  ;;  %v6842_v23 = vpop.f32.mrb[25].mxu0  ;;  %v2775_v24 = vld [vmem:[#allocation2] sm:$0xff]  ;;  %v2776_v25 = vld [vmem:[#allocation2 + $0x8] sm:$0xff]  ;;  %2772 = vst.msk [vmem:[#allocation2 + $0x71] sm:$0xff] %vm95_vm0, %v6838_v21  ;;  %v6846_v29 = vpop.f32.mrb[25].mxu1 }
 0x836   :  { %v2803_v26 = vld [vmem:[#allocation2 + $0x1] sm:$0xff]  ;;  %2763 = vst.msk [vmem:[#allocation2 + $0x21] sm:$0xff] %vm95_vm0, %v6842_v23  ;;  %v2791_v27 = vpack.c.bf16 %v2776_v25, %v2775_v24  ;;  %2771 = vst.msk [vmem:[#allocation2 + $0x69] sm:$0xff] %vm95_vm0, %v6846_v29  ;;  %v6854_v35 = vld [vmem:[#allocation2 + $0x49] sm:$0xff] }
 0x837   :  { %v2819_v31 = vpack.c.bf16 %v2804_v22, %v2803_v26  ;;  %v6852_v32 = vld [vmem:[#allocation2 + $0x48] sm:$0xff]  ;;  %v6882_v30 = vld [vmem:[#allocation2 + $0x50] sm:$0xff]  ;;  %v2823_v26 = vpack.c.bf16 %v6886_v53, %v6854_v35 }
 0x838   :  { %v6856_v36 = vld [vmem:[#allocation2 + $0x2] sm:$0xff]  ;;  %v6858_v37 = vld [vmem:[#allocation2 + $0x4a] sm:$0xff]  ;;  %v6860_v41 = vpop.f32.mrb[26].mxu0  ;;  %5477 = vmatprep.mubr.msk.bf16.mxu0 %vm95_vm0, %v2791_v27  ;;  %v2806_v43 = vld [vmem:[#allocation2 + $0x19] sm:$0xff]  ;;  %v6864_v44 = vpop.f32.mrb[26].mxu1  ;;  %v2795_v25 = vpack.c.bf16 %v6882_v30, %v6852_v32 }
 0x839   :  { %5453 = vmatprep.mubr.msk.bf16.mxu1 %vm95_vm0, %v2819_v31  ;;  %3471 = vst.msk [vmem:[#allocation2] sm:$0xff] %vm95_vm0, %v5971_v0  ;;  %3480 = vst.msk [vmem:[#allocation2 + $0x48] sm:$0xff] %vm95_vm0, %v5971_v0  ;;  %v6872_v45 = vpop.f32.mrb[27].mxu0  ;;  %v2777_v46 = vld [vmem:[#allocation2 + $0x10] sm:$0xff]  ;;  %v2778_v14 = vld [vmem:[#allocation2 + $0x18] sm:$0xff]  ;;  %v6876_v15 = vpop.f32.mrb[27].mxu1 }
 0x83a   :  { %2766 = vst.msk [vmem:[#allocation2 + $0x39] sm:$0xff] %vm95_vm0, %v6860_v41  ;;  %v2805_v13 = vld [vmem:[#allocation2 + $0x11] sm:$0xff]  ;;  %2774 = vst.msk [vmem:[#allocation2 + $0x81] sm:$0xff] %vm95_vm0, %v6864_v44  ;;  %v2792_v19 = vpack.c.bf16 %v2778_v14, %v2777_v46  ;;  %v6896_v5 = vld [vmem:[#allocation2 + $0x59] sm:$0xff] }
 0x83b   :  { %2765 = vst.msk [vmem:[#allocation2 + $0x31] sm:$0xff] %vm95_vm0, %v6872_v45  ;;  %v2820_v28 = vpack.c.bf16 %v2806_v43, %v2805_v13  ;;  %2773 = vst.msk [vmem:[#allocation2 + $0x79] sm:$0xff] %vm95_vm0, %v6876_v15  ;;  %v6884_v47 = vld [vmem:[#allocation2 + $0x58] sm:$0xff]  ;;  %v6888_v56 = vld [vmem:[#allocation2 + $0xa] sm:$0xff] }
 0x83c   :  { %v6890_v57 = vld [vmem:[#allocation2 + $0x12] sm:$0xff]  ;;  %5478 = vmatmul.mubr.msk.bf16.vlgmr.msra.gmra.mrb[28].mxu0 %vm95_vm0, %v2792_v19  ;;  %v2808_v3 = vld [vmem:[#allocation2 + $0x29] sm:$0xff]  ;;  %3472 = vst.msk [vmem:[#allocation2 + $0x8] sm:$0xff] %vm95_vm0, %v5971_v0  ;;  %v6904_v6 = vld [vmem:[#allocation2 + $0x5a] sm:$0xff]  ;;  %v3100_v19 = vpack.c.bf16 %v2740_v55, %v2739_v62 }
 0x83d   :  { %v6892_v59 = vld [vmem:[#allocation2 + $0x52] sm:$0xff]  ;;  %5454 = vmatmul.mubr.msk.bf16.vlgmr.msra.gmra.mrb[28].mxu1 %vm95_vm0, %v2820_v28  ;;  %3473 = vst.msk [vmem:[#allocation2 + $0x10] sm:$0xff] %vm95_vm0, %v5971_v0  ;;  %v2779_v61 = vld [vmem:[#allocation2 + $0x20] sm:$0xff]  ;;  %v2780_v40 = vld [vmem:[#allocation2 + $0x28] sm:$0xff]  ;;  %5494 = vmatpush3.bf16.msra.mxu0 %v6801_v50 }
 0x83e   :  { %3481 = vst.msk [vmem:[#allocation2 + $0x50] sm:$0xff] %vm95_vm0, %v5971_v0  ;;  %v2807_v63 = vld [vmem:[#allocation2 + $0x21] sm:$0xff]  ;;  %3482 = vst.msk [vmem:[#allocation2 + $0x58] sm:$0xff] %vm95_vm0, %v5971_v0  ;;  %v2793_v42 = vpack.c.bf16 %v2780_v40, %v2779_v61  ;;  %5495 = vmatprep.subr.bf16.mxu0 %v3098_v48  ;;  %v2788_v43 = vld [vmem:[#allocation2 + $0x70] sm:$0xff] }
 0x83f   :  { %v2821_v39 = vpack.c.bf16 %v2808_v3, %v2807_v63  ;;  %v2786_v60 = vld [vmem:[#allocation2 + $0x60] sm:$0xff]  ;;  %v2787_v34 = vld [vmem:[#allocation2 + $0x68] sm:$0xff]  ;;  %v2816_v16 = vld [vmem:[#allocation2 + $0x71] sm:$0xff] }
 0x840   :  { %v2814_v1 = vld [vmem:[#allocation2 + $0x61] sm:$0xff]  ;;  %5481 = vmatprep.mubr.msk.bf16.mxu0 %vm95_vm0, %v2793_v42  ;;  %v2815_v13 = vld [vmem:[#allocation2 + $0x69] sm:$0xff]  ;;  %v2796_v40 = vpack.c.bf16 %v2786_v60, %v6884_v47  ;;  %v2797_v63 = vpack.c.bf16 %v2788_v43, %v2787_v34  ;;  %v3460_v55 = vld [vmem:[#allocation5 + $0x1e8] sm:$0xff] }
 0x841   :  { %v6909_v7 = vld [vmem:[#allocation2 + $0x1a] sm:$0xff]  ;;  %v6911_v51 = vld [vmem:[#allocation2 + $0x22] sm:$0xff]  ;;  %5457 = vmatprep.mubr.msk.bf16.mxu1 %vm95_vm0, %v2821_v39  ;;  %5496 = vmatpush3.bf16.msra.mxu0 %v3098_v48  ;;  %v3085_v32 = vld [vmem:[#allocation2 + $0x6a] sm:$0xff]  ;;  %v2824_v48 = vpack.c.bf16 %v2814_v1, %v6896_v5  ;;  %v2825_v53 = vpack.c.bf16 %v2816_v16, %v2815_v13 }
 0x842   :  { %v6913_v8 = vld [vmem:[#allocation2 + $0x62] sm:$0xff]  ;;  %v2810_v10 = vld [vmem:[#allocation2 + $0x39] sm:$0xff]  ;;  %3474 = vst.msk [vmem:[#allocation2 + $0x18] sm:$0xff] %vm95_vm0, %v5971_v0  ;;  %3475 = vst.msk [vmem:[#allocation2 + $0x20] sm:$0xff] %vm95_vm0, %v5971_v0  ;;  %5497 = vmatprep.subr.bf16.mxu0 %v3099_v4  ;;  %v3090_v47 = vpack.c.bf16 %v6909_v7, %v6890_v57 }
 0x843   :  { %v6917_v52 = vld [vmem:[#allocation2 + $0x3a] sm:$0xff]  ;;  %3483 = vst.msk [vmem:[#allocation2 + $0x60] sm:$0xff] %vm95_vm0, %v5971_v0  ;;  %v2781_v50 = vld [vmem:[#allocation2 + $0x30] sm:$0xff]  ;;  %v3088_v28 = vld [vmem:[#allocation2 + $0x82] sm:$0xff] }
 0x844   :  { %v2782_v22 = vld [vmem:[#allocation2 + $0x38] sm:$0xff]  ;;  %3479 = vst.msk [vmem:[#allocation2 + $0x40] sm:$0xff] %vm95_vm0, %v5971_v0  ;;  %v2818_v27 = vld [vmem:[#allocation2 + $0x81] sm:$0xff]  ;;  %v3078_v3 = vld [vmem:[#allocation2 + $0x2a] sm:$0xff] }
 0x845   :  { %v2809_v24 = vld [vmem:[#allocation2 + $0x31] sm:$0xff]  ;;  %v2794_v31 = vpack.c.bf16 %v2782_v22, %v2781_v50  ;;  %v2790_v14 = vld [vmem:[#allocation2 + $0x80] sm:$0xff]  ;;  %3488 = vst.msk [vmem:[#allocation2 + $0x88] sm:$0xff] %vm95_vm0, %v5971_v0  ;;  %3476 = vst.msk [vmem:[#allocation2 + $0x28] sm:$0xff] %vm95_vm0, %v5971_v0  ;;  %5498 = vmatpush3.bf16.msra.mxu0 %v3099_v4  ;;  %v3089_v4 = vpack.c.bf16 %v6888_v56, %v6856_v36  ;;  %v3091_v5 = vpack.c.bf16 %v3078_v3, %v6911_v51 }
 0x846   :  { %v2822_v33 = vpack.c.bf16 %v2810_v10, %v2809_v24  ;;  %v2789_v46 = vld [vmem:[#allocation2 + $0x78] sm:$0xff]  ;;  %3484 = vst.msk [vmem:[#allocation2 + $0x68] sm:$0xff] %vm95_vm0, %v5971_v0  ;;  %5499 = vmatprep.subr.bf16.mxu0 %v3100_v19  ;;  %v3093_v36 = vpack.c.bf16 %v6892_v59, %v6858_v37  ;;  %v3094_v56 = vpack.c.bf16 %v6913_v8, %v6904_v6  ;;  %v3455_v62 = vld [vmem:[#allocation5 + $0x1c0] sm:$0xff]  ;;  %v3457_v37 = vld [vmem:[#allocation5 + $0x1d0] sm:$0xff] }
 0x847   :  { %v2817_v17 = vld [vmem:[#allocation2 + $0x79] sm:$0xff]  ;;  %5482 = vmatmul.mubr.msk.bf16.gmra.mrb[32].mxu0 %vm95_vm0, %v2794_v31  ;;  %v2798_v39 = vpack.c.bf16 %v2790_v14, %v2789_v46  ;;  %v3458_v59 = vld [vmem:[#allocation5 + $0x1d8] sm:$0xff]  ;;  %v3459_v10 = vld [vmem:[#allocation5 + $0x1e0] sm:$0xff] }
 0x848   :  { %v3079_v61 = vld [vmem:[#allocation2 + $0x32] sm:$0xff]  ;;  %5458 = vmatmul.mubr.msk.bf16.gmra.mrb[32].mxu1 %vm95_vm0, %v2822_v33  ;;  %v3087_v30 = vld [vmem:[#allocation2 + $0x7a] sm:$0xff]  ;;  %5485 = vmatprep.mubr.msk.bf16.mxu0 %vm95_vm0, %v2795_v25  ;;  %v2826_v42 = vpack.c.bf16 %v2818_v27, %v2817_v17  ;;  %v3559_v50 = vpack.c.bf16 %v3460_v55, %v3459_v10  ;;  %v3462_v8 = vld [vmem:[#allocation5 + $0x1f8] sm:$0xff] }
 0x849   :  { %3477 = vst.msk [vmem:[#allocation2 + $0x30] sm:$0xff] %vm95_vm0, %v5971_v0  ;;  %3478 = vst.msk [vmem:[#allocation2 + $0x38] sm:$0xff] %vm95_vm0, %v5971_v0  ;;  %v3086_v35 = vld [vmem:[#allocation2 + $0x72] sm:$0xff]  ;;  %5461 = vmatprep.mubr.msk.bf16.mxu1 %vm95_vm0, %v2823_v26  ;;  %5500 = vmatpush3.bf16.msra.mxu0 %v3100_v19  ;;  %v3092_v60 = vpack.c.bf16 %v6917_v52, %v3079_v61  ;;  %v3096_v57 = vpack.c.bf16 %v3088_v28, %v3087_v30  ;;  %v3461_v6 = vld [vmem:[#allocation5 + $0x1f0] sm:$0xff] }
 0x84a   :  { %3485 = vst.msk [vmem:[#allocation2 + $0x70] sm:$0xff] %vm95_vm0, %v5971_v0  ;;  %3487 = vst.msk [vmem:[#allocation2 + $0x80] sm:$0xff] %vm95_vm0, %v5971_v0  ;;  %v3095_v1 = vpack.c.bf16 %v3086_v35, %v3085_v32  ;;  %v3456_v7 = vld [vmem:[#allocation5 + $0x1c8] sm:$0xff]  ;;  %v3558_v52 = vpack.c.bf16 %v3458_v59, %v3457_v37  ;;  %v3560_v22 = vpack.c.bf16 %v3462_v8, %v3461_v6  ;;  %v3447_v33 = vld [vmem:[#allocation5 + $0x180] sm:$0xff] }
 0x84b   :  { %3486 = vst.msk [vmem:[#allocation2 + $0x78] sm:$0xff] %vm95_vm0, %v5971_v0  ;;  %v3557_v51 = vpack.c.bf16 %v3456_v7, %v3455_v62  ;;  %v3448_v34 = vld [vmem:[#allocation5 + $0x188] sm:$0xff] }
 0x84c   :  { %v6977_v46 = vpack.c.bf16 %v3448_v34, %v3447_v33 }
 0x84d   :  { %5517 = vmatprep.subr.bf16.mxu1 %v3557_v51 }
 0x84e   :  { %5518 = vmatpush3.bf16.msra.mxu1 %v3557_v51 }
 0x84f   :  { %5486 = vmatmul.mubr.msk.bf16.gmra.mrb[36].mxu0 %vm95_vm0, %v2796_v40  ;;  %5519 = vmatprep.subr.bf16.mxu1 %v3558_v52 }
 0x850   :  { %5462 = vmatmul.mubr.msk.bf16.gmra.mrb[36].mxu1 %vm95_vm0, %v2824_v48  ;;  %5489 = vmatprep.mubr.msk.bf16.mxu0 %vm95_vm0, %v2797_v63 }
 0x851   :  { %5465 = vmatprep.mubr.msk.bf16.mxu1 %vm95_vm0, %v2825_v53 }
 0x852   :  { %5520 = vmatpush3.bf16.msra.mxu1 %v3558_v52 }
 0x853   :  { %5521 = vmatprep.subr.bf16.mxu1 %v3559_v50 }
 0x856   :  { %5522 = vmatpush3.bf16.msra.mxu1 %v3559_v50 }
 0x857   :  { %5490 = vmatmul.mubr.msk.bf16.gmra.mrb[40].mxu0 %vm95_vm0, %v2798_v39  ;;  %5523 = vmatprep.subr.bf16.mxu1 %v3560_v22 }
 0x858   :  { %5466 = vmatmul.mubr.msk.bf16.gmra.mrb[40].mxu1 %vm95_vm0, %v2826_v42  ;;  %5501 = vmatprep.mubr.msk.bf16.mxu0 %vm95_vm0, %v3089_v4 }
 0x85a   :  { %5524 = vmatpush3.bf16.msra.mxu1 %v3560_v22 }
 0x85b   :  { %5541 = vmatprep.subr.bf16.mxu1 %v6977_v46 }
 0x85f   :  { %5502 = vmatmul.mubr.msk.bf16.vlgmr.msra.gmra.mrb[28].mxu0 %vm95_vm0, %v3090_v47 }
 0x860   :  { %5505 = vmatprep.mubr.msk.bf16.mxu0 %vm95_vm0, %v3091_v5 }
 0x867   :  { %5506 = vmatmul.mubr.msk.bf16.gmra.mrb[32].mxu0 %vm95_vm0, %v3092_v60 }
 0x868   :  { %5509 = vmatprep.mubr.msk.bf16.mxu0 %vm95_vm0, %v3093_v36 }
 0x86f   :  { %5510 = vmatmul.mubr.msk.bf16.gmra.mrb[36].mxu0 %vm95_vm0, %v3094_v56 }
 0x870   :  { %5513 = vmatprep.mubr.msk.bf16.mxu0 %vm95_vm0, %v3095_v1 }
 0x877   :  { %5514 = vmatmul.mubr.msk.bf16.gmra.mrb[40].mxu0 %vm95_vm0, %v3096_v57 }
 0x910   :  { %v5455_v24 = vpop.f32.mrb[28].mxu1 }
 0x911   :  { %v2889_v25 = vpop.f32.mrb[29].mxu1 }
 0x912   :  { %v5456_v26 = vpop.f32.mrb[30].mxu1 }
 0x913   :  { %v2892_v27 = vpop.f32.mrb[31].mxu1 }
 0x91b   :  { %v5459_v31 = vpop.f32.mrb[32].mxu1 }
 0x91c   :  { %v2905_v43 = vpop.f32.mrb[33].mxu1 }
 0x91d   :  { %v5460_v14 = vpop.f32.mrb[34].mxu1 }
 0x91e   :  { %v2908_v13 = vpop.f32.mrb[35].mxu1 }
 0x923   :  { %v5463_v16 = vpop.f32.mrb[36].mxu1 }
 0x924   :  { %v2921_v17 = vpop.f32.mrb[37].mxu1 }
 0x925   :  { %v5464_v19 = vpop.f32.mrb[38].mxu1 }
 0x926   :  { %v6980_v28 = vpop.f32.mrb[39].mxu1 }
 0x92b   :  { %v6982_v3 = vpop.f32.mrb[40].mxu1 }
 0x92c   :  { %v6984_v61 = vpop.f32.mrb[41].mxu1 }
 0x92d   :  { %v6986_v32 = vpop.f32.mrb[42].mxu1 }
 0x92e   :  { %v6988_v35 = vpop.f32.mrb[43].mxu1 }
 0x932   :  { %v5503_v30 = vpop.f32.mrb[28].mxu0 }
 0x933   :  { %v6990_v48 = vadd.f32 %v5503_v30, %v5455_v24  ;;  %v3159_v53 = vpop.f32.mrb[29].mxu0 }
 0x934   :  { %v6992_v40 = vadd.f32 %v3159_v53, %v2889_v25  ;;  %v5504_v63 = vpop.f32.mrb[30].mxu0 }
 0x935   :  { %v6994_v42 = vadd.f32 %v5504_v63, %v5456_v26  ;;  %v3162_v39 = vpop.f32.mrb[31].mxu0  ;;  %v3281_v5 = vmul.f32 %v6990_v48, %v6990_v48  ;;  %v3245_v62 = vsel %vm95_vm0, %v6990_v48, 0.0 }
 0x936   :  { %v3279_v4 = vmul.f32 %v6992_v40, %v6992_v40  ;;  %v6998_v47 = vadd.f32 %v3162_v39, %v2892_v27  ;;  %v3242_v60 = vsel %vm95_vm0, %v6992_v40, 0.0 }
 0x937   :  { %v3282_v1 = vmul.f32 %v6994_v42, %v6994_v42  ;;  %v3298_v50 = vsel %vm95_vm0, %v3281_v5, 0.0  ;;  %v3247_v6 = vsel %vm95_vm0, %v6994_v42, 0.0 }
 0x938   :  { %v3243_v36 = vsel %vm95_vm0, %v6998_v47, 0.0  ;;  %v3280_v56 = vmul.f32 %v6998_v47, %v6998_v47  ;;  %v3295_v7 = vsel %vm95_vm0, %v3279_v4, 0.0 }
 0x939   :  { %v3244_v57 = vadd.f32 %v3243_v36, %v3242_v60  ;;  %v3300_v24 = vsel %vm95_vm0, %v3282_v1, 0.0 }
 0x93a   :  { %v3296_v51 = vsel %vm95_vm0, %v3280_v56, 0.0  ;;  %v5507_v37 = vpop.f32.mrb[32].mxu0 }
 0x93b   :  { %v3246_v59 = vadd.f32 %v3245_v62, %v3244_v57  ;;  %v3297_v10 = vadd.f32 %v3296_v51, %v3295_v7  ;;  %v7014_v52 = vadd.f32 %v5507_v37, %v5459_v31  ;;  %v3175_v55 = vpop.f32.mrb[33].mxu0 }
 0x93c   :  { %v7019_v8 = vadd.f32 %v3175_v55, %v2905_v43  ;;  %v5508_v22 = vpop.f32.mrb[34].mxu0 }
 0x93d   :  { %v3299_v25 = vadd.f32 %v3298_v50, %v3297_v10  ;;  %v3248_v26 = vadd.f32 %v3247_v6, %v3246_v59  ;;  %v3178_v27 = vpop.f32.mrb[35].mxu0  ;;  %v7026_v34 = vadd.f32 %v5508_v22, %v5460_v14  ;;  %v3285_v4 = vmul.f32 %v7014_v52, %v7014_v52 }
 0x93e   :  { %v3249_v33 = vsel %vm95_vm0, %v7019_v8, 0.0  ;;  %v3283_v31 = vmul.f32 %v7019_v8, %v7019_v8  ;;  %v7028_v30 = vadd.f32 %v3178_v27, %v2908_v13  ;;  %v3253_v14 = vsel %vm95_vm0, %v7014_v52, 0.0 }
 0x93f   :  { %v3250_v53 = vadd.f32 %v3249_v33, %v3248_v26  ;;  %v3301_v63 = vadd.f32 %v3300_v24, %v3299_v25  ;;  %v3286_v56 = vmul.f32 %v7026_v34, %v7026_v34  ;;  %v3255_v51 = vsel %vm95_vm0, %v7026_v34, 0.0 }
 0x940   :  { %v3302_v43 = vsel %vm95_vm0, %v3283_v31, 0.0  ;;  %v3251_v39 = vsel %vm95_vm0, %v7028_v30, 0.0  ;;  %v3284_v36 = vmul.f32 %v7028_v30, %v7028_v30  ;;  %v3306_v55 = vsel %vm95_vm0, %v3285_v4, 0.0 }
 0x941   :  { %v3303_v5 = vadd.f32 %v3302_v43, %v3301_v63  ;;  %v3252_v60 = vadd.f32 %v3251_v39, %v3250_v53 }
 0x942   :  { %v5511_v13 = vpop.f32.mrb[36].mxu0  ;;  %v3304_v57 = vsel %vm95_vm0, %v3284_v36, 0.0 }
 0x943   :  { %v3254_v1 = vadd.f32 %v3253_v14, %v3252_v60  ;;  %v7042_v62 = vadd.f32 %v5511_v13, %v5463_v16  ;;  %v3191_v7 = vpop.f32.mrb[37].mxu0  ;;  %v3305_v37 = vadd.f32 %v3304_v57, %v3303_v5 }
 0x944   :  { %v7046_v59 = vadd.f32 %v3191_v7, %v2921_v17  ;;  %v5512_v10 = vpop.f32.mrb[38].mxu0  ;;  %v3308_v17 = vsel %vm95_vm0, %v3286_v56, 0.0 }
 0x945   :  { %v3256_v50 = vadd.f32 %v3255_v51, %v3254_v1  ;;  %v7049_v6 = vadd.f32 %v5512_v10, %v5464_v19  ;;  %v3194_v22 = vpop.f32.mrb[39].mxu0  ;;  %v3307_v24 = vadd.f32 %v3306_v55, %v3305_v37  ;;  %v3289_v63 = vmul.f32 %v7042_v62, %v7042_v62 }
 0x946   :  { %v3257_v25 = vsel %vm95_vm0, %v7046_v59, 0.0  ;;  %v3287_v16 = vmul.f32 %v7046_v59, %v7046_v59  ;;  %v7056_v26 = vadd.f32 %v3194_v22, %v6980_v28  ;;  %v3261_v28 = vsel %vm95_vm0, %v7042_v62, 0.0 }
 0x947   :  { %v3258_v27 = vadd.f32 %v3257_v25, %v3256_v50  ;;  %v3309_v33 = vadd.f32 %v3308_v17, %v3307_v24  ;;  %v3290_v60 = vmul.f32 %v7049_v6, %v7049_v6  ;;  %v3263_v56 = vsel %vm95_vm0, %v7049_v6, 0.0 }
 0x948   :  { %v3310_v31 = vsel %vm95_vm0, %v3287_v16, 0.0  ;;  %v3259_v19 = vsel %vm95_vm0, %v7056_v26, 0.0  ;;  %v3288_v53 = vmul.f32 %v7056_v26, %v7056_v26  ;;  %v3314_v51 = vsel %vm95_vm0, %v3289_v63, 0.0 }
 0x949   :  { %v3260_v43 = vadd.f32 %v3259_v19, %v3258_v27  ;;  %v3311_v39 = vadd.f32 %v3310_v31, %v3309_v33 }
 0x94a   :  { %v3312_v4 = vsel %vm95_vm0, %v3288_v53, 0.0  ;;  %v5515_v5 = vpop.f32.mrb[40].mxu0 }
 0x94b   :  { %v3262_v36 = vadd.f32 %v3261_v28, %v3260_v43  ;;  %v7072_v14 = vadd.f32 %v5515_v5, %v6982_v3  ;;  %v3207_v13 = vpop.f32.mrb[41].mxu0  ;;  %v3313_v1 = vadd.f32 %v3312_v4, %v3311_v39 }
 0x94c   :  { %v7077_v57 = vadd.f32 %v3207_v13, %v6984_v61  ;;  %v5516_v7 = vpop.f32.mrb[42].mxu0  ;;  %v3316_v61 = vsel %vm95_vm0, %v3290_v60, 0.0 }
 0x94d   :  { %v3264_v37 = vadd.f32 %v3263_v56, %v3262_v36  ;;  %v7081_v10 = vadd.f32 %v5516_v7, %v6986_v32  ;;  %v3210_v55 = vpop.f32.mrb[43].mxu0  ;;  %v3315_v50 = vadd.f32 %v3314_v51, %v3313_v1  ;;  %v3293_v33 = vmul.f32 %v7072_v14, %v7072_v14 }
 0x94e   :  { %v3265_v3 = vsel %vm95_vm0, %v7077_v57, 0.0  ;;  %v3291_v22 = vmul.f32 %v7077_v57, %v7077_v57  ;;  %v7088_v24 = vadd.f32 %v3210_v55, %v6988_v35  ;;  %v3269_v35 = vsel %vm95_vm0, %v7072_v14, 0.0 }
 0x94f   :  { %v3266_v25 = vadd.f32 %v3265_v3, %v3264_v37  ;;  %v3317_v16 = vadd.f32 %v3316_v61, %v3315_v50  ;;  %v3294_v63 = vmul.f32 %v7081_v10, %v7081_v10  ;;  %v3271_v28 = vsel %vm95_vm0, %v7081_v10, 0.0 }
 0x950   :  { %v3318_v17 = vsel %vm95_vm0, %v3291_v22, 0.0  ;;  %v3267_v32 = vsel %vm95_vm0, %v7088_v24, 0.0  ;;  %v3292_v27 = vmul.f32 %v7088_v24, %v7088_v24  ;;  %v3322_v4 = vsel %vm95_vm0, %v3293_v33, 0.0 }
 0x951   :  { %v3268_v31 = vadd.f32 %v3267_v32, %v3266_v25  ;;  %v3319_v19 = vadd.f32 %v3318_v17, %v3317_v16  ;;  %v3324_v36 = vsel %vm95_vm0, %v3294_v63, 0.0 }
 0x952   :  { %v3320_v53 = vsel %vm95_vm0, %v3292_v27, 0.0 }
 0x953   :  { %v3270_v43 = vadd.f32 %v3269_v35, %v3268_v31  ;;  %v3321_v39 = vadd.f32 %v3320_v53, %v3319_v19 }
 0x955   :  { %v3272_v5 = vadd.f32 %v3271_v28, %v3270_v43  ;;  %v3323_v60 = vadd.f32 %v3322_v4, %v3321_v39 }
 0x957   :  { %v3273_v13 = vrot.slane %v3272_v5, 4  ;;  %v3325_v56 = vadd.f32 %v3324_v36, %v3323_v60 }
 0x959   :  { %v3274_v1 = vadd.f32 %v3273_v13, %v3272_v5  ;;  %v3326_v7 = vrot.slane %v3325_v56, 4  ;;  %v4853_v5 = vld [vmem:[%s7753_s4 + $0x2] sm:$0x1] }
 0x95a   :  { %v3449_v13 = vld [vmem:[#allocation5 + $0x190] sm:$0xff] }
 0x95b   :  { %v3275_v51 = vrot.slane %v3274_v1, 2  ;;  %v3327_v37 = vadd.f32 %v3326_v7, %v3325_v56  ;;  %v3450_v56 = vld [vmem:[#allocation5 + $0x198] sm:$0xff]  ;;  %v7152_v7 = vld [vmem:[%s7754_s5 + $0x2] ss:$0 sm:$0xff] }
 0x95d   :  { %v3276_v55 = vadd.f32 %v3275_v51, %v3274_v1  ;;  %v3328_v50 = vrot.slane %v3327_v37, 2  ;;  %v7154_v51 = vpack.c.bf16 %v3450_v56, %v3449_v13 }
 0x95f   :  { %v3277_v3 = vrot.slane %v3276_v55, 1  ;;  %v3329_v22 = vadd.f32 %v3328_v50, %v3327_v37 }
 0x961   :  { %v3278_v61 = vadd.f32 %v3277_v3, %v3276_v55  ;;  %v3330_v25 = vrot.slane %v3329_v22, 1 }
 0x963   :  { %v7107_v16 = vmul.f32 0.0078125, %v3278_v61  ;;  %v3331_v17 = vadd.f32 %v3330_v25, %v3329_v22 }
 0x965   :  { %v3334_v32 = vmul.f32 %v7107_v16, %v7107_v16  ;;  %v3340_v27 = vsub.f32 %v6998_v47, %v7107_v16  ;;  %v3341_v33 = vsub.f32 %v6990_v48, %v7107_v16  ;;  %v3348_v31 = vsub.f32 %v7056_v26, %v7107_v16 }
 0x966   :  { %v3333_v35 = vmul.f32 0.0078125, %v3331_v17  ;;  %v3349_v19 = vsub.f32 %v7042_v62, %v7107_v16  ;;  %v3352_v53 = vsub.f32 %v7088_v24, %v7107_v16  ;;  %v3339_v63 = vsub.f32 %v6992_v40, %v7107_v16 }
 0x967   :  { %v3342_v43 = vsub.f32 %v6994_v42, %v7107_v16  ;;  %v3343_v47 = vsub.f32 %v7019_v8, %v7107_v16  ;;  %v3344_v48 = vsub.f32 %v7028_v30, %v7107_v16  ;;  %v3345_v26 = vsub.f32 %v7014_v52, %v7107_v16 }
 0x968   :  { %v3335_v28 = vsub.f32 %v3333_v35, %v3334_v32  ;;  %v3346_v62 = vsub.f32 %v7026_v34, %v7107_v16  ;;  %v3347_v24 = vsub.f32 %v7046_v59, %v7107_v16  ;;  %v3350_v40 = vsub.f32 %v7049_v6, %v7107_v16 }
 0x969   :  { %v3351_v42 = vsub.f32 %v7077_v57, %v7107_v16  ;;  %v3353_v8 = vsub.f32 %v7072_v14, %v7107_v16  ;;  %v3354_v30 = vsub.f32 %v7081_v10, %v7107_v16 }
 0x96a   :  { %v3336_v39 = vmax.f32 %v3335_v28, 0.0 }
 0x96c   :  { %v3337_v4 = vadd.f32 1e-05, %v3336_v39 }
 0x96e   :  { %5883 = vrsqrt.f32 %v3337_v4 }
 0x978   :  { %v5884_v60 = vpop.eup %5883 }
 0x979   :  { %v3355_v36 = vmul.f32 %v5884_v60, %v4853_v5 }
 0x97b   :  { %v7147_v1 = vrot.slane %v3355_v36, %v6426_v49 }
 0x97d   :  { %v3361_v37 = vmul.f32 %v7147_v1, %v3340_v27  ;;  %v3362_v55 = vmul.f32 %v7147_v1, %v3341_v33  ;;  %v3369_v50 = vmul.f32 %v7147_v1, %v3348_v31  ;;  %v3370_v3 = vmul.f32 %v7147_v1, %v3349_v19 }
 0x97e   :  { %v3373_v22 = vmul.f32 %v7147_v1, %v3352_v53  ;;  %v3360_v61 = vmul.f32 %v7147_v1, %v3339_v63  ;;  %v3363_v25 = vmul.f32 %v7147_v1, %v3342_v43  ;;  %v3364_v17 = vmul.f32 %v7147_v1, %v3343_v47 }
 0x97f   :  { %v3383_v32 = vadd.f32 %v7152_v7, %v3361_v37  ;;  %v3384_v35 = vadd.f32 %v7152_v7, %v3362_v55  ;;  %v3391_v27 = vadd.f32 %v7152_v7, %v3369_v50  ;;  %v3392_v33 = vadd.f32 %v7152_v7, %v3370_v3 }
 0x980   :  { %v3395_v31 = vadd.f32 %v7152_v7, %v3373_v22  ;;  %v3382_v19 = vadd.f32 %v7152_v7, %v3360_v61  ;;  %v3385_v53 = vadd.f32 %v7152_v7, %v3363_v25  ;;  %v3365_v63 = vmul.f32 %v7147_v1, %v3344_v48 }
 0x981   :  { %vm3399_vm7 = vcmp.ge.f32.partialorder %v3383_v32, 0.0  ;;  %vm3400_vm8 = vcmp.ge.f32.partialorder %v3384_v35, 0.0  ;;  %vm3407_vm9 = vcmp.ge.f32.partialorder %v3391_v27, 0.0  ;;  %vm3408_vm10 = vcmp.ge.f32.partialorder %v3392_v33, 0.0 }
 0x982   :  { %vm3411_vm11 = vcmp.ge.f32.partialorder %v3395_v31, 0.0  ;;  %v3415_v43 = vmul.f32 0.3, %v3383_v32  ;;  %v3416_v47 = vmul.f32 0.3, %v3384_v35  ;;  %vm3398_vm12 = vcmp.ge.f32.partialorder %v3382_v19, 0.0 }
 0x983   :  { %v3423_v28 = vmul.f32 0.3, %v3391_v27  ;;  %v3424_v39 = vmul.f32 0.3, %v3392_v33  ;;  %v3427_v4 = vmul.f32 0.3, %v3395_v31  ;;  %v3386_v5 = vadd.f32 %v7152_v7, %v3364_v17 }
 0x984   :  { %v3431_v60 = vsel %vm3399_vm7, %v3383_v32, %v3415_v43  ;;  %v3432_v36 = vsel %vm3400_vm8, %v3384_v35, %v3416_v47  ;;  %v3414_v13 = vmul.f32 0.3, %v3382_v19  ;;  %vm3401_vm13 = vcmp.ge.f32.partialorder %v3385_v53, 0.0 }
 0x985   :  { %v3439_v56 = vsel %vm3407_vm9, %v3391_v27, %v3423_v28  ;;  %v3440_v37 = vsel %vm3408_vm10, %v3392_v33, %v3424_v39  ;;  %v3443_v48 = vsel %vm3411_vm11, %v3395_v31, %v3427_v4  ;;  %3490 = vst.msk [vmem:[#allocation2 + $0x9] sm:$0xff] %vm95_vm0, %v3431_v60  ;;  %3491 = vst.msk [vmem:[#allocation2 + $0x11] sm:$0xff] %vm95_vm0, %v3432_v36  ;;  %v3417_v55 = vmul.f32 0.3, %v3385_v53  ;;  %v3451_v60 = vld [vmem:[#allocation5 + $0x1a0] sm:$0xff]  ;;  %v3452_v36 = vld [vmem:[#allocation5 + $0x1a8] sm:$0xff] }
 0x986   :  { %3502 = vst.msk [vmem:[#allocation2 + $0x71] sm:$0xff] %vm95_vm0, %v3443_v48  ;;  %3498 = vst.msk [vmem:[#allocation2 + $0x51] sm:$0xff] %vm95_vm0, %v3439_v56  ;;  %v3430_v50 = vsel %vm3398_vm12, %v3382_v19, %v3414_v13  ;;  %v3387_v3 = vadd.f32 %v7152_v7, %v3365_v63  ;;  %vm3402_vm14 = vcmp.ge.f32.partialorder %v3386_v5, 0.0  ;;  %v3418_v22 = vmul.f32 0.3, %v3386_v5 }
 0x987   :  { %3499 = vst.msk [vmem:[#allocation2 + $0x59] sm:$0xff] %vm95_vm0, %v3440_v37  ;;  %3489 = vst.msk [vmem:[#allocation2 + $0x1] sm:$0xff] %vm95_vm0, %v3430_v50  ;;  %v3433_v61 = vsel %vm3401_vm13, %v3385_v53, %v3417_v55  ;;  %v3366_v25 = vmul.f32 %v7147_v1, %v3345_v26  ;;  %v3367_v17 = vmul.f32 %v7147_v1, %v3346_v62 }
 0x988   :  { %v3368_v32 = vmul.f32 %v7147_v1, %v3347_v24  ;;  %3492 = vst.msk [vmem:[#allocation2 + $0x19] sm:$0xff] %vm95_vm0, %v3433_v61  ;;  %vm3403_vm15 = vcmp.ge.f32.partialorder %v3387_v3, 0.0  ;;  %v3419_v35 = vmul.f32 0.3, %v3387_v3  ;;  %v3434_v27 = vsel %vm3402_vm14, %v3386_v5, %v3418_v22 }
 0x989   :  { %v3371_v52 = vmul.f32 %v7147_v1, %v3350_v40  ;;  %3493 = vst.msk [vmem:[#allocation2 + $0x21] sm:$0xff] %vm95_vm0, %v3434_v27  ;;  %v3388_v34 = vadd.f32 %v7152_v7, %v3366_v25  ;;  %v3389_v26 = vadd.f32 %v7152_v7, %v3367_v17  ;;  %v3372_v62 = vmul.f32 %v7147_v1, %v3351_v42 }
 0x98a   :  { %v3390_v59 = vadd.f32 %v7152_v7, %v3368_v32  ;;  %v3435_v24 = vsel %vm3403_vm15, %v3387_v3, %v3419_v35  ;;  %v3374_v6 = vmul.f32 %v7147_v1, %v3353_v8  ;;  %v3375_v40 = vmul.f32 %v7147_v1, %v3354_v30 }
 0x98b   :  { %v3393_v33 = vadd.f32 %v7152_v7, %v3371_v52  ;;  %3494 = vst.msk [vmem:[#allocation2 + $0x29] sm:$0xff] %vm95_vm0, %v3435_v24  ;;  %vm3404_vm2 = vcmp.ge.f32.partialorder %v3388_v34, 0.0  ;;  %vm3405_vm3 = vcmp.ge.f32.partialorder %v3389_v26, 0.0  ;;  %v3420_v57 = vmul.f32 0.3, %v3388_v34 }
 0x98c   :  { %v3421_v31 = vmul.f32 0.3, %v3389_v26  ;;  %v3534_v42 = vld [vmem:[#allocation2 + $0x9] sm:$0xff]  ;;  %vm3406_vm4 = vcmp.ge.f32.partialorder %v3390_v59, 0.0  ;;  %v3422_v19 = vmul.f32 0.3, %v3390_v59  ;;  %v3394_v53 = vadd.f32 %v7152_v7, %v3372_v62 }
 0x98d   :  { %vm3409_vm5 = vcmp.ge.f32.partialorder %v3393_v33, 0.0  ;;  %v3535_v14 = vld [vmem:[#allocation2 + $0x11] sm:$0xff]  ;;  %v3436_v63 = vsel %vm3404_vm2, %v3388_v34, %v3420_v57  ;;  %v3425_v43 = vmul.f32 0.3, %v3393_v33  ;;  %v3396_v10 = vadd.f32 %v7152_v7, %v3374_v6  ;;  %v3453_v62 = vld [vmem:[#allocation5 + $0x1b0] sm:$0xff] }
 0x98e   :  { %v3437_v8 = vsel %vm3405_vm3, %v3389_v26, %v3421_v31  ;;  %v3533_v16 = vld [vmem:[#allocation2 + $0x1] sm:$0xff]  ;;  %3495 = vst.msk [vmem:[#allocation2 + $0x31] sm:$0xff] %vm95_vm0, %v3436_v63  ;;  %v3438_v30 = vsel %vm3406_vm4, %v3390_v59, %v3422_v19  ;;  %vm3410_vm6 = vcmp.ge.f32.partialorder %v3394_v53, 0.0  ;;  %v3426_v1 = vmul.f32 0.3, %v3394_v53  ;;  %v7228_v50 = vld [vmem:[#allocation2 + $0x10] sm:$0xff] }
 0x98f   :  { %3496 = vst.msk [vmem:[#allocation2 + $0x39] sm:$0xff] %vm95_vm0, %v3437_v8  ;;  %v3397_v47 = vadd.f32 %v7152_v7, %v3375_v40  ;;  %v3549_v28 = vpack.c.bf16 %v3534_v42, %v3533_v16  ;;  %v3536_v39 = vld [vmem:[#allocation2 + $0x19] sm:$0xff]  ;;  %3497 = vst.msk [vmem:[#allocation2 + $0x49] sm:$0xff] %vm95_vm0, %v3438_v30  ;;  %v3441_v4 = vsel %vm3409_vm5, %v3393_v33, %v3425_v43  ;;  %vm3412_vm7 = vcmp.ge.f32.partialorder %v3396_v10, 0.0  ;;  %v7226_v7 = vld [vmem:[#allocation2 + $0x8] sm:$0xff] }
 0x990   :  { %v3428_v5 = vmul.f32 0.3, %v3396_v10  ;;  %v7223_v13 = vld [vmem:[#allocation2] sm:$0xff]  ;;  %v3550_v56 = vpack.c.bf16 %v3536_v39, %v3535_v14  ;;  %3500 = vst.msk [vmem:[#allocation2 + $0x61] sm:$0xff] %vm95_vm0, %v3441_v4  ;;  %v3442_v48 = vsel %vm3410_vm6, %v3394_v53, %v3426_v1  ;;  %v7234_v61 = vld [vmem:[#allocation2 + $0xa] sm:$0xff]  ;;  %v7236_v25 = vld [vmem:[#allocation2 + $0x12] sm:$0xff]  ;;  %v3531_v59 = vpack.c.bf16 %v3452_v36, %v3451_v60 }
 0x991   :  { %v3537_v37 = vld [vmem:[#allocation2 + $0x21] sm:$0xff]  ;;  %vm3413_vm8 = vcmp.ge.f32.partialorder %v3397_v47, 0.0  ;;  %v3429_v55 = vmul.f32 0.3, %v3397_v47  ;;  %5525 = vmatprep.mubr.msk.bf16.mxu1 %vm95_vm0, %v3549_v28  ;;  %3501 = vst.msk [vmem:[#allocation2 + $0x69] sm:$0xff] %vm95_vm0, %v3442_v48  ;;  %v7240_v35 = vld [vmem:[#allocation2 + $0x18] sm:$0xff] }
 0x992   :  { %v3444_v3 = vsel %vm3412_vm7, %v3396_v10, %v3428_v5  ;;  %v7232_v22 = vld [vmem:[#allocation2 + $0x2] sm:$0xff]  ;;  %5526 = vmatmul.mubr.msk.bf16.vlgmr.msra.gmra.mrb[44].mxu1 %vm95_vm0, %v3550_v56  ;;  %v7246_v27 = vld [vmem:[#allocation2 + $0x1a] sm:$0xff]  ;;  %4170 = vst.msk [vmem:[#allocation2 + $0x10] sm:$0xff] %vm95_vm0, %v5971_v0  ;;  %v3542_v40 = vld [vmem:[#allocation2 + $0x51] sm:$0xff] }
 0x993   :  { %v3538_v17 = vld [vmem:[#allocation2 + $0x29] sm:$0xff]  ;;  %v3445_v32 = vsel %vm3413_vm8, %v3397_v47, %v3429_v55  ;;  %3503 = vst.msk [vmem:[#allocation2 + $0x79] sm:$0xff] %vm95_vm0, %v3444_v3  ;;  %4168 = vst.msk [vmem:[#allocation2] sm:$0xff] %vm95_vm0, %v5971_v0  ;;  %5542 = vmatpush3.bf16.msra.mxu1 %v6977_v46  ;;  %v7252_v34 = vld [vmem:[#allocation2 + $0x20] sm:$0xff] }
 0x994   :  { %4169 = vst.msk [vmem:[#allocation2 + $0x8] sm:$0xff] %vm95_vm0, %v5971_v0  ;;  %v3551_v52 = vpack.c.bf16 %v3538_v17, %v3537_v37  ;;  %3504 = vst.msk [vmem:[#allocation2 + $0x81] sm:$0xff] %vm95_vm0, %v3445_v32  ;;  %v7256_v26 = vld [vmem:[#allocation2 + $0x22] sm:$0xff]  ;;  %5543 = vmatprep.subr.bf16.mxu1 %v7154_v51  ;;  %v3463_v57 = vld [vmem:[#allocation5 + $0x200] sm:$0xff] }
 0x995   :  { %4171 = vst.msk [vmem:[#allocation2 + $0x18] sm:$0xff] %vm95_vm0, %v5971_v0  ;;  %4172 = vst.msk [vmem:[#allocation2 + $0x20] sm:$0xff] %vm95_vm0, %v5971_v0  ;;  %v3539_v24 = vld [vmem:[#allocation2 + $0x31] sm:$0xff]  ;;  %v3454_v33 = vld [vmem:[#allocation5 + $0x1b8] sm:$0xff] }
 0x996   :  { %5529 = vmatprep.mubr.msk.bf16.mxu1 %vm95_vm0, %v3551_v52  ;;  %v3540_v46 = vld [vmem:[#allocation2 + $0x39] sm:$0xff]  ;;  %v3541_v6 = vld [vmem:[#allocation2 + $0x49] sm:$0xff]  ;;  %v3532_v42 = vpack.c.bf16 %v3454_v33, %v3453_v62  ;;  %v3546_v39 = vld [vmem:[#allocation2 + $0x71] sm:$0xff] }
 0x997   :  { %5544 = vmatpush3.bf16.msra.mxu1 %v7154_v51  ;;  %v3552_v31 = vpack.c.bf16 %v3540_v46, %v3539_v24  ;;  %v7263_v19 = vld [vmem:[#allocation2 + $0x28] sm:$0xff]  ;;  %v7265_v53 = vld [vmem:[#allocation2 + $0x30] sm:$0xff]  ;;  %v3464_v14 = vld [vmem:[#allocation5 + $0x208] sm:$0xff]  ;;  %v3553_v63 = vpack.c.bf16 %v3542_v40, %v3541_v6 }
 0x998   :  { %5545 = vmatprep.subr.bf16.mxu1 %v3531_v59  ;;  %v3543_v8 = vld [vmem:[#allocation2 + $0x59] sm:$0xff]  ;;  %v7269_v10 = vld [vmem:[#allocation2 + $0x48] sm:$0xff]  ;;  %v7271_v16 = vld [vmem:[#allocation2 + $0x50] sm:$0xff]  ;;  %v3827_v32 = vpack.c.bf16 %v3464_v14, %v3463_v57 }
 0x999   :  { %v7267_v43 = vld [vmem:[#allocation2 + $0x38] sm:$0xff]  ;;  %v7275_v51 = vld [vmem:[#allocation2 + $0x2a] sm:$0xff]  ;;  %v3544_v47 = vld [vmem:[#allocation2 + $0x61] sm:$0xff] }
 0x99a   :  { %v7273_v30 = vld [vmem:[#allocation2 + $0x58] sm:$0xff]  ;;  %5530 = vmatmul.mubr.msk.bf16.gmra.mrb[48].mxu1 %vm95_vm0, %v3552_v31  ;;  %v3545_v28 = vld [vmem:[#allocation2 + $0x69] sm:$0xff]  ;;  %v7280_v4 = vld [vmem:[#allocation2 + $0x60] sm:$0xff]  ;;  %4173 = vst.msk [vmem:[#allocation2 + $0x28] sm:$0xff] %vm95_vm0, %v5971_v0  ;;  %v3554_v6 = vpack.c.bf16 %v3544_v47, %v3543_v8  ;;  %v3521_v31 = vpack.c.bf16 %v7226_v7, %v7223_v13  ;;  %v3523_v8 = vpack.c.bf16 %v7263_v19, %v7252_v34 }
 0x99b   :  { %v7277_v1 = vld [vmem:[#allocation2 + $0x52] sm:$0xff]  ;;  %v7282_v5 = vld [vmem:[#allocation2 + $0x68] sm:$0xff]  ;;  %5533 = vmatprep.mubr.msk.bf16.mxu1 %vm95_vm0, %v3553_v63  ;;  %5546 = vmatpush3.bf16.msra.mxu1 %v3531_v59  ;;  %v7293_v55 = vld [vmem:[#allocation2 + $0x3a] sm:$0xff]  ;;  %v3555_v40 = vpack.c.bf16 %v3546_v39, %v3545_v28  ;;  %v3526_v34 = vpack.c.bf16 %v7280_v4, %v7273_v30 }
 0x99c   :  { %v7284_v60 = vld [vmem:[#allocation2 + $0x70] sm:$0xff]  ;;  %v3547_v56 = vld [vmem:[#allocation2 + $0x79] sm:$0xff]  ;;  %v3548_v37 = vld [vmem:[#allocation2 + $0x81] sm:$0xff]  ;;  %5547 = vmatprep.subr.bf16.mxu1 %v3532_v42  ;;  %4176 = vst.msk [vmem:[#allocation2 + $0x40] sm:$0xff] %vm95_vm0, %v5971_v0 }
 0x99d   :  { %v7288_v36 = vld [vmem:[#allocation2 + $0x32] sm:$0xff]  ;;  %v7297_v3 = vld [vmem:[#allocation2 + $0x4a] sm:$0xff]  ;;  %v7299_v17 = vld [vmem:[#allocation2 + $0x5a] sm:$0xff]  ;;  %v3556_v57 = vpack.c.bf16 %v3548_v37, %v3547_v56  ;;  %v3524_v56 = vpack.c.bf16 %v7267_v43, %v7265_v53  ;;  %v3527_v19 = vpack.c.bf16 %v7284_v60, %v7282_v5  ;;  %v3819_v43 = vpack.c.bf16 %v7234_v61, %v7232_v22 }
 0x99e   :  { %v7291_v48 = vld [vmem:[#allocation2 + $0x78] sm:$0xff]  ;;  %4174 = vst.msk [vmem:[#allocation2 + $0x30] sm:$0xff] %vm95_vm0, %v5971_v0  ;;  %4175 = vst.msk [vmem:[#allocation2 + $0x38] sm:$0xff] %vm95_vm0, %v5971_v0  ;;  %v7309_v52 = vld [vmem:[#allocation2 + $0x62] sm:$0xff]  ;;  %v3822_v30 = vpack.c.bf16 %v7293_v55, %v7288_v36  ;;  %v3823_v22 = vpack.c.bf16 %v7277_v1, %v7297_v3 }
 0x99f   :  { %4177 = vst.msk [vmem:[#allocation2 + $0x48] sm:$0xff] %vm95_vm0, %v5971_v0  ;;  %4178 = vst.msk [vmem:[#allocation2 + $0x50] sm:$0xff] %vm95_vm0, %v5971_v0  ;;  %v7313_v59 = vld [vmem:[#allocation2 + $0x6a] sm:$0xff]  ;;  %v7315_v62 = vld [vmem:[#allocation2 + $0x72] sm:$0xff]  ;;  %5548 = vmatpush3.bf16.msra.mxu1 %v3532_v42  ;;  %v3824_v61 = vpack.c.bf16 %v7309_v52, %v7299_v17 }
 0x9a0   :  { %4179 = vst.msk [vmem:[#allocation2 + $0x58] sm:$0xff] %vm95_vm0, %v5971_v0  ;;  %v3520_v24 = vld [vmem:[#allocation2 + $0x80] sm:$0xff]  ;;  %4180 = vst.msk [vmem:[#allocation2 + $0x60] sm:$0xff] %vm95_vm0, %v5971_v0  ;;  %5565 = vmatprep.subr.bf16.mxu1 %v3827_v32  ;;  %v3466_v63 = vld [vmem:[#allocation5 + $0x218] sm:$0xff] }
 0x9a1   :  { %4181 = vst.msk [vmem:[#allocation2 + $0x68] sm:$0xff] %vm95_vm0, %v5971_v0  ;;  %4182 = vst.msk [vmem:[#allocation2 + $0x70] sm:$0xff] %vm95_vm0, %v5971_v0  ;;  %v3817_v46 = vld [vmem:[#allocation2 + $0x7a] sm:$0xff]  ;;  %v3818_v33 = vld [vmem:[#allocation2 + $0x82] sm:$0xff]  ;;  %v3528_v53 = vpack.c.bf16 %v3520_v24, %v7291_v48 }
 0x9a2   :  { %4183 = vst.msk [vmem:[#allocation2 + $0x78] sm:$0xff] %vm95_vm0, %v5971_v0  ;;  %4184 = vst.msk [vmem:[#allocation2 + $0x80] sm:$0xff] %vm95_vm0, %v5971_v0  ;;  %5534 = vmatmul.mubr.msk.bf16.gmra.mrb[52].mxu1 %vm95_vm0, %v3554_v6  ;;  %v3465_v14 = vld [vmem:[#allocation5 + $0x210] sm:$0xff]  ;;  %v3467_v47 = vld [vmem:[#allocation5 + $0x220] sm:$0xff] }
 0x9a3   :  { %4185 = vst.msk [vmem:[#allocation2 + $0x88] sm:$0xff] %vm95_vm0, %v5971_v0  ;;  %5537 = vmatprep.mubr.msk.bf16.mxu1 %vm95_vm0, %v3555_v40  ;;  %v3522_v0 = vpack.c.bf16 %v7240_v35, %v7228_v50  ;;  %v3828_v42 = vpack.c.bf16 %v3466_v63, %v3465_v14  ;;  %v3468_v28 = vld [vmem:[#allocation5 + $0x228] sm:$0xff]  ;;  %v3469_v7 = vld [vmem:[#allocation5 + $0x230] sm:$0xff]  ;;  %v3470_v39 = vld [vmem:[#allocation5 + $0x238] sm:$0xff]  ;;  %v3525_v35 = vpack.c.bf16 %v7271_v16, %v7269_v10 }
 0x9a4   :  { %v3829_v13 = vpack.c.bf16 %v3468_v28, %v3467_v47  ;;  %v3830_v50 = vpack.c.bf16 %v3470_v39, %v3469_v7  ;;  %v3820_v10 = vpack.c.bf16 %v7246_v27, %v7236_v25  ;;  %v3821_v16 = vpack.c.bf16 %v7275_v51, %v7256_v26  ;;  %v4152_v26 = vld [vmem:[%s7760_s11 + $0x40] sm:$0xff]  ;;  %v4153_v51 = vld [vmem:[%s7760_s11 + $0x48] sm:$0xff]  ;;  %v4154_v1 = vld [vmem:[%s7760_s11 + $0x50] sm:$0xff] }
 0x9a5   :  { %v3825_v25 = vpack.c.bf16 %v7315_v62, %v7313_v59  ;;  %v3826_v27 = vpack.c.bf16 %v3818_v33, %v3817_v46  ;;  %v4254_v4 = vpack.c.bf16 %v4153_v51, %v4152_v26  ;;  %v4155_v5 = vld [vmem:[%s7760_s11 + $0x58] sm:$0xff]  ;;  %v4156_v36 = vld [vmem:[%s7760_s11 + $0x60] sm:$0xff]  ;;  %v4157_v37 = vld [vmem:[%s7760_s11 + $0x68] sm:$0xff] }
 0x9a6   :  { %v4255_v60 = vpack.c.bf16 %v4155_v5, %v4154_v1  ;;  %v4256_v48 = vpack.c.bf16 %v4157_v37, %v4156_v36  ;;  %v4158_v55 = vld [vmem:[%s7760_s11 + $0x70] sm:$0xff]  ;;  %v4159_v3 = vld [vmem:[%s7760_s11 + $0x78] sm:$0xff]  ;;  %v4145_v52 = vld [vmem:[%s7760_s11 + $0x8] sm:$0xff] }
 0x9a7   :  { %5589 = vmatprep.subr.bf16.mxu0 %v4254_v4  ;;  %v4257_v17 = vpack.c.bf16 %v4159_v3, %v4158_v55 }
 0x9a8   :  { %5590 = vmatpush3.bf16.msra.mxu0 %v4254_v4 }
 0x9a9   :  { %5591 = vmatprep.subr.bf16.mxu0 %v4255_v60 }
 0x9aa   :  { %5538 = vmatmul.mubr.msk.bf16.gmra.mrb[56].mxu1 %vm95_vm0, %v3556_v57 }
 0x9ab   :  { %5549 = vmatprep.mubr.msk.bf16.mxu1 %vm95_vm0, %v3521_v31 }
 0x9ac   :  { %5592 = vmatpush3.bf16.msra.mxu0 %v4255_v60 }
 0x9ad   :  { %5593 = vmatprep.subr.bf16.mxu0 %v4256_v48 }
 0x9b0   :  { %5594 = vmatpush3.bf16.msra.mxu0 %v4256_v48 }
 0x9b1   :  { %5595 = vmatprep.subr.bf16.mxu0 %v4257_v17 }
 0x9b2   :  { %5550 = vmatmul.mubr.msk.bf16.vlgmr.msra.gmra.mrb[44].mxu1 %vm95_vm0, %v3522_v0 }
 0x9b3   :  { %5553 = vmatprep.mubr.msk.bf16.mxu1 %vm95_vm0, %v3523_v8  ;;  %5566 = vmatpush3.bf16.msra.mxu1 %v3827_v32  ;;  %v4144_v32 = vld [vmem:[%s7760_s11] sm:$0xff] }
 0x9b4   :  { %5567 = vmatprep.subr.bf16.mxu1 %v3828_v42  ;;  %5596 = vmatpush3.bf16.msra.mxu0 %v4257_v17  ;;  %v7407_v59 = vpack.c.bf16 %v4145_v52, %v4144_v32 }
 0x9b6   :  { %5613 = vmatprep.subr.bf16.mxu0 %v7407_v59 }
 0x9b7   :  { %5568 = vmatpush3.bf16.msra.mxu1 %v3828_v42 }
 0x9b8   :  { %5569 = vmatprep.subr.bf16.mxu1 %v3829_v13 }
 0x9ba   :  { %5554 = vmatmul.mubr.msk.bf16.gmra.mrb[48].mxu1 %vm95_vm0, %v3524_v56 }
 0x9bb   :  { %5557 = vmatprep.mubr.msk.bf16.mxu1 %vm95_vm0, %v3525_v35  ;;  %5570 = vmatpush3.bf16.msra.mxu1 %v3829_v13 }
 0x9bc   :  { %5571 = vmatprep.subr.bf16.mxu1 %v3830_v50 }
 0x9bf   :  { %5572 = vmatpush3.bf16.msra.mxu1 %v3830_v50 }
 0x9c2   :  { %5558 = vmatmul.mubr.msk.bf16.gmra.mrb[52].mxu1 %vm95_vm0, %v3526_v34 }
 0x9c3   :  { %5561 = vmatprep.mubr.msk.bf16.mxu1 %vm95_vm0, %v3527_v19 }
 0x9ca   :  { %5562 = vmatmul.mubr.msk.bf16.gmra.mrb[56].mxu1 %vm95_vm0, %v3528_v53 }
 0x9cb   :  { %5573 = vmatprep.mubr.msk.bf16.mxu1 %vm95_vm0, %v3819_v43 }
 0x9d2   :  { %5574 = vmatmul.mubr.msk.bf16.vlgmr.msra.gmra.mrb[44].mxu1 %vm95_vm0, %v3820_v10 }
 0x9d3   :  { %5577 = vmatprep.mubr.msk.bf16.mxu1 %vm95_vm0, %v3821_v16 }
 0x9da   :  { %5578 = vmatmul.mubr.msk.bf16.gmra.mrb[48].mxu1 %vm95_vm0, %v3822_v30 }
 0x9db   :  { %5581 = vmatprep.mubr.msk.bf16.mxu1 %vm95_vm0, %v3823_v22 }
 0x9e2   :  { %5582 = vmatmul.mubr.msk.bf16.gmra.mrb[52].mxu1 %vm95_vm0, %v3824_v61 }
 0x9e3   :  { %5585 = vmatprep.mubr.msk.bf16.mxu1 %vm95_vm0, %v3825_v25 }
 0x9ea   :  { %5586 = vmatmul.mubr.msk.bf16.gmra.mrb[56].mxu1 %vm95_vm0, %v3826_v27 }
 0xaa5   :  { %v7410_v62 = vpop.f32.mrb[44].mxu1 }
 0xaa6   :  { %v7412_v24 = vpop.f32.mrb[45].mxu1  ;;  %v4011_v40 = vmul.f32 %v7410_v62, %v7410_v62  ;;  %v3975_v0 = vsel %vm95_vm0, %v7410_v62, 0.0 }
 0xaa7   :  { %v4009_v46 = vmul.f32 %v7412_v24, %v7412_v24  ;;  %v7416_v33 = vpop.f32.mrb[46].mxu1  ;;  %v3972_v57 = vsel %vm95_vm0, %v7412_v24, 0.0 }
 0xaa8   :  { %v7418_v6 = vpop.f32.mrb[47].mxu1  ;;  %v4012_v8 = vmul.f32 %v7416_v33, %v7416_v33  ;;  %v4028_v7 = vsel %vm95_vm0, %v4011_v40, 0.0  ;;  %v3977_v39 = vsel %vm95_vm0, %v7416_v33, 0.0 }
 0xaa9   :  { %v3973_v31 = vsel %vm95_vm0, %v7418_v6, 0.0  ;;  %v4010_v14 = vmul.f32 %v7418_v6, %v7418_v6  ;;  %v4025_v42 = vsel %vm95_vm0, %v4009_v46, 0.0 }
 0xaaa   :  { %v3974_v63 = vadd.f32 %v3973_v31, %v3972_v57  ;;  %v4030_v19 = vsel %vm95_vm0, %v4012_v8, 0.0 }
 0xaab   :  { %v4026_v47 = vsel %vm95_vm0, %v4010_v14, 0.0 }
 0xaac   :  { %v3976_v28 = vadd.f32 %v3975_v0, %v3974_v63  ;;  %v4027_v13 = vadd.f32 %v4026_v47, %v4025_v42 }
 0xaad   :  { %v7437_v56 = vpop.f32.mrb[48].mxu1 }
 0xaae   :  { %v4029_v50 = vadd.f32 %v4028_v7, %v4027_v13  ;;  %v7439_v35 = vpop.f32.mrb[49].mxu1  ;;  %v3978_v34 = vadd.f32 %v3977_v39, %v3976_v28  ;;  %v4015_v61 = vmul.f32 %v7437_v56, %v7437_v56  ;;  %v3983_v4 = vsel %vm95_vm0, %v7437_v56, 0.0 }
 0xaaf   :  { %v3979_v53 = vsel %vm95_vm0, %v7439_v35, 0.0  ;;  %v4013_v43 = vmul.f32 %v7439_v35, %v7439_v35  ;;  %v7446_v10 = vpop.f32.mrb[50].mxu1 }
 0xab0   :  { %v3980_v16 = vadd.f32 %v3979_v53, %v3978_v34  ;;  %v4031_v30 = vadd.f32 %v4030_v19, %v4029_v50  ;;  %v7448_v22 = vpop.f32.mrb[51].mxu1  ;;  %v4016_v5 = vmul.f32 %v7446_v10, %v7446_v10  ;;  %v4036_v48 = vsel %vm95_vm0, %v4015_v61, 0.0 }
 0xab1   :  { %v4032_v25 = vsel %vm95_vm0, %v4013_v43, 0.0  ;;  %v3981_v27 = vsel %vm95_vm0, %v7448_v22, 0.0  ;;  %v4014_v26 = vmul.f32 %v7448_v22, %v7448_v22  ;;  %v3985_v55 = vsel %vm95_vm0, %v7446_v10, 0.0 }
 0xab2   :  { %v4033_v51 = vadd.f32 %v4032_v25, %v4031_v30  ;;  %v3982_v1 = vadd.f32 %v3981_v27, %v3980_v16  ;;  %v4038_v46 = vsel %vm95_vm0, %v4016_v5, 0.0 }
 0xab3   :  { %v4034_v60 = vsel %vm95_vm0, %v4014_v26, 0.0 }
 0xab4   :  { %v3984_v36 = vadd.f32 %v3983_v4, %v3982_v1  ;;  %v4035_v37 = vadd.f32 %v4034_v60, %v4033_v51 }
 0xab5   :  { %v7465_v3 = vpop.f32.mrb[52].mxu1 }
 0xab6   :  { %v4037_v17 = vadd.f32 %v4036_v48, %v4035_v37  ;;  %v7467_v32 = vpop.f32.mrb[53].mxu1  ;;  %v3986_v52 = vadd.f32 %v3985_v55, %v3984_v36  ;;  %v4019_v42 = vmul.f32 %v7465_v3, %v7465_v3  ;;  %v3991_v39 = vsel %vm95_vm0, %v7465_v3, 0.0 }
 0xab7   :  { %v3987_v40 = vsel %vm95_vm0, %v7467_v32, 0.0  ;;  %v4017_v57 = vmul.f32 %v7467_v32, %v7467_v32  ;;  %v7474_v31 = vpop.f32.mrb[54].mxu1 }
 0xab8   :  { %v3988_v14 = vadd.f32 %v3987_v40, %v3986_v52  ;;  %v4039_v63 = vadd.f32 %v4038_v46, %v4037_v17  ;;  %v7476_v0 = vpop.f32.mrb[55].mxu1  ;;  %v4020_v50 = vmul.f32 %v7474_v31, %v7474_v31  ;;  %v4044_v43 = vsel %vm95_vm0, %v4019_v42, 0.0 }
 0xab9   :  { %v4040_v8 = vsel %vm95_vm0, %v4017_v57, 0.0  ;;  %v3989_v47 = vsel %vm95_vm0, %v7476_v0, 0.0  ;;  %v4018_v28 = vmul.f32 %v7476_v0, %v7476_v0  ;;  %v3993_v16 = vsel %vm95_vm0, %v7474_v31, 0.0 }
 0xaba   :  { %v4041_v13 = vadd.f32 %v4040_v8, %v4039_v63  ;;  %v3990_v7 = vadd.f32 %v3989_v47, %v3988_v14  ;;  %v4046_v26 = vsel %vm95_vm0, %v4020_v50, 0.0 }
 0xabb   :  { %v4042_v34 = vsel %vm95_vm0, %v4018_v28, 0.0 }
 0xabc   :  { %v3992_v19 = vadd.f32 %v3991_v39, %v3990_v7  ;;  %v4043_v53 = vadd.f32 %v4042_v34, %v4041_v13 }
 0xabd   :  { %v7493_v30 = vpop.f32.mrb[56].mxu1 }
 0xabe   :  { %v4045_v61 = vadd.f32 %v4044_v43, %v4043_v53  ;;  %v7495_v25 = vpop.f32.mrb[57].mxu1  ;;  %v3994_v27 = vadd.f32 %v3993_v16, %v3992_v19  ;;  %v4023_v37 = vmul.f32 %v7493_v30, %v7493_v30  ;;  %v3999_v40 = vsel %vm95_vm0, %v7493_v30, 0.0 }
 0xabf   :  { %v3995_v51 = vsel %vm95_vm0, %v7495_v25, 0.0  ;;  %v4021_v1 = vmul.f32 %v7495_v25, %v7495_v25  ;;  %v7502_v4 = vpop.f32.mrb[58].mxu1 }
 0xac0   :  { %v3996_v5 = vadd.f32 %v3995_v51, %v3994_v27  ;;  %v4047_v60 = vadd.f32 %v4046_v26, %v4045_v61  ;;  %v7504_v36 = vpop.f32.mrb[59].mxu1  ;;  %v4024_v57 = vmul.f32 %v7502_v4, %v7502_v4  ;;  %v4052_v8 = vsel %vm95_vm0, %v4023_v37, 0.0 }
 0xac1   :  { %v4048_v48 = vsel %vm95_vm0, %v4021_v1, 0.0  ;;  %v3997_v55 = vsel %vm95_vm0, %v7504_v36, 0.0  ;;  %v4022_v17 = vmul.f32 %v7504_v36, %v7504_v36  ;;  %v4001_v47 = vsel %vm95_vm0, %v7502_v4, 0.0 }
 0xac2   :  { %v4049_v52 = vadd.f32 %v4048_v48, %v4047_v60  ;;  %v3998_v46 = vadd.f32 %v3997_v55, %v3996_v5  ;;  %v4054_v7 = vsel %vm95_vm0, %v4024_v57, 0.0 }
 0xac3   :  { %v4050_v14 = vsel %vm95_vm0, %v4022_v17, 0.0 }
 0xac4   :  { %v4000_v63 = vadd.f32 %v3999_v40, %v3998_v46  ;;  %v4051_v42 = vadd.f32 %v4050_v14, %v4049_v52 }
 0xac6   :  { %v4002_v28 = vadd.f32 %v4001_v47, %v4000_v63  ;;  %v4053_v13 = vadd.f32 %v4052_v8, %v4051_v42 }
 0xac8   :  { %v4003_v39 = vrot.slane %v4002_v28, 4  ;;  %v4055_v50 = vadd.f32 %v4054_v7, %v4053_v13 }
 0xaca   :  { %v4004_v34 = vadd.f32 %v4003_v39, %v4002_v28  ;;  %v4056_v19 = vrot.slane %v4055_v50, 4 }
 0xacc   :  { %v4005_v53 = vrot.slane %v4004_v34, 2  ;;  %v4057_v43 = vadd.f32 %v4056_v19, %v4055_v50 }
 0xace   :  { %v4006_v16 = vadd.f32 %v4005_v53, %v4004_v34  ;;  %v4058_v61 = vrot.slane %v4057_v43, 2 }
 0xad0   :  { %v4007_v27 = vrot.slane %v4006_v16, 1  ;;  %v4059_v26 = vadd.f32 %v4058_v61, %v4057_v43 }
 0xad2   :  { %v4008_v51 = vadd.f32 %v4007_v27, %v4006_v16  ;;  %v4060_v1 = vrot.slane %v4059_v26, 1 }
 0xad4   :  { %v4061_v5 = vadd.f32 %v4060_v1, %v4059_v26  ;;  %v7522_v60 = vmul.f32 0.0078125, %v4008_v51 }
 0xad6   :  { %v4063_v37 = vmul.f32 0.0078125, %v4061_v5  ;;  %v4064_v48 = vmul.f32 %v7522_v60, %v7522_v60  ;;  %v4069_v55 = vsub.f32 %v7412_v24, %v7522_v60  ;;  %v4070_v17 = vsub.f32 %v7418_v6, %v7522_v60 }
 0xad7   :  { %v4071_v52 = vsub.f32 %v7410_v62, %v7522_v60  ;;  %v4072_v46 = vsub.f32 %v7416_v33, %v7522_v60  ;;  %v4077_v40 = vsub.f32 %v7467_v32, %v7522_v60  ;;  %v4078_v57 = vsub.f32 %v7476_v0, %v7522_v60 }
 0xad8   :  { %v4065_v14 = vsub.f32 %v4063_v37, %v4064_v48  ;;  %v4079_v63 = vsub.f32 %v7465_v3, %v7522_v60  ;;  %v4080_v24 = vsub.f32 %v7474_v31, %v7522_v60  ;;  %v4082_v6 = vsub.f32 %v7504_v36, %v7522_v60 }
 0xad9   :  { %v4073_v62 = vsub.f32 %v7439_v35, %v7522_v60  ;;  %v4074_v33 = vsub.f32 %v7448_v22, %v7522_v60  ;;  %v4075_v32 = vsub.f32 %v7437_v56, %v7522_v60  ;;  %v4076_v0 = vsub.f32 %v7446_v10, %v7522_v60  ;;  %v4880_v22 = vld [vmem:[%s7756_s7 + $0x2] sm:$0x1] }
 0xada   :  { %v4066_v42 = vmax.f32 %v4065_v14, 0.0  ;;  %v4081_v3 = vsub.f32 %v7495_v25, %v7522_v60  ;;  %v4083_v31 = vsub.f32 %v7493_v30, %v7522_v60  ;;  %v4084_v36 = vsub.f32 %v7502_v4, %v7522_v60  ;;  %v4882_v25 = vld [vmem:[%s7757_s8 + $0x2] ss:$0 sm:$0xff] }
 0xadc   :  { %v4067_v35 = vadd.f32 1e-05, %v4066_v42  ;;  %v4146_v42 = vld [vmem:[%s7760_s11 + $0x10] sm:$0xff] }
 0xade   :  { %5885 = vrsqrt.f32 %v4067_v35 }
 0xae8   :  { %v5886_v56 = vpop.eup %5885 }
 0xae9   :  { %v4085_v8 = vmul.f32 %v5886_v56, %v4880_v22  ;;  %v4149_v22 = vld [vmem:[%s7760_s11 + $0x28] sm:$0xff] }
 0xaeb   :  { %v4089_v10 = vrot.slane %v4085_v8, %v6426_v49 }
 0xaed   :  { %v4090_v47 = vmul.f32 %v4089_v10, %v4069_v55  ;;  %v4091_v28 = vmul.f32 %v4089_v10, %v4070_v17  ;;  %v4092_v30 = vmul.f32 %v4089_v10, %v4071_v52  ;;  %v4093_v13 = vmul.f32 %v4089_v10, %v4072_v46 }
 0xaee   :  { %v4098_v7 = vmul.f32 %v4089_v10, %v4077_v40  ;;  %v4099_v4 = vmul.f32 %v4089_v10, %v4078_v57  ;;  %v4100_v39 = vmul.f32 %v4089_v10, %v4079_v63  ;;  %v4101_v50 = vmul.f32 %v4089_v10, %v4080_v24 }
 0xaef   :  { %v4103_v34 = vmul.f32 %v4089_v10, %v4082_v6  ;;  %v4112_v19 = vadd.f32 %v4882_v25, %v4090_v47  ;;  %v4113_v53 = vadd.f32 %v4882_v25, %v4091_v28  ;;  %v4114_v43 = vadd.f32 %v4882_v25, %v4092_v30 }
 0xaf0   :  { %v4115_v16 = vadd.f32 %v4882_v25, %v4093_v13  ;;  %v4120_v61 = vadd.f32 %v4882_v25, %v4098_v7  ;;  %v4121_v27 = vadd.f32 %v4882_v25, %v4099_v4  ;;  %v4122_v49 = vadd.f32 %v4882_v25, %v4100_v39 }
 0xaf1   :  { %v4123_v26 = vadd.f32 %v4882_v25, %v4101_v50  ;;  %v4125_v51 = vadd.f32 %v4882_v25, %v4103_v34  ;;  %v4128_v1 = vadd.f32 %v4112_v19, %v6810_v11  ;;  %v4129_v5 = vadd.f32 %v6804_v54, %v4113_v53  ;;  %v4160_v34 = vld [vmem:[%s7760_s11 + $0x80] sm:$0xff]  ;;  %v4161_v19 = vld [vmem:[%s7760_s11 + $0x88] sm:$0xff] }
 0xaf2   :  { %v4130_v60 = vadd.f32 %v4114_v43, %v6826_v12  ;;  %v4131_v37 = vadd.f32 %v6820_v9, %v4115_v16  ;;  %v4136_v48 = vadd.f32 %v4120_v61, %v6814_v2  ;;  %v4137_v55 = vadd.f32 %v6806_v58, %v4121_v27 }
 0xaf3   :  { %v4138_v17 = vadd.f32 %v4122_v49, %v6830_v18  ;;  %v4139_v52 = vadd.f32 %v6822_v38, %v4123_v26  ;;  %v4141_v46 = vadd.f32 %v6838_v21, %v4125_v51  ;;  %4186 = vst.msk [vmem:[#allocation2 + $0x1] sm:$0xff] %vm95_vm0, %v4128_v1  ;;  %4187 = vst.msk [vmem:[#allocation2 + $0x9] sm:$0xff] %vm95_vm0, %v4129_v5 }
 0xaf4   :  { %v4094_v11 = vmul.f32 %v4089_v10, %v4073_v62  ;;  %4188 = vst.msk [vmem:[#allocation2 + $0x11] sm:$0xff] %vm95_vm0, %v4130_v60  ;;  %4189 = vst.msk [vmem:[#allocation2 + $0x19] sm:$0xff] %vm95_vm0, %v4131_v37  ;;  %v4095_v54 = vmul.f32 %v4089_v10, %v4074_v33  ;;  %v4096_v58 = vmul.f32 %v4089_v10, %v4075_v32 }
 0xaf5   :  { %4194 = vst.msk [vmem:[#allocation2 + $0x49] sm:$0xff] %vm95_vm0, %v4136_v48  ;;  %4195 = vst.msk [vmem:[#allocation2 + $0x51] sm:$0xff] %vm95_vm0, %v4137_v55  ;;  %v4097_v2 = vmul.f32 %v4089_v10, %v4076_v0  ;;  %v4102_v9 = vmul.f32 %v4089_v10, %v4081_v3  ;;  %v4104_v12 = vmul.f32 %v4089_v10, %v4083_v31  ;;  %v4162_v55 = vld [vmem:[%s7760_s11 + $0x90] sm:$0xff] }
 0xaf6   :  { %4196 = vst.msk [vmem:[#allocation2 + $0x59] sm:$0xff] %vm95_vm0, %v4138_v17  ;;  %4197 = vst.msk [vmem:[#allocation2 + $0x61] sm:$0xff] %vm95_vm0, %v4139_v52  ;;  %v4116_v38 = vadd.f32 %v4882_v25, %v4094_v11  ;;  %v4105_v18 = vmul.f32 %v4089_v10, %v4084_v36  ;;  %v4117_v21 = vadd.f32 %v4882_v25, %v4095_v54  ;;  %v4150_v10 = vld [vmem:[%s7760_s11 + $0x30] sm:$0xff] }
 0xaf7   :  { %4199 = vst.msk [vmem:[#allocation2 + $0x71] sm:$0xff] %vm95_vm0, %v4141_v46  ;;  %v4118_v40 = vadd.f32 %v4882_v25, %v4096_v58  ;;  %v4119_v57 = vadd.f32 %v4882_v25, %v4097_v2  ;;  %v4124_v14 = vadd.f32 %v4882_v25, %v4102_v9  ;;  %v4126_v24 = vadd.f32 %v4882_v25, %v4104_v12  ;;  %v4163_v46 = vld [vmem:[%s7760_s11 + $0x98] sm:$0xff]  ;;  %v4165_v12 = vld [vmem:[%s7760_s11 + $0xa8] sm:$0xff] }
 0xaf8   :  { %v4132_v63 = vadd.f32 %v4116_v38, %v6842_v23  ;;  %v4127_v6 = vadd.f32 %v4882_v25, %v4105_v18  ;;  %v4133_v62 = vadd.f32 %v6836_v20, %v4117_v21  ;;  %v4147_v23 = vld [vmem:[%s7760_s11 + $0x18] sm:$0xff]  ;;  %v4524_v53 = vpack.c.bf16 %v4161_v19, %v4160_v34  ;;  %v4164_v38 = vld [vmem:[%s7760_s11 + $0xa0] sm:$0xff]  ;;  %v4166_v21 = vld [vmem:[%s7760_s11 + $0xb0] sm:$0xff] }
 0xaf9   :  { %v4134_v33 = vadd.f32 %v4118_v40, %v6872_v45  ;;  %v4135_v32 = vadd.f32 %v6860_v41, %v4119_v57  ;;  %v4140_v0 = vadd.f32 %v4124_v14, %v6846_v29  ;;  %v4142_v3 = vadd.f32 %v4126_v24, %v6876_v15  ;;  %v4151_v25 = vld [vmem:[%s7760_s11 + $0x38] sm:$0xff] }
 0xafa   :  { %4190 = vst.msk [vmem:[#allocation2 + $0x21] sm:$0xff] %vm95_vm0, %v4132_v63  ;;  %v4143_v20 = vadd.f32 %v6864_v44, %v4127_v6  ;;  %v4230_v31 = vld [vmem:[#allocation2 + $0x1] sm:$0xff]  ;;  %v4231_v45 = vld [vmem:[#allocation2 + $0x9] sm:$0xff]  ;;  %4191 = vst.msk [vmem:[#allocation2 + $0x29] sm:$0xff] %vm95_vm0, %v4133_v62  ;;  %v4227_v35 = vpack.c.bf16 %v4147_v23, %v4146_v42  ;;  %v4229_v39 = vpack.c.bf16 %v4151_v25, %v4150_v10 }
 0xafb   :  { %4192 = vst.msk [vmem:[#allocation2 + $0x31] sm:$0xff] %vm95_vm0, %v4134_v33  ;;  %4193 = vst.msk [vmem:[#allocation2 + $0x39] sm:$0xff] %vm95_vm0, %v4135_v32  ;;  %v4246_v29 = vpack.c.bf16 %v4231_v45, %v4230_v31  ;;  %v4232_v41 = vld [vmem:[#allocation2 + $0x11] sm:$0xff]  ;;  %v4233_v36 = vld [vmem:[#allocation2 + $0x19] sm:$0xff]  ;;  %v4525_v2 = vpack.c.bf16 %v4163_v46, %v4162_v55  ;;  %v4526_v18 = vpack.c.bf16 %v4165_v12, %v4164_v38 }
 0xafc   :  { %4198 = vst.msk [vmem:[#allocation2 + $0x69] sm:$0xff] %vm95_vm0, %v4140_v0  ;;  %4200 = vst.msk [vmem:[#allocation2 + $0x79] sm:$0xff] %vm95_vm0, %v4142_v3  ;;  %v4247_v15 = vpack.c.bf16 %v4233_v36, %v4232_v41  ;;  %v4148_v44 = vld [vmem:[%s7760_s11 + $0x20] sm:$0xff]  ;;  %v4238_v7 = vld [vmem:[#allocation2 + $0x49] sm:$0xff] }
 0xafd   :  { %4201 = vst.msk [vmem:[#allocation2 + $0x81] sm:$0xff] %vm95_vm0, %v4143_v20  ;;  %5597 = vmatprep.mubr.msk.bf16.mxu0 %vm95_vm0, %v4246_v29  ;;  %v4228_v8 = vpack.c.bf16 %v4149_v22, %v4148_v44  ;;  %v4239_v4 = vld [vmem:[#allocation2 + $0x51] sm:$0xff]  ;;  %v4240_v43 = vld [vmem:[#allocation2 + $0x59] sm:$0xff]  ;;  %v4241_v16 = vld [vmem:[#allocation2 + $0x61] sm:$0xff] }
 0xafe   :  { %5598 = vmatmul.mubr.msk.bf16.vlgmr.msra.gmra.mrb[44].mxu0 %vm95_vm0, %v4247_v15  ;;  %v4250_v50 = vpack.c.bf16 %v4239_v4, %v4238_v7  ;;  %v4243_v27 = vld [vmem:[#allocation2 + $0x71] sm:$0xff]  ;;  %v4251_v49 = vpack.c.bf16 %v4241_v16, %v4240_v43  ;;  %v4202_v5 = vld [vmem:[#allocation2] sm:$0xff]  ;;  %v4203_v60 = vld [vmem:[#allocation2 + $0x8] sm:$0xff] }
 0xaff   :  { %5614 = vmatpush3.bf16.msra.mxu0 %v7407_v59  ;;  %v4218_v48 = vpack.c.bf16 %v4203_v60, %v4202_v5  ;;  %v4204_v17 = vld [vmem:[#allocation2 + $0x10] sm:$0xff]  ;;  %v4205_v52 = vld [vmem:[#allocation2 + $0x18] sm:$0xff]  ;;  %v4210_v63 = vld [vmem:[#allocation2 + $0x48] sm:$0xff] }
 0xb00   :  { %5615 = vmatprep.subr.bf16.mxu0 %v4227_v35  ;;  %v4219_v58 = vpack.c.bf16 %v4205_v52, %v4204_v17  ;;  %v4167_v14 = vld [vmem:[%s7760_s11 + $0xb8] sm:$0xff]  ;;  %v4211_v24 = vld [vmem:[#allocation2 + $0x50] sm:$0xff]  ;;  %v4213_v0 = vld [vmem:[#allocation2 + $0x60] sm:$0xff] }
 0xb01   :  { %v4234_v56 = vld [vmem:[#allocation2 + $0x21] sm:$0xff]  ;;  %v4235_v47 = vld [vmem:[#allocation2 + $0x29] sm:$0xff]  ;;  %v4527_v62 = vpack.c.bf16 %v4167_v14, %v4166_v21  ;;  %v4222_v33 = vpack.c.bf16 %v4211_v24, %v4210_v63  ;;  %v4212_v32 = vld [vmem:[#allocation2 + $0x58] sm:$0xff] }
 0xb02   :  { %v4236_v28 = vld [vmem:[#allocation2 + $0x31] sm:$0xff]  ;;  %v4237_v30 = vld [vmem:[#allocation2 + $0x39] sm:$0xff]  ;;  %v4248_v13 = vpack.c.bf16 %v4235_v47, %v4234_v56  ;;  %v4207_v54 = vld [vmem:[#allocation2 + $0x28] sm:$0xff]  ;;  %v4223_v3 = vpack.c.bf16 %v4213_v0, %v4212_v32 }
 0xb03   :  { %5616 = vmatpush3.bf16.msra.mxu0 %v4227_v35  ;;  %v4249_v59 = vpack.c.bf16 %v4237_v30, %v4236_v28  ;;  %v4242_v61 = vld [vmem:[#allocation2 + $0x69] sm:$0xff]  ;;  %v4244_v51 = vld [vmem:[#allocation2 + $0x79] sm:$0xff] }
 0xb04   :  { %5601 = vmatprep.mubr.msk.bf16.mxu0 %vm95_vm0, %v4248_v13  ;;  %5617 = vmatprep.subr.bf16.mxu0 %v4228_v8  ;;  %v4252_v26 = vpack.c.bf16 %v4243_v27, %v4242_v61  ;;  %v4245_v1 = vld [vmem:[#allocation2 + $0x81] sm:$0xff]  ;;  %v4208_v40 = vld [vmem:[#allocation2 + $0x30] sm:$0xff]  ;;  %v4209_v57 = vld [vmem:[#allocation2 + $0x38] sm:$0xff] }
 0xb05   :  { %v4253_v37 = vpack.c.bf16 %v4245_v1, %v4244_v51  ;;  %v4206_v11 = vld [vmem:[#allocation2 + $0x20] sm:$0xff]  ;;  %v4221_v6 = vpack.c.bf16 %v4209_v57, %v4208_v40  ;;  %v4214_v42 = vld [vmem:[#allocation2 + $0x68] sm:$0xff]  ;;  %v4215_v23 = vld [vmem:[#allocation2 + $0x70] sm:$0xff] }
 0xb06   :  { %5602 = vmatmul.mubr.msk.bf16.gmra.mrb[48].mxu0 %vm95_vm0, %v4249_v59  ;;  %v4220_v9 = vpack.c.bf16 %v4207_v54, %v4206_v11  ;;  %v4224_v20 = vpack.c.bf16 %v4215_v23, %v4214_v42  ;;  %v4216_v31 = vld [vmem:[#allocation2 + $0x78] sm:$0xff]  ;;  %v4217_v45 = vld [vmem:[#allocation2 + $0x80] sm:$0xff]  ;;  %v4501_v41 = vld [vmem:[#allocation2 + $0xa] sm:$0xff] }
 0xb07   :  { %5605 = vmatprep.mubr.msk.bf16.mxu0 %vm95_vm0, %v4250_v50  ;;  %5618 = vmatpush3.bf16.msra.mxu0 %v4228_v8  ;;  %v4500_v29 = vld [vmem:[#allocation2 + $0x2] sm:$0xff]  ;;  %v4225_v36 = vpack.c.bf16 %v4217_v45, %v4216_v31  ;;  %v4502_v35 = vld [vmem:[#allocation2 + $0x12] sm:$0xff]  ;;  %v4503_v44 = vld [vmem:[#allocation2 + $0x1a] sm:$0xff] }
 0xb08   :  { %5619 = vmatprep.subr.bf16.mxu0 %v4229_v39  ;;  %v4516_v15 = vpack.c.bf16 %v4501_v41, %v4500_v29  ;;  %v4504_v22 = vld [vmem:[#allocation2 + $0x22] sm:$0xff]  ;;  %v4505_v56 = vld [vmem:[#allocation2 + $0x2a] sm:$0xff]  ;;  %v4517_v8 = vpack.c.bf16 %v4503_v44, %v4502_v35  ;;  %v4506_v25 = vld [vmem:[#allocation2 + $0x32] sm:$0xff] }
 0xb09   :  { %v4518_v10 = vpack.c.bf16 %v4505_v56, %v4504_v22  ;;  %v4507_v47 = vld [vmem:[#allocation2 + $0x3a] sm:$0xff]  ;;  %v4508_v28 = vld [vmem:[#allocation2 + $0x4a] sm:$0xff]  ;;  %v4509_v30 = vld [vmem:[#allocation2 + $0x52] sm:$0xff] }
 0xb0a   :  { %v4519_v13 = vpack.c.bf16 %v4507_v47, %v4506_v25  ;;  %v4520_v7 = vpack.c.bf16 %v4509_v30, %v4508_v28  ;;  %v4510_v4 = vld [vmem:[#allocation2 + $0x5a] sm:$0xff]  ;;  %v4511_v59 = vld [vmem:[#allocation2 + $0x62] sm:$0xff]  ;;  %v4513_v50 = vld [vmem:[#allocation2 + $0x72] sm:$0xff] }
 0xb0b   :  { %5620 = vmatpush3.bf16.msra.mxu0 %v4229_v39  ;;  %v4512_v39 = vld [vmem:[#allocation2 + $0x6a] sm:$0xff]  ;;  %v4521_v34 = vpack.c.bf16 %v4511_v59, %v4510_v4  ;;  %v4515_v43 = vld [vmem:[#allocation2 + $0x82] sm:$0xff]  ;;  %v7667_v61 = vld [vmem:[%s7761_s12] ss:$0 sm:$0xff] }
 0xb0c   :  { %5637 = vmatprep.subr.bf16.mxu0 %v4524_v53  ;;  %v4522_v19 = vpack.c.bf16 %v4513_v50, %v4512_v39 }
 0xb0e   :  { %5606 = vmatmul.mubr.msk.bf16.gmra.mrb[52].mxu0 %vm95_vm0, %v4251_v49 }
 0xb0f   :  { %5609 = vmatprep.mubr.msk.bf16.mxu0 %vm95_vm0, %v4252_v26 }
 0xb16   :  { %5610 = vmatmul.mubr.msk.bf16.gmra.mrb[56].mxu0 %vm95_vm0, %v4253_v37 }
 0xb17   :  { %5621 = vmatprep.mubr.msk.bf16.mxu0 %vm95_vm0, %v4218_v48 }
 0xb1e   :  { %5622 = vmatmul.mubr.msk.bf16.vlgmr.msra.gmra.mrb[44].mxu0 %vm95_vm0, %v4219_v58 }
 0xb1f   :  { %5625 = vmatprep.mubr.msk.bf16.mxu0 %vm95_vm0, %v4220_v9  ;;  %5638 = vmatpush3.bf16.msra.mxu0 %v4524_v53  ;;  %v4514_v53 = vld [vmem:[#allocation2 + $0x7a] sm:$0xff] }
 0xb20   :  { %5639 = vmatprep.subr.bf16.mxu0 %v4525_v2  ;;  %v4523_v16 = vpack.c.bf16 %v4515_v43, %v4514_v53 }
 0xb23   :  { %5640 = vmatpush3.bf16.msra.mxu0 %v4525_v2 }
 0xb24   :  { %5641 = vmatprep.subr.bf16.mxu0 %v4526_v18 }
 0xb26   :  { %5626 = vmatmul.mubr.msk.bf16.gmra.mrb[48].mxu0 %vm95_vm0, %v4221_v6 }
 0xb27   :  { %5629 = vmatprep.mubr.msk.bf16.mxu0 %vm95_vm0, %v4222_v33  ;;  %5642 = vmatpush3.bf16.msra.mxu0 %v4526_v18 }
 0xb28   :  { %5643 = vmatprep.subr.bf16.mxu0 %v4527_v62 }
 0xb2b   :  { %5644 = vmatpush3.bf16.msra.mxu0 %v4527_v62 }
 0xb2e   :  { %5630 = vmatmul.mubr.msk.bf16.gmra.mrb[52].mxu0 %vm95_vm0, %v4223_v3 }
 0xb2f   :  { %5633 = vmatprep.mubr.msk.bf16.mxu0 %vm95_vm0, %v4224_v20 }
 0xb36   :  { %5634 = vmatmul.mubr.msk.bf16.gmra.mrb[56].mxu0 %vm95_vm0, %v4225_v36 }
 0xb37   :  { %5645 = vmatprep.mubr.msk.bf16.mxu0 %vm95_vm0, %v4516_v15 }
 0xb3e   :  { %5646 = vmatmul.mubr.msk.bf16.vlgmr.msra.gmra.mrb[44].mxu0 %vm95_vm0, %v4517_v8 }
 0xb3f   :  { %5649 = vmatprep.mubr.msk.bf16.mxu0 %vm95_vm0, %v4518_v10 }
 0xb46   :  { %5650 = vmatmul.mubr.msk.bf16.gmra.mrb[48].mxu0 %vm95_vm0, %v4519_v13 }
 0xb47   :  { %5653 = vmatprep.mubr.msk.bf16.mxu0 %vm95_vm0, %v4520_v7 }
 0xb4e   :  { %5654 = vmatmul.mubr.msk.bf16.gmra.mrb[52].mxu0 %vm95_vm0, %v4521_v34 }
 0xb4f   :  { %5657 = vmatprep.mubr.msk.bf16.mxu0 %vm95_vm0, %v4522_v19 }
 0xb56   :  { %5658 = vmatmul.mubr.msk.bf16.gmra.mrb[56].mxu0 %vm95_vm0, %v4523_v16 }
 0xc11   :  { %v5647_v27 = vpop.f32.mrb[44].mxu0 }
 0xc12   :  { %v4674_v49 = vadd.f32 %v5647_v27, %v7667_v61  ;;  %v4586_v26 = vpop.f32.mrb[45].mxu0 }
 0xc13   :  { %v4672_v51 = vadd.f32 %v7667_v61, %v4586_v26  ;;  %v5648_v1 = vpop.f32.mrb[46].mxu0 }
 0xc14   :  { %5887 = vtanh.f32 %v4674_v49  ;;  %v4675_v5 = vadd.f32 %v5648_v1, %v7667_v61  ;;  %v4589_v60 = vpop.f32.mrb[47].mxu0 }
 0xc15   :  { %5889 = vtanh.f32 %v4672_v51  ;;  %v4673_v37 = vadd.f32 %v7667_v61, %v4589_v60 }
 0xc16   :  { %5891 = vtanh.f32 %v4675_v5 }
 0xc17   :  { %5893 = vtanh.f32 %v4673_v37 }
 0xc19   :  { %v5651_v48 = vpop.f32.mrb[48].mxu0 }
 0xc1a   :  { %v4678_v55 = vadd.f32 %v5651_v48, %v7667_v61  ;;  %v4602_v17 = vpop.f32.mrb[49].mxu0 }
 0xc1b   :  { %v4676_v52 = vadd.f32 %v7667_v61, %v4602_v17  ;;  %v5652_v46 = vpop.f32.mrb[50].mxu0 }
 0xc1c   :  { %5895 = vtanh.f32 %v4678_v55  ;;  %v4679_v11 = vadd.f32 %v5652_v46, %v7667_v61  ;;  %v4605_v54 = vpop.f32.mrb[51].mxu0 }
 0xc1d   :  { %5897 = vtanh.f32 %v4676_v52  ;;  %v4677_v58 = vadd.f32 %v7667_v61, %v4605_v54 }
 0xc1e   :  { %v5888_v2 = vpop.eup %5887  ;;  %5899 = vtanh.f32 %v4679_v11 }
 0xc1f   :  { %v5890_v9 = vpop.eup %5889  ;;  %v4706_v38 = vmul.f32 0.5, %v5888_v2  ;;  %5901 = vtanh.f32 %v4677_v58 }
 0xc20   :  { %v5892_v12 = vpop.eup %5891  ;;  %v4704_v18 = vmul.f32 0.5, %v5890_v9 }
 0xc21   :  { %v5894_v21 = vpop.eup %5893  ;;  %4722 = vst.msk [vmem:[%s7762_s13 + $0x10] sm:$0xff] %vm114_vm1, %v4706_v38  ;;  %v4707_v40 = vmul.f32 0.5, %v5892_v12  ;;  %v5655_v57 = vpop.f32.mrb[52].mxu0 }
 0xc22   :  { %4720 = vst.msk [vmem:[%s7762_s13] sm:$0xff] %vm114_vm1, %v4704_v18  ;;  %v4705_v14 = vmul.f32 0.5, %v5894_v21  ;;  %v4682_v63 = vadd.f32 %v5655_v57, %v7667_v61  ;;  %v4618_v24 = vpop.f32.mrb[53].mxu0 }
 0xc23   :  { %4723 = vst.msk [vmem:[%s7762_s13 + $0x18] sm:$0xff] %vm114_vm1, %v4707_v40  ;;  %v4680_v6 = vadd.f32 %v7667_v61, %v4618_v24  ;;  %v5656_v62 = vpop.f32.mrb[54].mxu0 }
 0xc24   :  { %4721 = vst.msk [vmem:[%s7762_s13 + $0x8] sm:$0xff] %vm114_vm1, %v4705_v14  ;;  %5903 = vtanh.f32 %v4682_v63  ;;  %v4683_v33 = vadd.f32 %v5656_v62, %v7667_v61  ;;  %v4621_v32 = vpop.f32.mrb[55].mxu0 }
 0xc25   :  { %5905 = vtanh.f32 %v4680_v6  ;;  %v4681_v0 = vadd.f32 %v7667_v61, %v4621_v32 }
 0xc26   :  { %v5896_v42 = vpop.eup %5895  ;;  %5907 = vtanh.f32 %v4683_v33 }
 0xc27   :  { %v5898_v23 = vpop.eup %5897  ;;  %v4710_v3 = vmul.f32 0.5, %v5896_v42  ;;  %5909 = vtanh.f32 %v4681_v0 }
 0xc28   :  { %v5900_v20 = vpop.eup %5899  ;;  %v4708_v31 = vmul.f32 0.5, %v5898_v23 }
 0xc29   :  { %v5902_v45 = vpop.eup %5901  ;;  %4726 = vst.msk [vmem:[%s7762_s13 + $0x30] sm:$0xff] %vm114_vm1, %v4710_v3  ;;  %v4711_v29 = vmul.f32 0.5, %v5900_v20  ;;  %v5659_v41 = vpop.f32.mrb[56].mxu0 }
 0xc2a   :  { %4724 = vst.msk [vmem:[%s7762_s13 + $0x20] sm:$0xff] %vm114_vm1, %v4708_v31  ;;  %v4709_v36 = vmul.f32 0.5, %v5902_v45  ;;  %v4686_v15 = vadd.f32 %v5659_v41, %v7667_v61  ;;  %v4634_v35 = vpop.f32.mrb[57].mxu0 }
 0xc2b   :  { %4727 = vst.msk [vmem:[%s7762_s13 + $0x38] sm:$0xff] %vm114_vm1, %v4711_v29  ;;  %v4684_v44 = vadd.f32 %v7667_v61, %v4634_v35  ;;  %v5660_v22 = vpop.f32.mrb[58].mxu0 }
 0xc2c   :  { %4725 = vst.msk [vmem:[%s7762_s13 + $0x28] sm:$0xff] %vm114_vm1, %v4709_v36  ;;  %5911 = vtanh.f32 %v4686_v15  ;;  %v4687_v56 = vadd.f32 %v5660_v22, %v7667_v61  ;;  %v4637_v8 = vpop.f32.mrb[59].mxu0 }
 0xc2d   :  { %5913 = vtanh.f32 %v4684_v44  ;;  %v4685_v10 = vadd.f32 %v7667_v61, %v4637_v8 }
 0xc2e   :  { %v5904_v25 = vpop.eup %5903  ;;  %5915 = vtanh.f32 %v4687_v56 }
 0xc2f   :  { %v5906_v47 = vpop.eup %5905  ;;  %v4714_v28 = vmul.f32 0.5, %v5904_v25  ;;  %5917 = vtanh.f32 %v4685_v10 }
 0xc30   :  { %v5908_v30 = vpop.eup %5907  ;;  %v4712_v13 = vmul.f32 0.5, %v5906_v47 }
 0xc31   :  { %v5910_v7 = vpop.eup %5909  ;;  %4730 = vst.msk [vmem:[%s7762_s13 + $0x50] sm:$0xff] %vm114_vm1, %v4714_v28  ;;  %v4715_v4 = vmul.f32 0.5, %v5908_v30 }
 0xc32   :  { %4728 = vst.msk [vmem:[%s7762_s13 + $0x40] sm:$0xff] %vm114_vm1, %v4712_v13  ;;  %v4713_v59 = vmul.f32 0.5, %v5910_v7 }
 0xc33   :  { %4731 = vst.msk [vmem:[%s7762_s13 + $0x58] sm:$0xff] %vm114_vm1, %v4715_v4 }
 0xc34   :  { %4729 = vst.msk [vmem:[%s7762_s13 + $0x48] sm:$0xff] %vm114_vm1, %v4713_v59 }
 0xc36   :  { %v5912_v39 = vpop.eup %5911 }
 0xc37   :  { %v5914_v50 = vpop.eup %5913  ;;  %v4718_v34 = vmul.f32 0.5, %v5912_v39 }
 0xc38   :  { %v5916_v19 = vpop.eup %5915  ;;  %v4716_v53 = vmul.f32 0.5, %v5914_v50 }
 0xc39   :  { %v5918_v43 = vpop.eup %5917  ;;  %4734 = vst.msk [vmem:[%s7762_s13 + $0x70] sm:$0xff] %vm114_vm1, %v4718_v34  ;;  %v4719_v16 = vmul.f32 0.5, %v5916_v19 }
 0xc3a   :  { %4732 = vst.msk [vmem:[%s7762_s13 + $0x60] sm:$0xff] %vm114_vm1, %v4716_v53  ;;  %v4717_v61 = vmul.f32 0.5, %v5918_v43 }
 0xc3b   :  { %4735 = vst.msk [vmem:[%s7762_s13 + $0x78] sm:$0xff] %vm114_vm1, %v4719_v16 }
 0xc3c   :  { %4733 = vst.msk [vmem:[%s7762_s13 + $0x68] sm:$0xff] %vm114_vm1, %v4717_v61 }
 0xc3d   :  { %4740 = vsyncpa [#allocation4], 1 }
 0xc3e   :  { %4741 = vsyncpa [#allocation6], 1 }

</bundles_post_ra>
